<compile_context>
chip_gen: v6e
topology: v6e:2x2x1
jax: 0.10.0
libtpu: 0.0.40
codegen_flags: <defaults>
</compile_context>

<pallas_src>
import functools

import jax
import jax.numpy as jnp
from jax.experimental import pallas as pl
from jax.experimental.pallas import tpu as pltpu

# ---- configuration consistent with PViT.__init__ ----
IMAGE_SIZE = 16
PATCH_SIZE = 4
CHANNELS = 3
NUM_CLASSES = 10
DIM = 32
DEPTH = 2
HEADS = 4
DIM_HEAD = 8
MLP_DIM = 64
ALPHA_WEIGHT = 0.5          # args.alpha_weight
POOL = "cls"

NUM_PATCHES = (IMAGE_SIZE // PATCH_SIZE) ** 2          # 16
PATCH_DIM = CHANNELS * PATCH_SIZE * PATCH_SIZE         # 48  (!= DIM -> linear path)
INNER = HEADS * DIM_HEAD                               # 32
SEQ = NUM_PATCHES + 2                                  # patches + cls + prior token
EPS = 1e-5


# ---------------------------------------------------------------------------
# in-kernel helper
# ---------------------------------------------------------------------------
def _ln(x, g, b):
    """LayerNorm over last dim, PyTorch semantics (biased var, eps=1e-5)."""
    mu = jnp.mean(x, axis=-1, keepdims=True)
    var = jnp.mean((x - mu) ** 2, axis=-1, keepdims=True)
    return (x - mu) * jax.lax.rsqrt(var + EPS) * g + b


# ---------------------------------------------------------------------------
# single fused kernel: whole PViT forward for one batch tile
# ---------------------------------------------------------------------------
def _pvit_fused_kernel(
    # batched inputs
    patches_ref, prior_ref,
    # patch embedding params
    pe_g1, pe_b1, pe_w, pe_bw, pe_g2, pe_b2,
    # tokens / positional embedding / prior projection
    cls_tok, pos_cls, pos_patch, prior_w, prior_bw,
    # scalar (SMEM)
    scale_f,
    # stacked per-layer transformer params (leading dim = layer)
    attn_g, attn_b, wqkv, wo, bo, ff_g, ff_b, w1, b1, w2, b2,
    # final norm + head
    norm_g, norm_b, head_w, head_b,
    # outputs
    prior_fes_ref, pooled_ref, logits_ref,
    # scratch
    seq_ref,
    *, heads):
    f32 = jnp.float32
    bt, n, patch_dim = patches_ref.shape
    _, s_pad, d = seq_ref.shape
    depth, _, inner3 = wqkv.shape
    inner = inner3 // 3
    dh = inner // heads
    seq = n + 2
    nc = prior_ref.shape[-1]

    # ---------------- patch embedding: LN -> Linear -> LN ----------------
    p2 = patches_ref[...].reshape(bt * n, patch_dim)              # n % 8 == 0 -> aligned
    x = _ln(p2, pe_g1[...], pe_b1[...])
    x = jnp.dot(x, pe_w[...], preferred_element_type=f32) + pe_bw[...]
    x = _ln(x, pe_g2[...], pe_b2[...])
    x = x.reshape(bt, n, d)

    # ---------------- prior: softmax (exact) -> Linear ----------------
    pr = prior_ref[...].reshape(bt, nc)
    pr = pr - jnp.max(pr, axis=-1, keepdims=True)
    ep = jnp.exp(pr)
    sm = ep / jnp.sum(ep, axis=-1, keepdims=True)                 # exact: visible output
    prior_fes = jnp.dot(sm, prior_w[...], preferred_element_type=f32) + prior_bw[...]
    prior_fes_ref[...] = prior_fes[:, None, :]

    # -------- assemble [patches(0..n-1) | cls(n) | prior(n+1) | zero pad] --------
    seq_ref[:, 0:n, :] = x + pos_patch[...][None, :, :]           # aligned bulk store
    cls_row = cls_tok[...] + pos_cls[...]                         # (1, d)
    seq_ref[:, n:n + 1, :] = jnp.broadcast_to(cls_row[None, :, :], (bt, 1, d))
    seq_ref[:, n + 1:n + 2, :] = (prior_fes * scale_f[0, 0])[:, None, :]
    if s_pad > seq:
        seq_ref[:, seq:, :] = jnp.zeros((bt, s_pad - seq, d), f32)  # keep: avoids NaN in V

    x2 = seq_ref[...].reshape(bt * s_pad, d)                      # (bt*s_pad, d)

    # padded key columns must get zero attention weight
    key_ids = jax.lax.broadcasted_iota(jnp.int32, (1, 1, s_pad), 2)
    key_valid = key_ids < seq

    # ---------------- transformer layers (unrolled, stacked weights) ----------------
    for l in range(depth):
        # ---- Attention (dh**-0.5 already folded into Q columns of wqkv) ----
        xn = _ln(x2, attn_g[l], attn_b[l])
        qkv = jnp.dot(xn, wqkv[l], preferred_element_type=f32)
        qkv = qkv.reshape(bt, s_pad, 3 * inner)
        wo_l = wo[l]                                              # (inner, d)
        attn_acc = None
        for h in range(heads):                                    # static, lane slices only
            qh = qkv[:, :, h * dh:(h + 1) * dh]
            kh = qkv[:, :, inner + h * dh:inner + (h + 1) * dh]
            vh = qkv[:, :, 2 * inner + h * dh:2 * inner + (h + 1) * dh]
            dots = jnp.einsum("bqd,bkd->bqk", qh, kh, preferred_element_type=f32)
            dots = jnp.where(key_valid, dots, -1e30)
            dots = dots - jnp.max(dots, axis=-1, keepdims=True)
            e = jnp.exp(dots)
            attn = e * pl.reciprocal(jnp.sum(e, axis=-1, keepdims=True), approx=True)
            oh = jnp.einsum("bqk,bkd->bqd", attn, vh, preferred_element_type=f32)
            part = jnp.dot(oh.reshape(bt * s_pad, dh),
                           wo_l[h * dh:(h + 1) * dh, :],
                           preferred_element_type=f32)            # per-head output proj
            attn_acc = part if attn_acc is None else attn_acc + part
        x2 = x2 + attn_acc + bo[l]                                # residual

        # ---- FeedForward ----
        xn = _ln(x2, ff_g[l], ff_b[l])
        h1 = jnp.dot(xn, w1[l], preferred_element_type=f32) + b1[l]
        h1 = jax.nn.gelu(h1, approximate=True)                    # tanh form -> EUP slot
        y = jnp.dot(h1, w2[l], preferred_element_type=f32) + b2[l]
        x2 = x2 + y                                               # residual

    # ---------------- final norm + cls pooling + mlp_head (cls rows only) ----------------
    seq_ref[...] = x2.reshape(bt, s_pad, d)                       # write back residual stream
    cls_x = seq_ref[:, n:n + 1, :].reshape(bt, d)                 # 8-aligned pooled row
    cls_n = _ln(cls_x, norm_g[...], norm_b[...])
    pooled_ref[...] = cls_n[:, None, :]
    logits_ref[...] = (jnp.dot(cls_n, head_w[...], preferred_element_type=f32)
                       + head_b[...])[:, None, :]


# ---------------------------------------------------------------------------
# wrapper: one pallas_call for the whole forward
# ---------------------------------------------------------------------------
def _full_spec(a):
    nd = a.ndim
    return pl.BlockSpec(a.shape, lambda i, _nd=nd: (0,) * _nd)


def pvit_forward(params, img, prior, *, batch_tile=None):
    B, C, H, W = img.shape
    hp, wp = H // PATCH_SIZE, W // PATCH_SIZE
    n = hp * wp
    # Rearrange('b c (h p1) (w p2) -> b (h w) (p1 p2 c)')
    patches = img.reshape(B, C, hp, PATCH_SIZE, wp, PATCH_SIZE)
    patches = patches.transpose(0, 2, 4, 3, 5, 1).reshape(B, n, PATCH_DIM)

    # default batch tile: largest divisor of B (capped at 128) that gives >= 2
    # grid steps, so DMA pipelines and the parallel axis has work for 2 TCs.
    if batch_tile is None:
        bt = 1 if B > 1 else B
        limit = min(128, B // 2) if B >= 2 else B
        for cand in range(limit, 0, -1):
            if B % cand == 0:
                bt = cand
                break
    else:
        bt = batch_tile
    assert B % bt == 0, "batch must be divisible by batch_tile"
    n_steps = B // bt
    s_pad = ((n + 2 + 7) // 8) * 8                    # pad sequence to a sublane multiple

    D = params["pe_w"].shape[1]
    NC = params["head_w"].shape[1]

    pos = params["pos_embedding"][0]                  # (num_patches + 2, D)

    # fold the attention scale into the Q columns of the (tiny) qkv weight once
    wqkv = params["wqkv"]
    inner = wqkv.shape[-1] // 3
    scale = float(DIM_HEAD) ** -0.5
    wqkv_scaled = jnp.concatenate([wqkv[..., :inner] * scale, wqkv[..., inner:]], axis=-1)

    weights_a = (
        params["pe_g1"], params["pe_b1"], params["pe_w"], params["pe_bw"],
        params["pe_g2"], params["pe_b2"],
        params["cls_token"][0], pos[0:1], pos[1:n + 1],
        params["prior_w"], params["prior_bw"],
    )
    scale_arr = params["scale_factor"].reshape(1, 1)
    weights_b = (
        params["attn_g"], params["attn_b"], wqkv_scaled, params["wo"], params["bo"],
        params["ff_g"], params["ff_b"], params["w1"], params["b1"],
        params["w2"], params["b2"],
        params["norm_g"], params["norm_b"], params["head_w"], params["head_b"],
    )

    # keep the batch-tiled axis outside the last two dims for the small 2-D
    # tensors so block last-two dims always equal the full array's last-two dims
    prior3 = prior.reshape(B, 1, NC)

    def batched_spec(full_shape):
        nd = len(full_shape)
        return pl.BlockSpec((bt,) + tuple(full_shape[1:]),
                            lambda i, _nd=nd: (i,) + (0,) * (_nd - 1))

    kernel = functools.partial(_pvit_fused_kernel, heads=HEADS)

    prior_fes, pooled, logits = pl.pallas_call(
        kernel,
        out_shape=(
            jax.ShapeDtypeStruct((B, 1, D), jnp.float32),
            jax.ShapeDtypeStruct((B, 1, D), jnp.float32),
            jax.ShapeDtypeStruct((B, 1, NC), jnp.float32),
        ),
        grid=(n_steps,),
        in_specs=(
            [batched_spec(patches.shape), batched_spec(prior3.shape)]
            + [_full_spec(a) for a in weights_a]
            + [pl.BlockSpec(memory_space=pltpu.MemorySpace.SMEM)]   # scale_factor scalar
            + [_full_spec(a) for a in weights_b]),
        out_specs=(
            pl.BlockSpec((bt, 1, D), lambda i: (i, 0, 0)),
            pl.BlockSpec((bt, 1, D), lambda i: (i, 0, 0)),
            pl.BlockSpec((bt, 1, NC), lambda i: (i, 0, 0)),
        ),
        scratch_shapes=[
            pltpu.VMEM((bt, s_pad, D), jnp.float32),      # residual-stream buffer
        ],
        compiler_params=pltpu.CompilerParams(
            dimension_semantics=("parallel",)),
    )(patches, prior3, *weights_a, scale_arr, *weights_b)
    return prior_fes[:, 0], pooled[:, 0], logits[:, 0]


# ---------------------------------------------------------------------------
# deterministic parameter init (synthetic, matching the module's shapes)
# ---------------------------------------------------------------------------
def init_params(key):
    def nrm(k, shape, scale=0.1):
        return scale * jax.random.normal(k, shape, jnp.float32)

    ks = iter(jax.random.split(key, 64))
    L = DEPTH
    p = {
        "pe_g1": jnp.ones((1, PATCH_DIM), jnp.float32),
        "pe_b1": jnp.zeros((1, PATCH_DIM), jnp.float32),
        "pe_w": nrm(next(ks), (PATCH_DIM, DIM)),
        "pe_bw": nrm(next(ks), (1, DIM)),
        "pe_g2": jnp.ones((1, DIM), jnp.float32),
        "pe_b2": jnp.zeros((1, DIM), jnp.float32),
        "pos_embedding": jax.random.normal(next(ks), (1, NUM_PATCHES + 2, DIM), jnp.float32),
        "cls_token": jax.random.normal(next(ks), (1, 1, DIM), jnp.float32),
        "prior_w": nrm(next(ks), (NUM_CLASSES, DIM)),
        "prior_bw": nrm(next(ks), (1, DIM)),
        "scale_factor": jnp.full((1,), ALPHA_WEIGHT, jnp.float32),
        "norm_g": jnp.ones((1, DIM), jnp.float32),
        "norm_b": jnp.zeros((1, DIM), jnp.float32),
        "head_w": nrm(next(ks), (DIM, NUM_CLASSES)),
        "head_b": nrm(next(ks), (1, NUM_CLASSES)),
        # stacked per-layer transformer weights (leading axis = layer)
        "attn_g": jnp.ones((L, 1, DIM), jnp.float32),
        "attn_b": jnp.zeros((L, 1, DIM), jnp.float32),
        "wqkv": nrm(next(ks), (L, DIM, 3 * INNER)),
        "wo": nrm(next(ks), (L, INNER, DIM)),
        "bo": nrm(next(ks), (L, 1, DIM)),
        "ff_g": jnp.ones((L, 1, DIM), jnp.float32),
        "ff_b": jnp.zeros((L, 1, DIM), jnp.float32),
        "w1": nrm(next(ks), (L, DIM, MLP_DIM)),
        "b1": nrm(next(ks), (L, 1, MLP_DIM)),
        "w2": nrm(next(ks), (L, MLP_DIM, DIM)),
        "b2": nrm(next(ks), (L, 1, DIM)),
    }
    return p


# ---------------------------------------------------------------------------
# pure-JAX reference (PyTorch semantics: exact GELU, exact softmax)
# ---------------------------------------------------------------------------
def _ln_ref(x, g, b):
    mu = x.mean(-1, keepdims=True)
    var = ((x - mu) ** 2).mean(-1, keepdims=True)
    return (x - mu) / jnp.sqrt(var + EPS) * g + b


def pvit_reference(params, img, prior):
    with jax.default_matmul_precision("highest"):
        B = img.shape[0]
        hp = wp = IMAGE_SIZE // PATCH_SIZE
        patches = img.reshape(B, CHANNELS, hp, PATCH_SIZE, wp, PATCH_SIZE)
        patches = patches.transpose(0, 2, 4, 3, 5, 1).reshape(B, hp * wp, PATCH_DIM)
        x = _ln_ref(patches, params["pe_g1"][0], params["pe_b1"][0])
        x = x @ params["pe_w"] + params["pe_bw"][0]
        x = _ln_ref(x, params["pe_g2"][0], params["pe_b2"][0])
        cls = jnp.broadcast_to(params["cls_token"], (B, 1, DIM))
        x = jnp.concatenate([cls, x], axis=1)
        x = x + params["pos_embedding"][:, : x.shape[1]]
        sm = jax.nn.softmax(prior, axis=-1)
        prior_fes = sm @ params["prior_w"] + params["prior_bw"][0]
        x = jnp.concatenate(
            [x, prior_fes[:, None, :] * params["scale_factor"]], axis=1)
        for l in range(DEPTH):
            xn = _ln_ref(x, params["attn_g"][l, 0], params["attn_b"][l, 0])
            qkv = xn @ params["wqkv"][l]
            q, k, v = jnp.split(qkv, 3, axis=-1)
            th = lambda t: t.reshape(B, SEQ, HEADS, DIM_HEAD).transpose(0, 2, 1, 3)
            q, k, v = th(q), th(k), th(v)
            dots = jnp.einsum("bhnd,bhmd->bhnm", q, k) * DIM_HEAD ** (-0.5)
            attn = jax.nn.softmax(dots, axis=-1)
            out = jnp.einsum("bhnm,bhmd->bhnd", attn, v)
            out = out.transpose(0, 2, 1, 3).reshape(B, SEQ, INNER)
            x = out @ params["wo"][l] + params["bo"][l, 0] + x
            xn = _ln_ref(x, params["ff_g"][l, 0], params["ff_b"][l, 0])
            h1 = jax.nn.gelu(xn @ params["w1"][l] + params["b1"][l, 0], approximate=False)
            x = h1 @ params["w2"][l] + params["b2"][l, 0] + x
        x = _ln_ref(x, params["norm_g"][0], params["norm_b"][0])
        pooled = x[:, 0]
        logits = pooled @ params["head_w"] + params["head_b"][0]
        return prior_fes, pooled, logits


if __name__ == "__main__":
    key = jax.random.PRNGKey(0)
    kp, ki, kr = jax.random.split(key, 3)
    params = init_params(kp)
    img = jax.random.normal(ki, (2, CHANNELS, IMAGE_SIZE, IMAGE_SIZE), jnp.float32)
    prior = jax.random.normal(kr, (2, NUM_CLASSES), jnp.float32)

    fwd = jax.jit(pvit_forward)
    outputs = jax.block_until_ready(fwd(params, img, prior))
    prior_fes, pooled, logits = outputs

    ref = pvit_reference(params, img, prior)
    names = ("prior_fes", "pooled", "logits")
    for name, a, b in zip(names, outputs, ref):
        assert a.shape == b.shape, (name, a.shape, b.shape)
        err = float(jnp.max(jnp.abs(a - b)))
        assert jnp.allclose(a, b, atol=2e-2, rtol=2e-2), (name, err)

    print("KERNEL_OK")
</pallas_src>

<mosaic_0001>
module attributes {stable_mosaic.version = 11 : i64} {
  func.func @_pvit_fused_kernel(%arg0: i32, %arg1: memref<1x16x48xf32, #tpu.memory_space<vmem>>, %arg2: memref<1x1x10xf32, #tpu.memory_space<vmem>>, %arg3: memref<1x48xf32, #tpu.memory_space<vmem>>, %arg4: memref<1x48xf32, #tpu.memory_space<vmem>>, %arg5: memref<48x32xf32, #tpu.memory_space<vmem>>, %arg6: memref<1x32xf32, #tpu.memory_space<vmem>>, %arg7: memref<1x32xf32, #tpu.memory_space<vmem>>, %arg8: memref<1x32xf32, #tpu.memory_space<vmem>>, %arg9: memref<1x32xf32, #tpu.memory_space<vmem>>, %arg10: memref<1x32xf32, #tpu.memory_space<vmem>>, %arg11: memref<16x32xf32, #tpu.memory_space<vmem>>, %arg12: memref<10x32xf32, #tpu.memory_space<vmem>>, %arg13: memref<1x32xf32, #tpu.memory_space<vmem>>, %arg14: memref<1x1xf32, #tpu.memory_space<smem>>, %arg15: memref<2x1x32xf32, #tpu.memory_space<vmem>>, %arg16: memref<2x1x32xf32, #tpu.memory_space<vmem>>, %arg17: memref<2x32x96xf32, #tpu.memory_space<vmem>>, %arg18: memref<2x32x32xf32, #tpu.memory_space<vmem>>, %arg19: memref<2x1x32xf32, #tpu.memory_space<vmem>>, %arg20: memref<2x1x32xf32, #tpu.memory_space<vmem>>, %arg21: memref<2x1x32xf32, #tpu.memory_space<vmem>>, %arg22: memref<2x32x64xf32, #tpu.memory_space<vmem>>, %arg23: memref<2x1x64xf32, #tpu.memory_space<vmem>>, %arg24: memref<2x64x32xf32, #tpu.memory_space<vmem>>, %arg25: memref<2x1x32xf32, #tpu.memory_space<vmem>>, %arg26: memref<1x32xf32, #tpu.memory_space<vmem>>, %arg27: memref<1x32xf32, #tpu.memory_space<vmem>>, %arg28: memref<32x10xf32, #tpu.memory_space<vmem>>, %arg29: memref<1x10xf32, #tpu.memory_space<vmem>>, %arg30: memref<1x1x32xf32, #tpu.memory_space<vmem>>, %arg31: memref<1x1x32xf32, #tpu.memory_space<vmem>>, %arg32: memref<1x1x10xf32, #tpu.memory_space<vmem>>, %arg33: memref<1x24x32xf32, #tpu.memory_space<vmem>>) attributes {dimension_semantics = [#tpu.dimension_semantics<parallel>], iteration_bounds = array<i64: 2>, scalar_prefetch = 0 : i64, scratch_operands = 1 : i64, tpu.core_type = #tpu.core_type<tc>, window_params = [{transform_indices = @transform_0, window_bounds = array<i64: 1, 16, 48>}, {transform_indices = @transform_1, window_bounds = array<i64: 1, 1, 10>}, {pipeline_mode = #tpu.pipeline_mode<synchronous>, transform_indices = @transform_2, window_bounds = array<i64: 1, 48>}, {pipeline_mode = #tpu.pipeline_mode<synchronous>, transform_indices = @transform_3, window_bounds = array<i64: 1, 48>}, {pipeline_mode = #tpu.pipeline_mode<synchronous>, transform_indices = @transform_4, window_bounds = array<i64: 48, 32>}, {pipeline_mode = #tpu.pipeline_mode<synchronous>, transform_indices = @transform_5, window_bounds = array<i64: 1, 32>}, {pipeline_mode = #tpu.pipeline_mode<synchronous>, transform_indices = @transform_6, window_bounds = array<i64: 1, 32>}, {pipeline_mode = #tpu.pipeline_mode<synchronous>, transform_indices = @transform_7, window_bounds = array<i64: 1, 32>}, {pipeline_mode = #tpu.pipeline_mode<synchronous>, transform_indices = @transform_8, window_bounds = array<i64: 1, 32>}, {pipeline_mode = #tpu.pipeline_mode<synchronous>, transform_indices = @transform_9, window_bounds = array<i64: 1, 32>}, {pipeline_mode = #tpu.pipeline_mode<synchronous>, transform_indices = @transform_10, window_bounds = array<i64: 16, 32>}, {pipeline_mode = #tpu.pipeline_mode<synchronous>, transform_indices = @transform_11, window_bounds = array<i64: 10, 32>}, {pipeline_mode = #tpu.pipeline_mode<synchronous>, transform_indices = @transform_12, window_bounds = array<i64: 1, 32>}, {transform_indices = @transform_13, window_bounds = array<i64: 1, 1>}, {pipeline_mode = #tpu.pipeline_mode<synchronous>, transform_indices = @transform_14, window_bounds = array<i64: 2, 1, 32>}, {pipeline_mode = #tpu.pipeline_mode<synchronous>, transform_indices = @transform_15, window_bounds = array<i64: 2, 1, 32>}, {pipeline_mode = #tpu.pipeline_mode<synchronous>, transform_indices = @transform_16, window_bounds = array<i64: 2, 32, 96>}, {pipeline_mode = #tpu.pipeline_mode<synchronous>, transform_indices = @transform_17, window_bounds = array<i64: 2, 32, 32>}, {pipeline_mode = #tpu.pipeline_mode<synchronous>, transform_indices = @transform_18, window_bounds = array<i64: 2, 1, 32>}, {pipeline_mode = #tpu.pipeline_mode<synchronous>, transform_indices = @transform_19, window_bounds = array<i64: 2, 1, 32>}, {pipeline_mode = #tpu.pipeline_mode<synchronous>, transform_indices = @transform_20, window_bounds = array<i64: 2, 1, 32>}, {pipeline_mode = #tpu.pipeline_mode<synchronous>, transform_indices = @transform_21, window_bounds = array<i64: 2, 32, 64>}, {pipeline_mode = #tpu.pipeline_mode<synchronous>, transform_indices = @transform_22, window_bounds = array<i64: 2, 1, 64>}, {pipeline_mode = #tpu.pipeline_mode<synchronous>, transform_indices = @transform_23, window_bounds = array<i64: 2, 64, 32>}, {pipeline_mode = #tpu.pipeline_mode<synchronous>, transform_indices = @transform_24, window_bounds = array<i64: 2, 1, 32>}, {pipeline_mode = #tpu.pipeline_mode<synchronous>, transform_indices = @transform_25, window_bounds = array<i64: 1, 32>}, {pipeline_mode = #tpu.pipeline_mode<synchronous>, transform_indices = @transform_26, window_bounds = array<i64: 1, 32>}, {pipeline_mode = #tpu.pipeline_mode<synchronous>, transform_indices = @transform_27, window_bounds = array<i64: 32, 10>}, {pipeline_mode = #tpu.pipeline_mode<synchronous>, transform_indices = @transform_28, window_bounds = array<i64: 1, 10>}, {transform_indices = @transform_29, window_bounds = array<i64: 1, 1, 32>}, {transform_indices = @transform_30, window_bounds = array<i64: 1, 1, 32>}, {transform_indices = @transform_31, window_bounds = array<i64: 1, 1, 10>}]} {
    %c0 = arith.constant 0 : index
    %c0_0 = arith.constant 0 : index
    %c0_1 = arith.constant 0 : index
    %0 = vector.load %arg1[%c0, %c0_0, %c0_1] : memref<1x16x48xf32, #tpu.memory_space<vmem>>, vector<1x16x48xf32>
    %1 = vector.shape_cast %0 : vector<1x16x48xf32> to vector<16x48xf32>
    %c0_2 = arith.constant 0 : index
    %c0_3 = arith.constant 0 : index
    %2 = vector.load %arg3[%c0_2, %c0_3] : memref<1x48xf32, #tpu.memory_space<vmem>>, vector<1x48xf32>
    %c0_4 = arith.constant 0 : index
    %c0_5 = arith.constant 0 : index
    %3 = vector.load %arg4[%c0_4, %c0_5] : memref<1x48xf32, #tpu.memory_space<vmem>>, vector<1x48xf32>
    %cst = arith.constant dense<0.000000e+00> : vector<16xf32>
    %4 = vector.multi_reduction <add>, %1, %cst [1] : vector<16x48xf32> to vector<16xf32>
    %5 = vector.shape_cast %4 : vector<16xf32> to vector<16x1xf32>
    %cst_6 = arith.constant 4.800000e+01 : f32
    %6 = vector.broadcast %cst_6 : f32 to vector<16x1xf32>
    %7 = arith.divf %5, %6 : vector<16x1xf32>
    %8 = vector.broadcast %7 : vector<16x1xf32> to vector<16x48xf32>
    %9 = arith.subf %1, %8 : vector<16x48xf32>
    %10 = arith.mulf %9, %9 : vector<16x48xf32>
    %cst_7 = arith.constant dense<0.000000e+00> : vector<16xf32>
    %11 = vector.multi_reduction <add>, %10, %cst_7 [1] : vector<16x48xf32> to vector<16xf32>
    %12 = vector.shape_cast %11 : vector<16xf32> to vector<16x1xf32>
    %cst_8 = arith.constant 4.800000e+01 : f32
    %13 = vector.broadcast %cst_8 : f32 to vector<16x1xf32>
    %14 = arith.divf %12, %13 : vector<16x1xf32>
    %15 = vector.broadcast %7 : vector<16x1xf32> to vector<16x48xf32>
    %16 = arith.subf %1, %15 : vector<16x48xf32>
    %cst_9 = arith.constant 9.99999974E-6 : f32
    %17 = vector.broadcast %cst_9 : f32 to vector<16x1xf32>
    %18 = arith.addf %14, %17 : vector<16x1xf32>
    %19 = math.rsqrt %18 : vector<16x1xf32>
    %20 = vector.broadcast %19 : vector<16x1xf32> to vector<16x48xf32>
    %21 = arith.mulf %16, %20 : vector<16x48xf32>
    %22 = vector.broadcast %2 : vector<1x48xf32> to vector<16x48xf32>
    %23 = arith.mulf %21, %22 : vector<16x48xf32>
    %24 = vector.broadcast %3 : vector<1x48xf32> to vector<16x48xf32>
    %25 = arith.addf %23, %24 : vector<16x48xf32>
    %c0_10 = arith.constant 0 : index
    %c0_11 = arith.constant 0 : index
    %26 = vector.load %arg5[%c0_10, %c0_11] : memref<48x32xf32, #tpu.memory_space<vmem>>, vector<48x32xf32>
    %cst_12 = arith.constant dense<0.000000e+00> : vector<16x32xf32>
    %27 = tpu.matmul %25, %26, %cst_12 {dimension_numbers = #tpu.dot_dimension_numbers<[1], [0], [0], [1], [0, 0, 1, 1], [], []>} : vector<16x48xf32>, vector<48x32xf32>, vector<16x32xf32> -> vector<16x32xf32>
    %c0_13 = arith.constant 0 : index
    %c0_14 = arith.constant 0 : index
    %28 = vector.load %arg6[%c0_13, %c0_14] : memref<1x32xf32, #tpu.memory_space<vmem>>, vector<1x32xf32>
    %29 = vector.broadcast %28 : vector<1x32xf32> to vector<16x32xf32>
    %30 = arith.addf %27, %29 : vector<16x32xf32>
    %c0_15 = arith.constant 0 : index
    %c0_16 = arith.constant 0 : index
    %31 = vector.load %arg7[%c0_15, %c0_16] : memref<1x32xf32, #tpu.memory_space<vmem>>, vector<1x32xf32>
    %c0_17 = arith.constant 0 : index
    %c0_18 = arith.constant 0 : index
    %32 = vector.load %arg8[%c0_17, %c0_18] : memref<1x32xf32, #tpu.memory_space<vmem>>, vector<1x32xf32>
    %cst_19 = arith.constant dense<0.000000e+00> : vector<16xf32>
    %33 = vector.multi_reduction <add>, %30, %cst_19 [1] : vector<16x32xf32> to vector<16xf32>
    %34 = vector.shape_cast %33 : vector<16xf32> to vector<16x1xf32>
    %cst_20 = arith.constant 3.200000e+01 : f32
    %35 = vector.broadcast %cst_20 : f32 to vector<16x1xf32>
    %36 = arith.divf %34, %35 : vector<16x1xf32>
    %37 = vector.broadcast %36 : vector<16x1xf32> to vector<16x32xf32>
    %38 = arith.subf %30, %37 : vector<16x32xf32>
    %39 = arith.mulf %38, %38 : vector<16x32xf32>
    %cst_21 = arith.constant dense<0.000000e+00> : vector<16xf32>
    %40 = vector.multi_reduction <add>, %39, %cst_21 [1] : vector<16x32xf32> to vector<16xf32>
    %41 = vector.shape_cast %40 : vector<16xf32> to vector<16x1xf32>
    %cst_22 = arith.constant 3.200000e+01 : f32
    %42 = vector.broadcast %cst_22 : f32 to vector<16x1xf32>
    %43 = arith.divf %41, %42 : vector<16x1xf32>
    %44 = vector.broadcast %36 : vector<16x1xf32> to vector<16x32xf32>
    %45 = arith.subf %30, %44 : vector<16x32xf32>
    %cst_23 = arith.constant 9.99999974E-6 : f32
    %46 = vector.broadcast %cst_23 : f32 to vector<16x1xf32>
    %47 = arith.addf %43, %46 : vector<16x1xf32>
    %48 = math.rsqrt %47 : vector<16x1xf32>
    %49 = vector.broadcast %48 : vector<16x1xf32> to vector<16x32xf32>
    %50 = arith.mulf %45, %49 : vector<16x32xf32>
    %51 = vector.broadcast %31 : vector<1x32xf32> to vector<16x32xf32>
    %52 = arith.mulf %50, %51 : vector<16x32xf32>
    %53 = vector.broadcast %32 : vector<1x32xf32> to vector<16x32xf32>
    %54 = arith.addf %52, %53 : vector<16x32xf32>
    %55 = vector.shape_cast %54 : vector<16x32xf32> to vector<1x16x32xf32>
    %c0_24 = arith.constant 0 : index
    %c0_25 = arith.constant 0 : index
    %c0_26 = arith.constant 0 : index
    %56 = vector.load %arg2[%c0_24, %c0_25, %c0_26] : memref<1x1x10xf32, #tpu.memory_space<vmem>>, vector<1x1x10xf32>
    %57 = vector.shape_cast %56 : vector<1x1x10xf32> to vector<1x10xf32>
    %cst_27 = arith.constant dense<0xFF800000> : vector<1xf32>
    %58 = vector.multi_reduction <maximumf>, %57, %cst_27 [1] : vector<1x10xf32> to vector<1xf32>
    %59 = vector.shape_cast %58 : vector<1xf32> to vector<1x1xf32>
    %60 = vector.broadcast %59 : vector<1x1xf32> to vector<1x10xf32>
    %61 = arith.subf %57, %60 : vector<1x10xf32>
    %62 = math.exp %61 : vector<1x10xf32>
    %cst_28 = arith.constant dense<0.000000e+00> : vector<1xf32>
    %63 = vector.multi_reduction <add>, %62, %cst_28 [1] : vector<1x10xf32> to vector<1xf32>
    %64 = vector.shape_cast %63 : vector<1xf32> to vector<1x1xf32>
    %65 = vector.broadcast %64 : vector<1x1xf32> to vector<1x10xf32>
    %66 = arith.divf %62, %65 : vector<1x10xf32>
    %c0_29 = arith.constant 0 : index
    %c0_30 = arith.constant 0 : index
    %67 = vector.load %arg12[%c0_29, %c0_30] : memref<10x32xf32, #tpu.memory_space<vmem>>, vector<10x32xf32>
    %cst_31 = arith.constant dense<0.000000e+00> : vector<1x32xf32>
    %68 = tpu.matmul %66, %67, %cst_31 {dimension_numbers = #tpu.dot_dimension_numbers<[1], [0], [0], [1], [0, 0, 1, 1], [], []>} : vector<1x10xf32>, vector<10x32xf32>, vector<1x32xf32> -> vector<1x32xf32>
    %c0_32 = arith.constant 0 : index
    %c0_33 = arith.constant 0 : index
    %69 = vector.load %arg13[%c0_32, %c0_33] : memref<1x32xf32, #tpu.memory_space<vmem>>, vector<1x32xf32>
    %70 = arith.addf %68, %69 : vector<1x32xf32>
    %71 = vector.shape_cast %70 : vector<1x32xf32> to vector<1x1x32xf32>
    %c0_34 = arith.constant 0 : index
    %c0_35 = arith.constant 0 : index
    %c0_36 = arith.constant 0 : index
    %72 = vector.load %arg30[%c0_34, %c0_35, %c0_36] : memref<1x1x32xf32, #tpu.memory_space<vmem>>, vector<1x1x32xf32>
    tpu.vector_store %arg30[%c0_34, %c0_35, %c0_36], %71 {strides = array<i32>} : memref<1x1x32xf32, #tpu.memory_space<vmem>>, vector<1x1x32xf32>,
    %c0_37 = arith.constant 0 : index
    %c0_38 = arith.constant 0 : index
    %73 = vector.load %arg11[%c0_37, %c0_38] : memref<16x32xf32, #tpu.memory_space<vmem>>, vector<16x32xf32>
    %74 = vector.shape_cast %73 : vector<16x32xf32> to vector<1x16x32xf32>
    %75 = arith.addf %55, %74 : vector<1x16x32xf32>
    %c0_39 = arith.constant 0 : index
    %c0_40 = arith.constant 0 : index
    %c0_41 = arith.constant 0 : index
    %76 = vector.load %arg33[%c0_39, %c0_40, %c0_41] : memref<1x24x32xf32, #tpu.memory_space<vmem>>, vector<1x16x32xf32>
    tpu.vector_store %arg33[%c0_39, %c0_40, %c0_41], %75 {strides = array<i32>} : memref<1x24x32xf32, #tpu.memory_space<vmem>>, vector<1x16x32xf32>,
    %c0_42 = arith.constant 0 : index
    %c0_43 = arith.constant 0 : index
    %77 = vector.load %arg9[%c0_42, %c0_43] : memref<1x32xf32, #tpu.memory_space<vmem>>, vector<1x32xf32>
    %c0_44 = arith.constant 0 : index
    %c0_45 = arith.constant 0 : index
    %78 = vector.load %arg10[%c0_44, %c0_45] : memref<1x32xf32, #tpu.memory_space<vmem>>, vector<1x32xf32>
    %79 = arith.addf %77, %78 : vector<1x32xf32>
    %80 = vector.shape_cast %79 : vector<1x32xf32> to vector<1x1x32xf32>
    %c0_46 = arith.constant 0 : index
    %c16 = arith.constant 16 : index
    %c0_47 = arith.constant 0 : index
    %81 = vector.load %arg33[%c0_46, %c16, %c0_47] : memref<1x24x32xf32, #tpu.memory_space<vmem>>, vector<1x1x32xf32>
    tpu.vector_store %arg33[%c0_46, %c16, %c0_47], %80 {strides = array<i32>} : memref<1x24x32xf32, #tpu.memory_space<vmem>>, vector<1x1x32xf32>,
    %c0_48 = arith.constant 0 : index
    %c0_49 = arith.constant 0 : index
    %82 = memref.load %arg14[%c0_48, %c0_49] : memref<1x1xf32, #tpu.memory_space<smem>>
    %83 = vector.broadcast %82 : f32 to vector<1x32xf32>
    %84 = arith.mulf %70, %83 : vector<1x32xf32>
    %85 = vector.shape_cast %84 : vector<1x32xf32> to vector<1x1x32xf32>
    %c0_50 = arith.constant 0 : index
    %c17 = arith.constant 17 : index
    %c0_51 = arith.constant 0 : index
    %86 = vector.load %arg33[%c0_50, %c17, %c0_51] : memref<1x24x32xf32, #tpu.memory_space<vmem>>, vector<1x1x32xf32>
    tpu.vector_store %arg33[%c0_50, %c17, %c0_51], %85 {strides = array<i32>} : memref<1x24x32xf32, #tpu.memory_space<vmem>>, vector<1x1x32xf32>,
    %cst_52 = arith.constant 0.000000e+00 : f32
    %87 = vector.broadcast %cst_52 : f32 to vector<1x6x32xf32>
    %c0_53 = arith.constant 0 : index
    %c18 = arith.constant 18 : index
    %c0_54 = arith.constant 0 : index
    %88 = vector.load %arg33[%c0_53, %c18, %c0_54] : memref<1x24x32xf32, #tpu.memory_space<vmem>>, vector<1x6x32xf32>
    tpu.vector_store %arg33[%c0_53, %c18, %c0_54], %87 {strides = array<i32>} : memref<1x24x32xf32, #tpu.memory_space<vmem>>, vector<1x6x32xf32>,
    %c0_55 = arith.constant 0 : index
    %c0_56 = arith.constant 0 : index
    %c0_57 = arith.constant 0 : index
    %89 = vector.load %arg33[%c0_55, %c0_56, %c0_57] : memref<1x24x32xf32, #tpu.memory_space<vmem>>, vector<1x24x32xf32>
    %90 = vector.shape_cast %89 : vector<1x24x32xf32> to vector<24x32xf32>
    %91 = tpu.iota {dimensions = array<i32: 2>} : vector<1x1x24xi32>
    %c18_i32 = arith.constant 18 : i32
    %92 = vector.broadcast %c18_i32 : i32 to vector<1x1x24xi32>
    %93 = arith.cmpi slt, %91, %92 : vector<1x1x24xi32>
    %c0_58 = arith.constant 0 : index
    %c0_59 = arith.constant 0 : index
    %c0_60 = arith.constant 0 : index
    %94 = vector.load %arg15[%c0_58, %c0_59, %c0_60] : memref<2x1x32xf32, #tpu.memory_space<vmem>>, vector<1x1x32xf32>
    %95 = vector.shape_cast %94 : vector<1x1x32xf32> to vector<1x32xf32>
    %c0_61 = arith.constant 0 : index
    %c0_62 = arith.constant 0 : index
    %c0_63 = arith.constant 0 : index
    %96 = vector.load %arg16[%c0_61, %c0_62, %c0_63] : memref<2x1x32xf32, #tpu.memory_space<vmem>>, vector<1x1x32xf32>
    %97 = vector.shape_cast %96 : vector<1x1x32xf32> to vector<1x32xf32>
    %cst_64 = arith.constant dense<0.000000e+00> : vector<24xf32>
    %98 = vector.multi_reduction <add>, %90, %cst_64 [1] : vector<24x32xf32> to vector<24xf32>
    %99 = vector.shape_cast %98 : vector<24xf32> to vector<24x1xf32>
    %cst_65 = arith.constant 3.200000e+01 : f32
    %100 = vector.broadcast %cst_65 : f32 to vector<24x1xf32>
    %101 = arith.divf %99, %100 : vector<24x1xf32>
    %102 = vector.broadcast %101 : vector<24x1xf32> to vector<24x32xf32>
    %103 = arith.subf %90, %102 : vector<24x32xf32>
    %104 = arith.mulf %103, %103 : vector<24x32xf32>
    %cst_66 = arith.constant dense<0.000000e+00> : vector<24xf32>
    %105 = vector.multi_reduction <add>, %104, %cst_66 [1] : vector<24x32xf32> to vector<24xf32>
    %106 = vector.shape_cast %105 : vector<24xf32> to vector<24x1xf32>
    %cst_67 = arith.constant 3.200000e+01 : f32
    %107 = vector.broadcast %cst_67 : f32 to vector<24x1xf32>
    %108 = arith.divf %106, %107 : vector<24x1xf32>
    %109 = vector.broadcast %101 : vector<24x1xf32> to vector<24x32xf32>
    %110 = arith.subf %90, %109 : vector<24x32xf32>
    %cst_68 = arith.constant 9.99999974E-6 : f32
    %111 = vector.broadcast %cst_68 : f32 to vector<24x1xf32>
    %112 = arith.addf %108, %111 : vector<24x1xf32>
    %113 = math.rsqrt %112 : vector<24x1xf32>
    %114 = vector.broadcast %113 : vector<24x1xf32> to vector<24x32xf32>
    %115 = arith.mulf %110, %114 : vector<24x32xf32>
    %116 = vector.broadcast %95 : vector<1x32xf32> to vector<24x32xf32>
    %117 = arith.mulf %115, %116 : vector<24x32xf32>
    %118 = vector.broadcast %97 : vector<1x32xf32> to vector<24x32xf32>
    %119 = arith.addf %117, %118 : vector<24x32xf32>
    %c0_69 = arith.constant 0 : index
    %c0_70 = arith.constant 0 : index
    %c0_71 = arith.constant 0 : index
    %120 = vector.load %arg17[%c0_69, %c0_70, %c0_71] : memref<2x32x96xf32, #tpu.memory_space<vmem>>, vector<1x32x96xf32>
    %121 = vector.shape_cast %120 : vector<1x32x96xf32> to vector<32x96xf32>
    %cst_72 = arith.constant dense<0.000000e+00> : vector<24x96xf32>
    %122 = tpu.matmul %119, %121, %cst_72 {dimension_numbers = #tpu.dot_dimension_numbers<[1], [0], [0], [1], [0, 0, 1, 1], [], []>} : vector<24x32xf32>, vector<32x96xf32>, vector<24x96xf32> -> vector<24x96xf32>
    %123 = vector.shape_cast %122 : vector<24x96xf32> to vector<1x24x96xf32>
    %c0_73 = arith.constant 0 : index
    %c0_74 = arith.constant 0 : index
    %c0_75 = arith.constant 0 : index
    %124 = vector.load %arg18[%c0_73, %c0_74, %c0_75] : memref<2x32x32xf32, #tpu.memory_space<vmem>>, vector<1x32x32xf32>
    %125 = vector.shape_cast %124 : vector<1x32x32xf32> to vector<32x32xf32>
    %126 = vector.extract_strided_slice %123 {offsets = [0, 0, 0], sizes = [1, 24, 8], strides = [1, 1, 1]} : vector<1x24x96xf32> to vector<1x24x8xf32>
    %127 = vector.extract_strided_slice %123 {offsets = [0, 0, 32], sizes = [1, 24, 8], strides = [1, 1, 1]} : vector<1x24x96xf32> to vector<1x24x8xf32>
    %128 = vector.extract_strided_slice %123 {offsets = [0, 0, 64], sizes = [1, 24, 8], strides = [1, 1, 1]} : vector<1x24x96xf32> to vector<1x24x8xf32>
    "tpu.trace_start"() <{level = 10 : i32, message = "bqd,bkd->bqk"}> : () -> ()
    %cst_76 = arith.constant dense<0.000000e+00> : vector<1x24x24xf32>
    %129 = tpu.matmul %126, %127, %cst_76 {dimension_numbers = #tpu.dot_dimension_numbers<[2], [2], [1], [1], [0, 0, 0, 1, 1, 1], [0], [0]>} : vector<1x24x8xf32>, vector<1x24x8xf32>, vector<1x24x24xf32> -> vector<1x24x24xf32>
    %cst_77 = arith.constant -1.000000e+30 : f32
    "tpu.trace_stop"() : () -> ()
    %130 = vector.shape_cast %93 : vector<1x1x24xi1> to vector<1x1x24xi1>
    %131 = vector.broadcast %130 : vector<1x1x24xi1> to vector<1x24x24xi1>
    %132 = vector.broadcast %cst_77 : f32 to vector<1x24x24xf32>
    %133 = arith.select %131, %129, %132 : vector<1x24x24xi1>, vector<1x24x24xf32>
    %cst_78 = arith.constant dense<0xFF800000> : vector<1x24xf32>
    %134 = vector.multi_reduction <maximumf>, %133, %cst_78 [2] : vector<1x24x24xf32> to vector<1x24xf32>
    %135 = vector.shape_cast %134 : vector<1x24xf32> to vector<1x24x1xf32>
    %136 = vector.broadcast %135 : vector<1x24x1xf32> to vector<1x24x24xf32>
    %137 = arith.subf %133, %136 : vector<1x24x24xf32>
    %138 = math.exp %137 : vector<1x24x24xf32>
    %cst_79 = arith.constant dense<0.000000e+00> : vector<1x24xf32>
    %139 = vector.multi_reduction <add>, %138, %cst_79 [2] : vector<1x24x24xf32> to vector<1x24xf32>
    %140 = vector.shape_cast %139 : vector<1x24xf32> to vector<1x24x1xf32>
    %141 = tpu.reciprocal %140 {approx = true} : vector<1x24x1xf32> -> vector<1x24x1xf32>
    %142 = vector.broadcast %141 : vector<1x24x1xf32> to vector<1x24x24xf32>
    %143 = arith.mulf %138, %142 : vector<1x24x24xf32>
    "tpu.trace_start"() <{level = 10 : i32, message = "bqk,bkd->bqd"}> : () -> ()
    %cst_80 = arith.constant dense<0.000000e+00> : vector<1x24x8xf32>
    %144 = tpu.matmul %143, %128, %cst_80 {dimension_numbers = #tpu.dot_dimension_numbers<[2], [1], [1], [2], [0, 0, 0, 1, 1, 2], [0], [0]>} : vector<1x24x24xf32>, vector<1x24x8xf32>, vector<1x24x8xf32> -> vector<1x24x8xf32>
    "tpu.trace_stop"() : () -> ()
    %145 = vector.shape_cast %144 : vector<1x24x8xf32> to vector<24x8xf32>
    %146 = vector.extract_strided_slice %125 {offsets = [0, 0], sizes = [8, 32], strides = [1, 1]} : vector<32x32xf32> to vector<8x32xf32>
    %cst_81 = arith.constant dense<0.000000e+00> : vector<24x32xf32>
    %147 = tpu.matmul %145, %146, %cst_81 {dimension_numbers = #tpu.dot_dimension_numbers<[1], [0], [0], [1], [0, 0, 1, 1], [], []>} : vector<24x8xf32>, vector<8x32xf32>, vector<24x32xf32> -> vector<24x32xf32>
    %148 = vector.extract_strided_slice %123 {offsets = [0, 0, 8], sizes = [1, 24, 8], strides = [1, 1, 1]} : vector<1x24x96xf32> to vector<1x24x8xf32>
    %149 = vector.extract_strided_slice %123 {offsets = [0, 0, 40], sizes = [1, 24, 8], strides = [1, 1, 1]} : vector<1x24x96xf32> to vector<1x24x8xf32>
    %150 = vector.extract_strided_slice %123 {offsets = [0, 0, 72], sizes = [1, 24, 8], strides = [1, 1, 1]} : vector<1x24x96xf32> to vector<1x24x8xf32>
    "tpu.trace_start"() <{level = 10 : i32, message = "bqd,bkd->bqk"}> : () -> ()
    %cst_82 = arith.constant dense<0.000000e+00> : vector<1x24x24xf32>
    %151 = tpu.matmul %148, %149, %cst_82 {dimension_numbers = #tpu.dot_dimension_numbers<[2], [2], [1], [1], [0, 0, 0, 1, 1, 1], [0], [0]>} : vector<1x24x8xf32>, vector<1x24x8xf32>, vector<1x24x24xf32> -> vector<1x24x24xf32>
    %cst_83 = arith.constant -1.000000e+30 : f32
    "tpu.trace_stop"() : () -> ()
    %152 = vector.shape_cast %93 : vector<1x1x24xi1> to vector<1x1x24xi1>
    %153 = vector.broadcast %152 : vector<1x1x24xi1> to vector<1x24x24xi1>
    %154 = vector.broadcast %cst_83 : f32 to vector<1x24x24xf32>
    %155 = arith.select %153, %151, %154 : vector<1x24x24xi1>, vector<1x24x24xf32>
    %cst_84 = arith.constant dense<0xFF800000> : vector<1x24xf32>
    %156 = vector.multi_reduction <maximumf>, %155, %cst_84 [2] : vector<1x24x24xf32> to vector<1x24xf32>
    %157 = vector.shape_cast %156 : vector<1x24xf32> to vector<1x24x1xf32>
    %158 = vector.broadcast %157 : vector<1x24x1xf32> to vector<1x24x24xf32>
    %159 = arith.subf %155, %158 : vector<1x24x24xf32>
    %160 = math.exp %159 : vector<1x24x24xf32>
    %cst_85 = arith.constant dense<0.000000e+00> : vector<1x24xf32>
    %161 = vector.multi_reduction <add>, %160, %cst_85 [2] : vector<1x24x24xf32> to vector<1x24xf32>
    %162 = vector.shape_cast %161 : vector<1x24xf32> to vector<1x24x1xf32>
    %163 = tpu.reciprocal %162 {approx = true} : vector<1x24x1xf32> -> vector<1x24x1xf32>
    %164 = vector.broadcast %163 : vector<1x24x1xf32> to vector<1x24x24xf32>
    %165 = arith.mulf %160, %164 : vector<1x24x24xf32>
    "tpu.trace_start"() <{level = 10 : i32, message = "bqk,bkd->bqd"}> : () -> ()
    %cst_86 = arith.constant dense<0.000000e+00> : vector<1x24x8xf32>
    %166 = tpu.matmul %165, %150, %cst_86 {dimension_numbers = #tpu.dot_dimension_numbers<[2], [1], [1], [2], [0, 0, 0, 1, 1, 2], [0], [0]>} : vector<1x24x24xf32>, vector<1x24x8xf32>, vector<1x24x8xf32> -> vector<1x24x8xf32>
    "tpu.trace_stop"() : () -> ()
    %167 = vector.shape_cast %166 : vector<1x24x8xf32> to vector<24x8xf32>
    %168 = vector.extract_strided_slice %125 {offsets = [8, 0], sizes = [8, 32], strides = [1, 1]} : vector<32x32xf32> to vector<8x32xf32>
    %cst_87 = arith.constant dense<0.000000e+00> : vector<24x32xf32>
    %169 = tpu.matmul %167, %168, %cst_87 {dimension_numbers = #tpu.dot_dimension_numbers<[1], [0], [0], [1], [0, 0, 1, 1], [], []>} : vector<24x8xf32>, vector<8x32xf32>, vector<24x32xf32> -> vector<24x32xf32>
    %170 = arith.addf %147, %169 : vector<24x32xf32>
    %171 = vector.extract_strided_slice %123 {offsets = [0, 0, 16], sizes = [1, 24, 8], strides = [1, 1, 1]} : vector<1x24x96xf32> to vector<1x24x8xf32>
    %172 = vector.extract_strided_slice %123 {offsets = [0, 0, 48], sizes = [1, 24, 8], strides = [1, 1, 1]} : vector<1x24x96xf32> to vector<1x24x8xf32>
    %173 = vector.extract_strided_slice %123 {offsets = [0, 0, 80], sizes = [1, 24, 8], strides = [1, 1, 1]} : vector<1x24x96xf32> to vector<1x24x8xf32>
    "tpu.trace_start"() <{level = 10 : i32, message = "bqd,bkd->bqk"}> : () -> ()
    %cst_88 = arith.constant dense<0.000000e+00> : vector<1x24x24xf32>
    %174 = tpu.matmul %171, %172, %cst_88 {dimension_numbers = #tpu.dot_dimension_numbers<[2], [2], [1], [1], [0, 0, 0, 1, 1, 1], [0], [0]>} : vector<1x24x8xf32>, vector<1x24x8xf32>, vector<1x24x24xf32> -> vector<1x24x24xf32>
    %cst_89 = arith.constant -1.000000e+30 : f32
    "tpu.trace_stop"() : () -> ()
    %175 = vector.shape_cast %93 : vector<1x1x24xi1> to vector<1x1x24xi1>
    %176 = vector.broadcast %175 : vector<1x1x24xi1> to vector<1x24x24xi1>
    %177 = vector.broadcast %cst_89 : f32 to vector<1x24x24xf32>
    %178 = arith.select %176, %174, %177 : vector<1x24x24xi1>, vector<1x24x24xf32>
    %cst_90 = arith.constant dense<0xFF800000> : vector<1x24xf32>
    %179 = vector.multi_reduction <maximumf>, %178, %cst_90 [2] : vector<1x24x24xf32> to vector<1x24xf32>
    %180 = vector.shape_cast %179 : vector<1x24xf32> to vector<1x24x1xf32>
    %181 = vector.broadcast %180 : vector<1x24x1xf32> to vector<1x24x24xf32>
    %182 = arith.subf %178, %181 : vector<1x24x24xf32>
    %183 = math.exp %182 : vector<1x24x24xf32>
    %cst_91 = arith.constant dense<0.000000e+00> : vector<1x24xf32>
    %184 = vector.multi_reduction <add>, %183, %cst_91 [2] : vector<1x24x24xf32> to vector<1x24xf32>
    %185 = vector.shape_cast %184 : vector<1x24xf32> to vector<1x24x1xf32>
    %186 = tpu.reciprocal %185 {approx = true} : vector<1x24x1xf32> -> vector<1x24x1xf32>
    %187 = vector.broadcast %186 : vector<1x24x1xf32> to vector<1x24x24xf32>
    %188 = arith.mulf %183, %187 : vector<1x24x24xf32>
    "tpu.trace_start"() <{level = 10 : i32, message = "bqk,bkd->bqd"}> : () -> ()
    %cst_92 = arith.constant dense<0.000000e+00> : vector<1x24x8xf32>
    %189 = tpu.matmul %188, %173, %cst_92 {dimension_numbers = #tpu.dot_dimension_numbers<[2], [1], [1], [2], [0, 0, 0, 1, 1, 2], [0], [0]>} : vector<1x24x24xf32>, vector<1x24x8xf32>, vector<1x24x8xf32> -> vector<1x24x8xf32>
    "tpu.trace_stop"() : () -> ()
    %190 = vector.shape_cast %189 : vector<1x24x8xf32> to vector<24x8xf32>
    %191 = vector.extract_strided_slice %125 {offsets = [16, 0], sizes = [8, 32], strides = [1, 1]} : vector<32x32xf32> to vector<8x32xf32>
    %cst_93 = arith.constant dense<0.000000e+00> : vector<24x32xf32>
    %192 = tpu.matmul %190, %191, %cst_93 {dimension_numbers = #tpu.dot_dimension_numbers<[1], [0], [0], [1], [0, 0, 1, 1], [], []>} : vector<24x8xf32>, vector<8x32xf32>, vector<24x32xf32> -> vector<24x32xf32>
    %193 = arith.addf %170, %192 : vector<24x32xf32>
    %194 = vector.extract_strided_slice %123 {offsets = [0, 0, 24], sizes = [1, 24, 8], strides = [1, 1, 1]} : vector<1x24x96xf32> to vector<1x24x8xf32>
    %195 = vector.extract_strided_slice %123 {offsets = [0, 0, 56], sizes = [1, 24, 8], strides = [1, 1, 1]} : vector<1x24x96xf32> to vector<1x24x8xf32>
    %196 = vector.extract_strided_slice %123 {offsets = [0, 0, 88], sizes = [1, 24, 8], strides = [1, 1, 1]} : vector<1x24x96xf32> to vector<1x24x8xf32>
    "tpu.trace_start"() <{level = 10 : i32, message = "bqd,bkd->bqk"}> : () -> ()
    %cst_94 = arith.constant dense<0.000000e+00> : vector<1x24x24xf32>
    %197 = tpu.matmul %194, %195, %cst_94 {dimension_numbers = #tpu.dot_dimension_numbers<[2], [2], [1], [1], [0, 0, 0, 1, 1, 1], [0], [0]>} : vector<1x24x8xf32>, vector<1x24x8xf32>, vector<1x24x24xf32> -> vector<1x24x24xf32>
    %cst_95 = arith.constant -1.000000e+30 : f32
    "tpu.trace_stop"() : () -> ()
    %198 = vector.shape_cast %93 : vector<1x1x24xi1> to vector<1x1x24xi1>
    %199 = vector.broadcast %198 : vector<1x1x24xi1> to vector<1x24x24xi1>
    %200 = vector.broadcast %cst_95 : f32 to vector<1x24x24xf32>
    %201 = arith.select %199, %197, %200 : vector<1x24x24xi1>, vector<1x24x24xf32>
    %cst_96 = arith.constant dense<0xFF800000> : vector<1x24xf32>
    %202 = vector.multi_reduction <maximumf>, %201, %cst_96 [2] : vector<1x24x24xf32> to vector<1x24xf32>
    %203 = vector.shape_cast %202 : vector<1x24xf32> to vector<1x24x1xf32>
    %204 = vector.broadcast %203 : vector<1x24x1xf32> to vector<1x24x24xf32>
    %205 = arith.subf %201, %204 : vector<1x24x24xf32>
    %206 = math.exp %205 : vector<1x24x24xf32>
    %cst_97 = arith.constant dense<0.000000e+00> : vector<1x24xf32>
    %207 = vector.multi_reduction <add>, %206, %cst_97 [2] : vector<1x24x24xf32> to vector<1x24xf32>
    %208 = vector.shape_cast %207 : vector<1x24xf32> to vector<1x24x1xf32>
    %209 = tpu.reciprocal %208 {approx = true} : vector<1x24x1xf32> -> vector<1x24x1xf32>
    %210 = vector.broadcast %209 : vector<1x24x1xf32> to vector<1x24x24xf32>
    %211 = arith.mulf %206, %210 : vector<1x24x24xf32>
    "tpu.trace_start"() <{level = 10 : i32, message = "bqk,bkd->bqd"}> : () -> ()
    %cst_98 = arith.constant dense<0.000000e+00> : vector<1x24x8xf32>
    %212 = tpu.matmul %211, %196, %cst_98 {dimension_numbers = #tpu.dot_dimension_numbers<[2], [1], [1], [2], [0, 0, 0, 1, 1, 2], [0], [0]>} : vector<1x24x24xf32>, vector<1x24x8xf32>, vector<1x24x8xf32> -> vector<1x24x8xf32>
    "tpu.trace_stop"() : () -> ()
    %213 = vector.shape_cast %212 : vector<1x24x8xf32> to vector<24x8xf32>
    %214 = vector.extract_strided_slice %125 {offsets = [24, 0], sizes = [8, 32], strides = [1, 1]} : vector<32x32xf32> to vector<8x32xf32>
    %cst_99 = arith.constant dense<0.000000e+00> : vector<24x32xf32>
    %215 = tpu.matmul %213, %214, %cst_99 {dimension_numbers = #tpu.dot_dimension_numbers<[1], [0], [0], [1], [0, 0, 1, 1], [], []>} : vector<24x8xf32>, vector<8x32xf32>, vector<24x32xf32> -> vector<24x32xf32>
    %216 = arith.addf %193, %215 : vector<24x32xf32>
    %217 = arith.addf %90, %216 : vector<24x32xf32>
    %c0_100 = arith.constant 0 : index
    %c0_101 = arith.constant 0 : index
    %c0_102 = arith.constant 0 : index
    %218 = vector.load %arg19[%c0_100, %c0_101, %c0_102] : memref<2x1x32xf32, #tpu.memory_space<vmem>>, vector<1x1x32xf32>
    %219 = vector.shape_cast %218 : vector<1x1x32xf32> to vector<1x32xf32>
    %220 = vector.broadcast %219 : vector<1x32xf32> to vector<24x32xf32>
    %221 = arith.addf %217, %220 : vector<24x32xf32>
    %c0_103 = arith.constant 0 : index
    %c0_104 = arith.constant 0 : index
    %c0_105 = arith.constant 0 : index
    %222 = vector.load %arg20[%c0_103, %c0_104, %c0_105] : memref<2x1x32xf32, #tpu.memory_space<vmem>>, vector<1x1x32xf32>
    %223 = vector.shape_cast %222 : vector<1x1x32xf32> to vector<1x32xf32>
    %c0_106 = arith.constant 0 : index
    %c0_107 = arith.constant 0 : index
    %c0_108 = arith.constant 0 : index
    %224 = vector.load %arg21[%c0_106, %c0_107, %c0_108] : memref<2x1x32xf32, #tpu.memory_space<vmem>>, vector<1x1x32xf32>
    %225 = vector.shape_cast %224 : vector<1x1x32xf32> to vector<1x32xf32>
    %cst_109 = arith.constant dense<0.000000e+00> : vector<24xf32>
    %226 = vector.multi_reduction <add>, %221, %cst_109 [1] : vector<24x32xf32> to vector<24xf32>
    %227 = vector.shape_cast %226 : vector<24xf32> to vector<24x1xf32>
    %cst_110 = arith.constant 3.200000e+01 : f32
    %228 = vector.broadcast %cst_110 : f32 to vector<24x1xf32>
    %229 = arith.divf %227, %228 : vector<24x1xf32>
    %230 = vector.broadcast %229 : vector<24x1xf32> to vector<24x32xf32>
    %231 = arith.subf %221, %230 : vector<24x32xf32>
    %232 = arith.mulf %231, %231 : vector<24x32xf32>
    %cst_111 = arith.constant dense<0.000000e+00> : vector<24xf32>
    %233 = vector.multi_reduction <add>, %232, %cst_111 [1] : vector<24x32xf32> to vector<24xf32>
    %234 = vector.shape_cast %233 : vector<24xf32> to vector<24x1xf32>
    %cst_112 = arith.constant 3.200000e+01 : f32
    %235 = vector.broadcast %cst_112 : f32 to vector<24x1xf32>
    %236 = arith.divf %234, %235 : vector<24x1xf32>
    %237 = vector.broadcast %229 : vector<24x1xf32> to vector<24x32xf32>
    %238 = arith.subf %221, %237 : vector<24x32xf32>
    %cst_113 = arith.constant 9.99999974E-6 : f32
    %239 = vector.broadcast %cst_113 : f32 to vector<24x1xf32>
    %240 = arith.addf %236, %239 : vector<24x1xf32>
    %241 = math.rsqrt %240 : vector<24x1xf32>
    %242 = vector.broadcast %241 : vector<24x1xf32> to vector<24x32xf32>
    %243 = arith.mulf %238, %242 : vector<24x32xf32>
    %244 = vector.broadcast %223 : vector<1x32xf32> to vector<24x32xf32>
    %245 = arith.mulf %243, %244 : vector<24x32xf32>
    %246 = vector.broadcast %225 : vector<1x32xf32> to vector<24x32xf32>
    %247 = arith.addf %245, %246 : vector<24x32xf32>
    %c0_114 = arith.constant 0 : index
    %c0_115 = arith.constant 0 : index
    %c0_116 = arith.constant 0 : index
    %248 = vector.load %arg22[%c0_114, %c0_115, %c0_116] : memref<2x32x64xf32, #tpu.memory_space<vmem>>, vector<1x32x64xf32>
    %249 = vector.shape_cast %248 : vector<1x32x64xf32> to vector<32x64xf32>
    %cst_117 = arith.constant dense<0.000000e+00> : vector<24x64xf32>
    %250 = tpu.matmul %247, %249, %cst_117 {dimension_numbers = #tpu.dot_dimension_numbers<[1], [0], [0], [1], [0, 0, 1, 1], [], []>} : vector<24x32xf32>, vector<32x64xf32>, vector<24x64xf32> -> vector<24x64xf32>
    %c0_118 = arith.constant 0 : index
    %c0_119 = arith.constant 0 : index
    %c0_120 = arith.constant 0 : index
    %251 = vector.load %arg23[%c0_118, %c0_119, %c0_120] : memref<2x1x64xf32, #tpu.memory_space<vmem>>, vector<1x1x64xf32>
    %252 = vector.shape_cast %251 : vector<1x1x64xf32> to vector<1x64xf32>
    %253 = vector.broadcast %252 : vector<1x64xf32> to vector<24x64xf32>
    %254 = arith.addf %250, %253 : vector<24x64xf32>
    %255 = arith.mulf %254, %254 : vector<24x64xf32>
    %256 = arith.mulf %254, %255 : vector<24x64xf32>
    %cst_121 = arith.constant 4.471500e-02 : f32
    %257 = vector.broadcast %cst_121 : f32 to vector<24x64xf32>
    %258 = arith.mulf %257, %256 : vector<24x64xf32>
    %259 = arith.addf %254, %258 : vector<24x64xf32>
    %cst_122 = arith.constant 0.797884583 : f32
    %260 = vector.broadcast %cst_122 : f32 to vector<24x64xf32>
    %261 = arith.mulf %260, %259 : vector<24x64xf32>
    %262 = math.tanh %261 : vector<24x64xf32>
    %cst_123 = arith.constant 1.000000e+00 : f32
    %263 = vector.broadcast %cst_123 : f32 to vector<24x64xf32>
    %264 = arith.addf %263, %262 : vector<24x64xf32>
    %cst_124 = arith.constant 5.000000e-01 : f32
    %265 = vector.broadcast %cst_124 : f32 to vector<24x64xf32>
    %266 = arith.mulf %265, %264 : vector<24x64xf32>
    %267 = arith.mulf %254, %266 : vector<24x64xf32>
    %c0_125 = arith.constant 0 : index
    %c0_126 = arith.constant 0 : index
    %c0_127 = arith.constant 0 : index
    %268 = vector.load %arg24[%c0_125, %c0_126, %c0_127] : memref<2x64x32xf32, #tpu.memory_space<vmem>>, vector<1x64x32xf32>
    %269 = vector.shape_cast %268 : vector<1x64x32xf32> to vector<64x32xf32>
    %cst_128 = arith.constant dense<0.000000e+00> : vector<24x32xf32>
    %270 = tpu.matmul %267, %269, %cst_128 {dimension_numbers = #tpu.dot_dimension_numbers<[1], [0], [0], [1], [0, 0, 1, 1], [], []>} : vector<24x64xf32>, vector<64x32xf32>, vector<24x32xf32> -> vector<24x32xf32>
    %c0_129 = arith.constant 0 : index
    %c0_130 = arith.constant 0 : index
    %c0_131 = arith.constant 0 : index
    %271 = vector.load %arg25[%c0_129, %c0_130, %c0_131] : memref<2x1x32xf32, #tpu.memory_space<vmem>>, vector<1x1x32xf32>
    %272 = vector.shape_cast %271 : vector<1x1x32xf32> to vector<1x32xf32>
    %273 = vector.broadcast %272 : vector<1x32xf32> to vector<24x32xf32>
    %274 = arith.addf %270, %273 : vector<24x32xf32>
    %275 = arith.addf %221, %274 : vector<24x32xf32>
    %c1 = arith.constant 1 : index
    %c0_132 = arith.constant 0 : index
    %c0_133 = arith.constant 0 : index
    %276 = vector.load %arg15[%c1, %c0_132, %c0_133] : memref<2x1x32xf32, #tpu.memory_space<vmem>>, vector<1x1x32xf32>
    %277 = vector.shape_cast %276 : vector<1x1x32xf32> to vector<1x32xf32>
    %c1_134 = arith.constant 1 : index
    %c0_135 = arith.constant 0 : index
    %c0_136 = arith.constant 0 : index
    %278 = vector.load %arg16[%c1_134, %c0_135, %c0_136] : memref<2x1x32xf32, #tpu.memory_space<vmem>>, vector<1x1x32xf32>
    %279 = vector.shape_cast %278 : vector<1x1x32xf32> to vector<1x32xf32>
    %cst_137 = arith.constant dense<0.000000e+00> : vector<24xf32>
    %280 = vector.multi_reduction <add>, %275, %cst_137 [1] : vector<24x32xf32> to vector<24xf32>
    %281 = vector.shape_cast %280 : vector<24xf32> to vector<24x1xf32>
    %cst_138 = arith.constant 3.200000e+01 : f32
    %282 = vector.broadcast %cst_138 : f32 to vector<24x1xf32>
    %283 = arith.divf %281, %282 : vector<24x1xf32>
    %284 = vector.broadcast %283 : vector<24x1xf32> to vector<24x32xf32>
    %285 = arith.subf %275, %284 : vector<24x32xf32>
    %286 = arith.mulf %285, %285 : vector<24x32xf32>
    %cst_139 = arith.constant dense<0.000000e+00> : vector<24xf32>
    %287 = vector.multi_reduction <add>, %286, %cst_139 [1] : vector<24x32xf32> to vector<24xf32>
    %288 = vector.shape_cast %287 : vector<24xf32> to vector<24x1xf32>
    %cst_140 = arith.constant 3.200000e+01 : f32
    %289 = vector.broadcast %cst_140 : f32 to vector<24x1xf32>
    %290 = arith.divf %288, %289 : vector<24x1xf32>
    %291 = vector.broadcast %283 : vector<24x1xf32> to vector<24x32xf32>
    %292 = arith.subf %275, %291 : vector<24x32xf32>
    %cst_141 = arith.constant 9.99999974E-6 : f32
    %293 = vector.broadcast %cst_141 : f32 to vector<24x1xf32>
    %294 = arith.addf %290, %293 : vector<24x1xf32>
    %295 = math.rsqrt %294 : vector<24x1xf32>
    %296 = vector.broadcast %295 : vector<24x1xf32> to vector<24x32xf32>
    %297 = arith.mulf %292, %296 : vector<24x32xf32>
    %298 = vector.broadcast %277 : vector<1x32xf32> to vector<24x32xf32>
    %299 = arith.mulf %297, %298 : vector<24x32xf32>
    %300 = vector.broadcast %279 : vector<1x32xf32> to vector<24x32xf32>
    %301 = arith.addf %299, %300 : vector<24x32xf32>
    %c1_142 = arith.constant 1 : index
    %c0_143 = arith.constant 0 : index
    %c0_144 = arith.constant 0 : index
    %302 = vector.load %arg17[%c1_142, %c0_143, %c0_144] : memref<2x32x96xf32, #tpu.memory_space<vmem>>, vector<1x32x96xf32>
    %303 = vector.shape_cast %302 : vector<1x32x96xf32> to vector<32x96xf32>
    %cst_145 = arith.constant dense<0.000000e+00> : vector<24x96xf32>
    %304 = tpu.matmul %301, %303, %cst_145 {dimension_numbers = #tpu.dot_dimension_numbers<[1], [0], [0], [1], [0, 0, 1, 1], [], []>} : vector<24x32xf32>, vector<32x96xf32>, vector<24x96xf32> -> vector<24x96xf32>
    %305 = vector.shape_cast %304 : vector<24x96xf32> to vector<1x24x96xf32>
    %c1_146 = arith.constant 1 : index
    %c0_147 = arith.constant 0 : index
    %c0_148 = arith.constant 0 : index
    %306 = vector.load %arg18[%c1_146, %c0_147, %c0_148] : memref<2x32x32xf32, #tpu.memory_space<vmem>>, vector<1x32x32xf32>
    %307 = vector.shape_cast %306 : vector<1x32x32xf32> to vector<32x32xf32>
    %308 = vector.extract_strided_slice %305 {offsets = [0, 0, 0], sizes = [1, 24, 8], strides = [1, 1, 1]} : vector<1x24x96xf32> to vector<1x24x8xf32>
    %309 = vector.extract_strided_slice %305 {offsets = [0, 0, 32], sizes = [1, 24, 8], strides = [1, 1, 1]} : vector<1x24x96xf32> to vector<1x24x8xf32>
    %310 = vector.extract_strided_slice %305 {offsets = [0, 0, 64], sizes = [1, 24, 8], strides = [1, 1, 1]} : vector<1x24x96xf32> to vector<1x24x8xf32>
    "tpu.trace_start"() <{level = 10 : i32, message = "bqd,bkd->bqk"}> : () -> ()
    %cst_149 = arith.constant dense<0.000000e+00> : vector<1x24x24xf32>
    %311 = tpu.matmul %308, %309, %cst_149 {dimension_numbers = #tpu.dot_dimension_numbers<[2], [2], [1], [1], [0, 0, 0, 1, 1, 1], [0], [0]>} : vector<1x24x8xf32>, vector<1x24x8xf32>, vector<1x24x24xf32> -> vector<1x24x24xf32>
    %cst_150 = arith.constant -1.000000e+30 : f32
    "tpu.trace_stop"() : () -> ()
    %312 = vector.shape_cast %93 : vector<1x1x24xi1> to vector<1x1x24xi1>
    %313 = vector.broadcast %312 : vector<1x1x24xi1> to vector<1x24x24xi1>
    %314 = vector.broadcast %cst_150 : f32 to vector<1x24x24xf32>
    %315 = arith.select %313, %311, %314 : vector<1x24x24xi1>, vector<1x24x24xf32>
    %cst_151 = arith.constant dense<0xFF800000> : vector<1x24xf32>
    %316 = vector.multi_reduction <maximumf>, %315, %cst_151 [2] : vector<1x24x24xf32> to vector<1x24xf32>
    %317 = vector.shape_cast %316 : vector<1x24xf32> to vector<1x24x1xf32>
    %318 = vector.broadcast %317 : vector<1x24x1xf32> to vector<1x24x24xf32>
    %319 = arith.subf %315, %318 : vector<1x24x24xf32>
    %320 = math.exp %319 : vector<1x24x24xf32>
    %cst_152 = arith.constant dense<0.000000e+00> : vector<1x24xf32>
    %321 = vector.multi_reduction <add>, %320, %cst_152 [2] : vector<1x24x24xf32> to vector<1x24xf32>
    %322 = vector.shape_cast %321 : vector<1x24xf32> to vector<1x24x1xf32>
    %323 = tpu.reciprocal %322 {approx = true} : vector<1x24x1xf32> -> vector<1x24x1xf32>
    %324 = vector.broadcast %323 : vector<1x24x1xf32> to vector<1x24x24xf32>
    %325 = arith.mulf %320, %324 : vector<1x24x24xf32>
    "tpu.trace_start"() <{level = 10 : i32, message = "bqk,bkd->bqd"}> : () -> ()
    %cst_153 = arith.constant dense<0.000000e+00> : vector<1x24x8xf32>
    %326 = tpu.matmul %325, %310, %cst_153 {dimension_numbers = #tpu.dot_dimension_numbers<[2], [1], [1], [2], [0, 0, 0, 1, 1, 2], [0], [0]>} : vector<1x24x24xf32>, vector<1x24x8xf32>, vector<1x24x8xf32> -> vector<1x24x8xf32>
    "tpu.trace_stop"() : () -> ()
    %327 = vector.shape_cast %326 : vector<1x24x8xf32> to vector<24x8xf32>
    %328 = vector.extract_strided_slice %307 {offsets = [0, 0], sizes = [8, 32], strides = [1, 1]} : vector<32x32xf32> to vector<8x32xf32>
    %cst_154 = arith.constant dense<0.000000e+00> : vector<24x32xf32>
    %329 = tpu.matmul %327, %328, %cst_154 {dimension_numbers = #tpu.dot_dimension_numbers<[1], [0], [0], [1], [0, 0, 1, 1], [], []>} : vector<24x8xf32>, vector<8x32xf32>, vector<24x32xf32> -> vector<24x32xf32>
    %330 = vector.extract_strided_slice %305 {offsets = [0, 0, 8], sizes = [1, 24, 8], strides = [1, 1, 1]} : vector<1x24x96xf32> to vector<1x24x8xf32>
    %331 = vector.extract_strided_slice %305 {offsets = [0, 0, 40], sizes = [1, 24, 8], strides = [1, 1, 1]} : vector<1x24x96xf32> to vector<1x24x8xf32>
    %332 = vector.extract_strided_slice %305 {offsets = [0, 0, 72], sizes = [1, 24, 8], strides = [1, 1, 1]} : vector<1x24x96xf32> to vector<1x24x8xf32>
    "tpu.trace_start"() <{level = 10 : i32, message = "bqd,bkd->bqk"}> : () -> ()
    %cst_155 = arith.constant dense<0.000000e+00> : vector<1x24x24xf32>
    %333 = tpu.matmul %330, %331, %cst_155 {dimension_numbers = #tpu.dot_dimension_numbers<[2], [2], [1], [1], [0, 0, 0, 1, 1, 1], [0], [0]>} : vector<1x24x8xf32>, vector<1x24x8xf32>, vector<1x24x24xf32> -> vector<1x24x24xf32>
    %cst_156 = arith.constant -1.000000e+30 : f32
    "tpu.trace_stop"() : () -> ()
    %334 = vector.shape_cast %93 : vector<1x1x24xi1> to vector<1x1x24xi1>
    %335 = vector.broadcast %334 : vector<1x1x24xi1> to vector<1x24x24xi1>
    %336 = vector.broadcast %cst_156 : f32 to vector<1x24x24xf32>
    %337 = arith.select %335, %333, %336 : vector<1x24x24xi1>, vector<1x24x24xf32>
    %cst_157 = arith.constant dense<0xFF800000> : vector<1x24xf32>
    %338 = vector.multi_reduction <maximumf>, %337, %cst_157 [2] : vector<1x24x24xf32> to vector<1x24xf32>
    %339 = vector.shape_cast %338 : vector<1x24xf32> to vector<1x24x1xf32>
    %340 = vector.broadcast %339 : vector<1x24x1xf32> to vector<1x24x24xf32>
    %341 = arith.subf %337, %340 : vector<1x24x24xf32>
    %342 = math.exp %341 : vector<1x24x24xf32>
    %cst_158 = arith.constant dense<0.000000e+00> : vector<1x24xf32>
    %343 = vector.multi_reduction <add>, %342, %cst_158 [2] : vector<1x24x24xf32> to vector<1x24xf32>
    %344 = vector.shape_cast %343 : vector<1x24xf32> to vector<1x24x1xf32>
    %345 = tpu.reciprocal %344 {approx = true} : vector<1x24x1xf32> -> vector<1x24x1xf32>
    %346 = vector.broadcast %345 : vector<1x24x1xf32> to vector<1x24x24xf32>
    %347 = arith.mulf %342, %346 : vector<1x24x24xf32>
    "tpu.trace_start"() <{level = 10 : i32, message = "bqk,bkd->bqd"}> : () -> ()
    %cst_159 = arith.constant dense<0.000000e+00> : vector<1x24x8xf32>
    %348 = tpu.matmul %347, %332, %cst_159 {dimension_numbers = #tpu.dot_dimension_numbers<[2], [1], [1], [2], [0, 0, 0, 1, 1, 2], [0], [0]>} : vector<1x24x24xf32>, vector<1x24x8xf32>, vector<1x24x8xf32> -> vector<1x24x8xf32>
    "tpu.trace_stop"() : () -> ()
    %349 = vector.shape_cast %348 : vector<1x24x8xf32> to vector<24x8xf32>
    %350 = vector.extract_strided_slice %307 {offsets = [8, 0], sizes = [8, 32], strides = [1, 1]} : vector<32x32xf32> to vector<8x32xf32>
    %cst_160 = arith.constant dense<0.000000e+00> : vector<24x32xf32>
    %351 = tpu.matmul %349, %350, %cst_160 {dimension_numbers = #tpu.dot_dimension_numbers<[1], [0], [0], [1], [0, 0, 1, 1], [], []>} : vector<24x8xf32>, vector<8x32xf32>, vector<24x32xf32> -> vector<24x32xf32>
    %352 = arith.addf %329, %351 : vector<24x32xf32>
    %353 = vector.extract_strided_slice %305 {offsets = [0, 0, 16], sizes = [1, 24, 8], strides = [1, 1, 1]} : vector<1x24x96xf32> to vector<1x24x8xf32>
    %354 = vector.extract_strided_slice %305 {offsets = [0, 0, 48], sizes = [1, 24, 8], strides = [1, 1, 1]} : vector<1x24x96xf32> to vector<1x24x8xf32>
    %355 = vector.extract_strided_slice %305 {offsets = [0, 0, 80], sizes = [1, 24, 8], strides = [1, 1, 1]} : vector<1x24x96xf32> to vector<1x24x8xf32>
    "tpu.trace_start"() <{level = 10 : i32, message = "bqd,bkd->bqk"}> : () -> ()
    %cst_161 = arith.constant dense<0.000000e+00> : vector<1x24x24xf32>
    %356 = tpu.matmul %353, %354, %cst_161 {dimension_numbers = #tpu.dot_dimension_numbers<[2], [2], [1], [1], [0, 0, 0, 1, 1, 1], [0], [0]>} : vector<1x24x8xf32>, vector<1x24x8xf32>, vector<1x24x24xf32> -> vector<1x24x24xf32>
    %cst_162 = arith.constant -1.000000e+30 : f32
    "tpu.trace_stop"() : () -> ()
    %357 = vector.shape_cast %93 : vector<1x1x24xi1> to vector<1x1x24xi1>
    %358 = vector.broadcast %357 : vector<1x1x24xi1> to vector<1x24x24xi1>
    %359 = vector.broadcast %cst_162 : f32 to vector<1x24x24xf32>
    %360 = arith.select %358, %356, %359 : vector<1x24x24xi1>, vector<1x24x24xf32>
    %cst_163 = arith.constant dense<0xFF800000> : vector<1x24xf32>
    %361 = vector.multi_reduction <maximumf>, %360, %cst_163 [2] : vector<1x24x24xf32> to vector<1x24xf32>
    %362 = vector.shape_cast %361 : vector<1x24xf32> to vector<1x24x1xf32>
    %363 = vector.broadcast %362 : vector<1x24x1xf32> to vector<1x24x24xf32>
    %364 = arith.subf %360, %363 : vector<1x24x24xf32>
    %365 = math.exp %364 : vector<1x24x24xf32>
    %cst_164 = arith.constant dense<0.000000e+00> : vector<1x24xf32>
    %366 = vector.multi_reduction <add>, %365, %cst_164 [2] : vector<1x24x24xf32> to vector<1x24xf32>
    %367 = vector.shape_cast %366 : vector<1x24xf32> to vector<1x24x1xf32>
    %368 = tpu.reciprocal %367 {approx = true} : vector<1x24x1xf32> -> vector<1x24x1xf32>
    %369 = vector.broadcast %368 : vector<1x24x1xf32> to vector<1x24x24xf32>
    %370 = arith.mulf %365, %369 : vector<1x24x24xf32>
    "tpu.trace_start"() <{level = 10 : i32, message = "bqk,bkd->bqd"}> : () -> ()
    %cst_165 = arith.constant dense<0.000000e+00> : vector<1x24x8xf32>
    %371 = tpu.matmul %370, %355, %cst_165 {dimension_numbers = #tpu.dot_dimension_numbers<[2], [1], [1], [2], [0, 0, 0, 1, 1, 2], [0], [0]>} : vector<1x24x24xf32>, vector<1x24x8xf32>, vector<1x24x8xf32> -> vector<1x24x8xf32>
    "tpu.trace_stop"() : () -> ()
    %372 = vector.shape_cast %371 : vector<1x24x8xf32> to vector<24x8xf32>
    %373 = vector.extract_strided_slice %307 {offsets = [16, 0], sizes = [8, 32], strides = [1, 1]} : vector<32x32xf32> to vector<8x32xf32>
    %cst_166 = arith.constant dense<0.000000e+00> : vector<24x32xf32>
    %374 = tpu.matmul %372, %373, %cst_166 {dimension_numbers = #tpu.dot_dimension_numbers<[1], [0], [0], [1], [0, 0, 1, 1], [], []>} : vector<24x8xf32>, vector<8x32xf32>, vector<24x32xf32> -> vector<24x32xf32>
    %375 = arith.addf %352, %374 : vector<24x32xf32>
    %376 = vector.extract_strided_slice %305 {offsets = [0, 0, 24], sizes = [1, 24, 8], strides = [1, 1, 1]} : vector<1x24x96xf32> to vector<1x24x8xf32>
    %377 = vector.extract_strided_slice %305 {offsets = [0, 0, 56], sizes = [1, 24, 8], strides = [1, 1, 1]} : vector<1x24x96xf32> to vector<1x24x8xf32>
    %378 = vector.extract_strided_slice %305 {offsets = [0, 0, 88], sizes = [1, 24, 8], strides = [1, 1, 1]} : vector<1x24x96xf32> to vector<1x24x8xf32>
    "tpu.trace_start"() <{level = 10 : i32, message = "bqd,bkd->bqk"}> : () -> ()
    %cst_167 = arith.constant dense<0.000000e+00> : vector<1x24x24xf32>
    %379 = tpu.matmul %376, %377, %cst_167 {dimension_numbers = #tpu.dot_dimension_numbers<[2], [2], [1], [1], [0, 0, 0, 1, 1, 1], [0], [0]>} : vector<1x24x8xf32>, vector<1x24x8xf32>, vector<1x24x24xf32> -> vector<1x24x24xf32>
    %cst_168 = arith.constant -1.000000e+30 : f32
    "tpu.trace_stop"() : () -> ()
    %380 = vector.shape_cast %93 : vector<1x1x24xi1> to vector<1x1x24xi1>
    %381 = vector.broadcast %380 : vector<1x1x24xi1> to vector<1x24x24xi1>
    %382 = vector.broadcast %cst_168 : f32 to vector<1x24x24xf32>
    %383 = arith.select %381, %379, %382 : vector<1x24x24xi1>, vector<1x24x24xf32>
    %cst_169 = arith.constant dense<0xFF800000> : vector<1x24xf32>
    %384 = vector.multi_reduction <maximumf>, %383, %cst_169 [2] : vector<1x24x24xf32> to vector<1x24xf32>
    %385 = vector.shape_cast %384 : vector<1x24xf32> to vector<1x24x1xf32>
    %386 = vector.broadcast %385 : vector<1x24x1xf32> to vector<1x24x24xf32>
    %387 = arith.subf %383, %386 : vector<1x24x24xf32>
    %388 = math.exp %387 : vector<1x24x24xf32>
    %cst_170 = arith.constant dense<0.000000e+00> : vector<1x24xf32>
    %389 = vector.multi_reduction <add>, %388, %cst_170 [2] : vector<1x24x24xf32> to vector<1x24xf32>
    %390 = vector.shape_cast %389 : vector<1x24xf32> to vector<1x24x1xf32>
    %391 = tpu.reciprocal %390 {approx = true} : vector<1x24x1xf32> -> vector<1x24x1xf32>
    %392 = vector.broadcast %391 : vector<1x24x1xf32> to vector<1x24x24xf32>
    %393 = arith.mulf %388, %392 : vector<1x24x24xf32>
    "tpu.trace_start"() <{level = 10 : i32, message = "bqk,bkd->bqd"}> : () -> ()
    %cst_171 = arith.constant dense<0.000000e+00> : vector<1x24x8xf32>
    %394 = tpu.matmul %393, %378, %cst_171 {dimension_numbers = #tpu.dot_dimension_numbers<[2], [1], [1], [2], [0, 0, 0, 1, 1, 2], [0], [0]>} : vector<1x24x24xf32>, vector<1x24x8xf32>, vector<1x24x8xf32> -> vector<1x24x8xf32>
    "tpu.trace_stop"() : () -> ()
    %395 = vector.shape_cast %394 : vector<1x24x8xf32> to vector<24x8xf32>
    %396 = vector.extract_strided_slice %307 {offsets = [24, 0], sizes = [8, 32], strides = [1, 1]} : vector<32x32xf32> to vector<8x32xf32>
    %cst_172 = arith.constant dense<0.000000e+00> : vector<24x32xf32>
    %397 = tpu.matmul %395, %396, %cst_172 {dimension_numbers = #tpu.dot_dimension_numbers<[1], [0], [0], [1], [0, 0, 1, 1], [], []>} : vector<24x8xf32>, vector<8x32xf32>, vector<24x32xf32> -> vector<24x32xf32>
    %398 = arith.addf %375, %397 : vector<24x32xf32>
    %399 = arith.addf %275, %398 : vector<24x32xf32>
    %c1_173 = arith.constant 1 : index
    %c0_174 = arith.constant 0 : index
    %c0_175 = arith.constant 0 : index
    %400 = vector.load %arg19[%c1_173, %c0_174, %c0_175] : memref<2x1x32xf32, #tpu.memory_space<vmem>>, vector<1x1x32xf32>
    %401 = vector.shape_cast %400 : vector<1x1x32xf32> to vector<1x32xf32>
    %402 = vector.broadcast %401 : vector<1x32xf32> to vector<24x32xf32>
    %403 = arith.addf %399, %402 : vector<24x32xf32>
    %c1_176 = arith.constant 1 : index
    %c0_177 = arith.constant 0 : index
    %c0_178 = arith.constant 0 : index
    %404 = vector.load %arg20[%c1_176, %c0_177, %c0_178] : memref<2x1x32xf32, #tpu.memory_space<vmem>>, vector<1x1x32xf32>
    %405 = vector.shape_cast %404 : vector<1x1x32xf32> to vector<1x32xf32>
    %c1_179 = arith.constant 1 : index
    %c0_180 = arith.constant 0 : index
    %c0_181 = arith.constant 0 : index
    %406 = vector.load %arg21[%c1_179, %c0_180, %c0_181] : memref<2x1x32xf32, #tpu.memory_space<vmem>>, vector<1x1x32xf32>
    %407 = vector.shape_cast %406 : vector<1x1x32xf32> to vector<1x32xf32>
    %cst_182 = arith.constant dense<0.000000e+00> : vector<24xf32>
    %408 = vector.multi_reduction <add>, %403, %cst_182 [1] : vector<24x32xf32> to vector<24xf32>
    %409 = vector.shape_cast %408 : vector<24xf32> to vector<24x1xf32>
    %cst_183 = arith.constant 3.200000e+01 : f32
    %410 = vector.broadcast %cst_183 : f32 to vector<24x1xf32>
    %411 = arith.divf %409, %410 : vector<24x1xf32>
    %412 = vector.broadcast %411 : vector<24x1xf32> to vector<24x32xf32>
    %413 = arith.subf %403, %412 : vector<24x32xf32>
    %414 = arith.mulf %413, %413 : vector<24x32xf32>
    %cst_184 = arith.constant dense<0.000000e+00> : vector<24xf32>
    %415 = vector.multi_reduction <add>, %414, %cst_184 [1] : vector<24x32xf32> to vector<24xf32>
    %416 = vector.shape_cast %415 : vector<24xf32> to vector<24x1xf32>
    %cst_185 = arith.constant 3.200000e+01 : f32
    %417 = vector.broadcast %cst_185 : f32 to vector<24x1xf32>
    %418 = arith.divf %416, %417 : vector<24x1xf32>
    %419 = vector.broadcast %411 : vector<24x1xf32> to vector<24x32xf32>
    %420 = arith.subf %403, %419 : vector<24x32xf32>
    %cst_186 = arith.constant 9.99999974E-6 : f32
    %421 = vector.broadcast %cst_186 : f32 to vector<24x1xf32>
    %422 = arith.addf %418, %421 : vector<24x1xf32>
    %423 = math.rsqrt %422 : vector<24x1xf32>
    %424 = vector.broadcast %423 : vector<24x1xf32> to vector<24x32xf32>
    %425 = arith.mulf %420, %424 : vector<24x32xf32>
    %426 = vector.broadcast %405 : vector<1x32xf32> to vector<24x32xf32>
    %427 = arith.mulf %425, %426 : vector<24x32xf32>
    %428 = vector.broadcast %407 : vector<1x32xf32> to vector<24x32xf32>
    %429 = arith.addf %427, %428 : vector<24x32xf32>
    %c1_187 = arith.constant 1 : index
    %c0_188 = arith.constant 0 : index
    %c0_189 = arith.constant 0 : index
    %430 = vector.load %arg22[%c1_187, %c0_188, %c0_189] : memref<2x32x64xf32, #tpu.memory_space<vmem>>, vector<1x32x64xf32>
    %431 = vector.shape_cast %430 : vector<1x32x64xf32> to vector<32x64xf32>
    %cst_190 = arith.constant dense<0.000000e+00> : vector<24x64xf32>
    %432 = tpu.matmul %429, %431, %cst_190 {dimension_numbers = #tpu.dot_dimension_numbers<[1], [0], [0], [1], [0, 0, 1, 1], [], []>} : vector<24x32xf32>, vector<32x64xf32>, vector<24x64xf32> -> vector<24x64xf32>
    %c1_191 = arith.constant 1 : index
    %c0_192 = arith.constant 0 : index
    %c0_193 = arith.constant 0 : index
    %433 = vector.load %arg23[%c1_191, %c0_192, %c0_193] : memref<2x1x64xf32, #tpu.memory_space<vmem>>, vector<1x1x64xf32>
    %434 = vector.shape_cast %433 : vector<1x1x64xf32> to vector<1x64xf32>
    %435 = vector.broadcast %434 : vector<1x64xf32> to vector<24x64xf32>
    %436 = arith.addf %432, %435 : vector<24x64xf32>
    %437 = arith.mulf %436, %436 : vector<24x64xf32>
    %438 = arith.mulf %436, %437 : vector<24x64xf32>
    %cst_194 = arith.constant 4.471500e-02 : f32
    %439 = vector.broadcast %cst_194 : f32 to vector<24x64xf32>
    %440 = arith.mulf %439, %438 : vector<24x64xf32>
    %441 = arith.addf %436, %440 : vector<24x64xf32>
    %cst_195 = arith.constant 0.797884583 : f32
    %442 = vector.broadcast %cst_195 : f32 to vector<24x64xf32>
    %443 = arith.mulf %442, %441 : vector<24x64xf32>
    %444 = math.tanh %443 : vector<24x64xf32>
    %cst_196 = arith.constant 1.000000e+00 : f32
    %445 = vector.broadcast %cst_196 : f32 to vector<24x64xf32>
    %446 = arith.addf %445, %444 : vector<24x64xf32>
    %cst_197 = arith.constant 5.000000e-01 : f32
    %447 = vector.broadcast %cst_197 : f32 to vector<24x64xf32>
    %448 = arith.mulf %447, %446 : vector<24x64xf32>
    %449 = arith.mulf %436, %448 : vector<24x64xf32>
    %c1_198 = arith.constant 1 : index
    %c0_199 = arith.constant 0 : index
    %c0_200 = arith.constant 0 : index
    %450 = vector.load %arg24[%c1_198, %c0_199, %c0_200] : memref<2x64x32xf32, #tpu.memory_space<vmem>>, vector<1x64x32xf32>
    %451 = vector.shape_cast %450 : vector<1x64x32xf32> to vector<64x32xf32>
    %cst_201 = arith.constant dense<0.000000e+00> : vector<24x32xf32>
    %452 = tpu.matmul %449, %451, %cst_201 {dimension_numbers = #tpu.dot_dimension_numbers<[1], [0], [0], [1], [0, 0, 1, 1], [], []>} : vector<24x64xf32>, vector<64x32xf32>, vector<24x32xf32> -> vector<24x32xf32>
    %c1_202 = arith.constant 1 : index
    %c0_203 = arith.constant 0 : index
    %c0_204 = arith.constant 0 : index
    %453 = vector.load %arg25[%c1_202, %c0_203, %c0_204] : memref<2x1x32xf32, #tpu.memory_space<vmem>>, vector<1x1x32xf32>
    %454 = vector.shape_cast %453 : vector<1x1x32xf32> to vector<1x32xf32>
    %455 = vector.broadcast %454 : vector<1x32xf32> to vector<24x32xf32>
    %456 = arith.addf %452, %455 : vector<24x32xf32>
    %457 = arith.addf %403, %456 : vector<24x32xf32>
    %458 = vector.shape_cast %457 : vector<24x32xf32> to vector<1x24x32xf32>
    %c0_205 = arith.constant 0 : index
    %c0_206 = arith.constant 0 : index
    %c0_207 = arith.constant 0 : index
    %459 = vector.load %arg33[%c0_205, %c0_206, %c0_207] : memref<1x24x32xf32, #tpu.memory_space<vmem>>, vector<1x24x32xf32>
    tpu.vector_store %arg33[%c0_205, %c0_206, %c0_207], %458 {strides = array<i32>} : memref<1x24x32xf32, #tpu.memory_space<vmem>>, vector<1x24x32xf32>,
    %c0_208 = arith.constant 0 : index
    %c16_209 = arith.constant 16 : index
    %c0_210 = arith.constant 0 : index
    %460 = vector.load %arg33[%c0_208, %c16_209, %c0_210] : memref<1x24x32xf32, #tpu.memory_space<vmem>>, vector<1x1x32xf32>
    %461 = vector.shape_cast %460 : vector<1x1x32xf32> to vector<1x32xf32>
    %c0_211 = arith.constant 0 : index
    %c0_212 = arith.constant 0 : index
    %462 = vector.load %arg26[%c0_211, %c0_212] : memref<1x32xf32, #tpu.memory_space<vmem>>, vector<1x32xf32>
    %c0_213 = arith.constant 0 : index
    %c0_214 = arith.constant 0 : index
    %463 = vector.load %arg27[%c0_213, %c0_214] : memref<1x32xf32, #tpu.memory_space<vmem>>, vector<1x32xf32>
    %cst_215 = arith.constant dense<0.000000e+00> : vector<1xf32>
    %464 = vector.multi_reduction <add>, %461, %cst_215 [1] : vector<1x32xf32> to vector<1xf32>
    %465 = vector.shape_cast %464 : vector<1xf32> to vector<1x1xf32>
    %cst_216 = arith.constant 3.200000e+01 : f32
    %466 = vector.broadcast %cst_216 : f32 to vector<1x1xf32>
    %467 = arith.divf %465, %466 : vector<1x1xf32>
    %468 = vector.broadcast %467 : vector<1x1xf32> to vector<1x32xf32>
    %469 = arith.subf %461, %468 : vector<1x32xf32>
    %470 = arith.mulf %469, %469 : vector<1x32xf32>
    %cst_217 = arith.constant dense<0.000000e+00> : vector<1xf32>
    %471 = vector.multi_reduction <add>, %470, %cst_217 [1] : vector<1x32xf32> to vector<1xf32>
    %472 = vector.shape_cast %471 : vector<1xf32> to vector<1x1xf32>
    %cst_218 = arith.constant 3.200000e+01 : f32
    %473 = vector.broadcast %cst_218 : f32 to vector<1x1xf32>
    %474 = arith.divf %472, %473 : vector<1x1xf32>
    %475 = vector.broadcast %467 : vector<1x1xf32> to vector<1x32xf32>
    %476 = arith.subf %461, %475 : vector<1x32xf32>
    %cst_219 = arith.constant 9.99999974E-6 : f32
    %477 = vector.broadcast %cst_219 : f32 to vector<1x1xf32>
    %478 = arith.addf %474, %477 : vector<1x1xf32>
    %479 = math.rsqrt %478 : vector<1x1xf32>
    %480 = vector.broadcast %479 : vector<1x1xf32> to vector<1x32xf32>
    %481 = arith.mulf %476, %480 : vector<1x32xf32>
    %482 = arith.mulf %481, %462 : vector<1x32xf32>
    %483 = arith.addf %482, %463 : vector<1x32xf32>
    %484 = vector.shape_cast %483 : vector<1x32xf32> to vector<1x1x32xf32>
    %c0_220 = arith.constant 0 : index
    %c0_221 = arith.constant 0 : index
    %c0_222 = arith.constant 0 : index
    %485 = vector.load %arg31[%c0_220, %c0_221, %c0_222] : memref<1x1x32xf32, #tpu.memory_space<vmem>>, vector<1x1x32xf32>
    tpu.vector_store %arg31[%c0_220, %c0_221, %c0_222], %484 {strides = array<i32>} : memref<1x1x32xf32, #tpu.memory_space<vmem>>, vector<1x1x32xf32>,
    %c0_223 = arith.constant 0 : index
    %c0_224 = arith.constant 0 : index
    %486 = vector.load %arg28[%c0_223, %c0_224] : memref<32x10xf32, #tpu.memory_space<vmem>>, vector<32x10xf32>
    %cst_225 = arith.constant dense<0.000000e+00> : vector<1x10xf32>
    %487 = tpu.matmul %483, %486, %cst_225 {dimension_numbers = #tpu.dot_dimension_numbers<[1], [0], [0], [1], [0, 0, 1, 1], [], []>} : vector<1x32xf32>, vector<32x10xf32>, vector<1x10xf32> -> vector<1x10xf32>
    %c0_226 = arith.constant 0 : index
    %c0_227 = arith.constant 0 : index
    %488 = vector.load %arg29[%c0_226, %c0_227] : memref<1x10xf32, #tpu.memory_space<vmem>>, vector<1x10xf32>
    %489 = arith.addf %487, %488 : vector<1x10xf32>
    %490 = vector.shape_cast %489 : vector<1x10xf32> to vector<1x1x10xf32>
    %c0_228 = arith.constant 0 : index
    %c0_229 = arith.constant 0 : index
    %c0_230 = arith.constant 0 : index
    %491 = vector.load %arg32[%c0_228, %c0_229, %c0_230] : memref<1x1x10xf32, #tpu.memory_space<vmem>>, vector<1x1x10xf32>
    tpu.vector_store %arg32[%c0_228, %c0_229, %c0_230], %490 {strides = array<i32>} : memref<1x1x10xf32, #tpu.memory_space<vmem>>, vector<1x1x10xf32>,
    return
  }
  func.func @transform_0(%arg0: i32) -> (i32, i32, i32) {
    %c0_i32 = arith.constant 0 : i32
    %c0_i32_0 = arith.constant 0 : i32
    %c0_i32_1 = arith.constant 0 : i32
    return %arg0, %c0_i32, %c0_i32_0 : i32, i32, i32
  }
  func.func @transform_1(%arg0: i32) -> (i32, i32, i32) {
    %c0_i32 = arith.constant 0 : i32
    %c0_i32_0 = arith.constant 0 : i32
    %c0_i32_1 = arith.constant 0 : i32
    return %arg0, %c0_i32, %c0_i32_0 : i32, i32, i32
  }
  func.func @transform_2(%arg0: i32) -> (i32, i32) {
    %c0_i32 = arith.constant 0 : i32
    %c0_i32_0 = arith.constant 0 : i32
    %c0_i32_1 = arith.constant 0 : i32
    return %c0_i32, %c0_i32_0 : i32, i32
  }
  func.func @transform_3(%arg0: i32) -> (i32, i32) {
    %c0_i32 = arith.constant 0 : i32
    %c0_i32_0 = arith.constant 0 : i32
    %c0_i32_1 = arith.constant 0 : i32
    return %c0_i32, %c0_i32_0 : i32, i32
  }
  func.func @transform_4(%arg0: i32) -> (i32, i32) {
    %c0_i32 = arith.constant 0 : i32
    %c0_i32_0 = arith.constant 0 : i32
    %c0_i32_1 = arith.constant 0 : i32
    return %c0_i32, %c0_i32_0 : i32, i32
  }
  func.func @transform_5(%arg0: i32) -> (i32, i32) {
    %c0_i32 = arith.constant 0 : i32
    %c0_i32_0 = arith.constant 0 : i32
    %c0_i32_1 = arith.constant 0 : i32
    return %c0_i32, %c0_i32_0 : i32, i32
  }
  func.func @transform_6(%arg0: i32) -> (i32, i32) {
    %c0_i32 = arith.constant 0 : i32
    %c0_i32_0 = arith.constant 0 : i32
    %c0_i32_1 = arith.constant 0 : i32
    return %c0_i32, %c0_i32_0 : i32, i32
  }
  func.func @transform_7(%arg0: i32) -> (i32, i32) {
    %c0_i32 = arith.constant 0 : i32
    %c0_i32_0 = arith.constant 0 : i32
    %c0_i32_1 = arith.constant 0 : i32
    return %c0_i32, %c0_i32_0 : i32, i32
  }
  func.func @transform_8(%arg0: i32) -> (i32, i32) {
    %c0_i32 = arith.constant 0 : i32
    %c0_i32_0 = arith.constant 0 : i32
    %c0_i32_1 = arith.constant 0 : i32
    return %c0_i32, %c0_i32_0 : i32, i32
  }
  func.func @transform_9(%arg0: i32) -> (i32, i32) {
    %c0_i32 = arith.constant 0 : i32
    %c0_i32_0 = arith.constant 0 : i32
    %c0_i32_1 = arith.constant 0 : i32
    return %c0_i32, %c0_i32_0 : i32, i32
  }
  func.func @transform_10(%arg0: i32) -> (i32, i32) {
    %c0_i32 = arith.constant 0 : i32
    %c0_i32_0 = arith.constant 0 : i32
    %c0_i32_1 = arith.constant 0 : i32
    return %c0_i32, %c0_i32_0 : i32, i32
  }
  func.func @transform_11(%arg0: i32) -> (i32, i32) {
    %c0_i32 = arith.constant 0 : i32
    %c0_i32_0 = arith.constant 0 : i32
    %c0_i32_1 = arith.constant 0 : i32
    return %c0_i32, %c0_i32_0 : i32, i32
  }
  func.func @transform_12(%arg0: i32) -> (i32, i32) {
    %c0_i32 = arith.constant 0 : i32
    %c0_i32_0 = arith.constant 0 : i32
    %c0_i32_1 = arith.constant 0 : i32
    return %c0_i32, %c0_i32_0 : i32, i32
  }
  func.func @transform_13(%arg0: i32) -> (i32, i32) {
    %c0_i32 = arith.constant 0 : i32
    %c0_i32_0 = arith.constant 0 : i32
    %c0_i32_1 = arith.constant 0 : i32
    return %c0_i32, %c0_i32_0 : i32, i32
  }
  func.func @transform_14(%arg0: i32) -> (i32, i32, i32) {
    %c0_i32 = arith.constant 0 : i32
    %c0_i32_0 = arith.constant 0 : i32
    %c0_i32_1 = arith.constant 0 : i32
    %c0_i32_2 = arith.constant 0 : i32
    return %c0_i32, %c0_i32_0, %c0_i32_1 : i32, i32, i32
  }
  func.func @transform_15(%arg0: i32) -> (i32, i32, i32) {
    %c0_i32 = arith.constant 0 : i32
    %c0_i32_0 = arith.constant 0 : i32
    %c0_i32_1 = arith.constant 0 : i32
    %c0_i32_2 = arith.constant 0 : i32
    return %c0_i32, %c0_i32_0, %c0_i32_1 : i32, i32, i32
  }
  func.func @transform_16(%arg0: i32) -> (i32, i32, i32) {
    %c0_i32 = arith.constant 0 : i32
    %c0_i32_0 = arith.constant 0 : i32
    %c0_i32_1 = arith.constant 0 : i32
    %c0_i32_2 = arith.constant 0 : i32
    return %c0_i32, %c0_i32_0, %c0_i32_1 : i32, i32, i32
  }
  func.func @transform_17(%arg0: i32) -> (i32, i32, i32) {
    %c0_i32 = arith.constant 0 : i32
    %c0_i32_0 = arith.constant 0 : i32
    %c0_i32_1 = arith.constant 0 : i32
    %c0_i32_2 = arith.constant 0 : i32
    return %c0_i32, %c0_i32_0, %c0_i32_1 : i32, i32, i32
  }
  func.func @transform_18(%arg0: i32) -> (i32, i32, i32) {
    %c0_i32 = arith.constant 0 : i32
    %c0_i32_0 = arith.constant 0 : i32
    %c0_i32_1 = arith.constant 0 : i32
    %c0_i32_2 = arith.constant 0 : i32
    return %c0_i32, %c0_i32_0, %c0_i32_1 : i32, i32, i32
  }
  func.func @transform_19(%arg0: i32) -> (i32, i32, i32) {
    %c0_i32 = arith.constant 0 : i32
    %c0_i32_0 = arith.constant 0 : i32
    %c0_i32_1 = arith.constant 0 : i32
    %c0_i32_2 = arith.constant 0 : i32
    return %c0_i32, %c0_i32_0, %c0_i32_1 : i32, i32, i32
  }
  func.func @transform_20(%arg0: i32) -> (i32, i32, i32) {
    %c0_i32 = arith.constant 0 : i32
    %c0_i32_0 = arith.constant 0 : i32
    %c0_i32_1 = arith.constant 0 : i32
    %c0_i32_2 = arith.constant 0 : i32
    return %c0_i32, %c0_i32_0, %c0_i32_1 : i32, i32, i32
  }
  func.func @transform_21(%arg0: i32) -> (i32, i32, i32) {
    %c0_i32 = arith.constant 0 : i32
    %c0_i32_0 = arith.constant 0 : i32
    %c0_i32_1 = arith.constant 0 : i32
    %c0_i32_2 = arith.constant 0 : i32
    return %c0_i32, %c0_i32_0, %c0_i32_1 : i32, i32, i32
  }
  func.func @transform_22(%arg0: i32) -> (i32, i32, i32) {
    %c0_i32 = arith.constant 0 : i32
    %c0_i32_0 = arith.constant 0 : i32
    %c0_i32_1 = arith.constant 0 : i32
    %c0_i32_2 = arith.constant 0 : i32
    return %c0_i32, %c0_i32_0, %c0_i32_1 : i32, i32, i32
  }
  func.func @transform_23(%arg0: i32) -> (i32, i32, i32) {
    %c0_i32 = arith.constant 0 : i32
    %c0_i32_0 = arith.constant 0 : i32
    %c0_i32_1 = arith.constant 0 : i32
    %c0_i32_2 = arith.constant 0 : i32
    return %c0_i32, %c0_i32_0, %c0_i32_1 : i32, i32, i32
  }
  func.func @transform_24(%arg0: i32) -> (i32, i32, i32) {
    %c0_i32 = arith.constant 0 : i32
    %c0_i32_0 = arith.constant 0 : i32
    %c0_i32_1 = arith.constant 0 : i32
    %c0_i32_2 = arith.constant 0 : i32
    return %c0_i32, %c0_i32_0, %c0_i32_1 : i32, i32, i32
  }
  func.func @transform_25(%arg0: i32) -> (i32, i32) {
    %c0_i32 = arith.constant 0 : i32
    %c0_i32_0 = arith.constant 0 : i32
    %c0_i32_1 = arith.constant 0 : i32
    return %c0_i32, %c0_i32_0 : i32, i32
  }
  func.func @transform_26(%arg0: i32) -> (i32, i32) {
    %c0_i32 = arith.constant 0 : i32
    %c0_i32_0 = arith.constant 0 : i32
    %c0_i32_1 = arith.constant 0 : i32
    return %c0_i32, %c0_i32_0 : i32, i32
  }
  func.func @transform_27(%arg0: i32) -> (i32, i32) {
    %c0_i32 = arith.constant 0 : i32
    %c0_i32_0 = arith.constant 0 : i32
    %c0_i32_1 = arith.constant 0 : i32
    return %c0_i32, %c0_i32_0 : i32, i32
  }
  func.func @transform_28(%arg0: i32) -> (i32, i32) {
    %c0_i32 = arith.constant 0 : i32
    %c0_i32_0 = arith.constant 0 : i32
    %c0_i32_1 = arith.constant 0 : i32
    return %c0_i32, %c0_i32_0 : i32, i32
  }
  func.func @transform_29(%arg0: i32) -> (i32, i32, i32) {
    %c0_i32 = arith.constant 0 : i32
    %c0_i32_0 = arith.constant 0 : i32
    %c0_i32_1 = arith.constant 0 : i32
    return %arg0, %c0_i32, %c0_i32_0 : i32, i32, i32
  }
  func.func @transform_30(%arg0: i32) -> (i32, i32, i32) {
    %c0_i32 = arith.constant 0 : i32
    %c0_i32_0 = arith.constant 0 : i32
    %c0_i32_1 = arith.constant 0 : i32
    return %arg0, %c0_i32, %c0_i32_0 : i32, i32, i32
  }
  func.func @transform_31(%arg0: i32) -> (i32, i32, i32) {
    %c0_i32 = arith.constant 0 : i32
    %c0_i32_0 = arith.constant 0 : i32
    %c0_i32_1 = arith.constant 0 : i32
    return %arg0, %c0_i32, %c0_i32_0 : i32, i32, i32
  }
}

</mosaic_0001>

<bundles_post_ra>
// kernel: pvit_forward.1
= control target key start
LH: loop header
LB: loop body
LE: loop exit
PB: predicated region body
PF: predicated region fallthrough
CT: control target
= control target key end

     0   :  { %s6367_s6 = smov 1   ;;  %s6368_s10 = smov 2   ;;  %s7559_s0 = inlined_call_operand.smem [shape: u32[32], index: -1, kind: input, shape index: {}] }
   0x1   :  { %s6422_s5 = sld [smem:[%s7559_s0]]   ;;  %s6369_s14 = smov 3  }
   0x2   :  { %s6427_s9 = sld [smem:[%s7559_s0 + %s6367_s6]]   ;;  %s6370_s18 = smov 4  }
   0x3   :  { %s6432_s13 = sld [smem:[%s7559_s0 + %s6368_s10]]   ;;  %s6371_s22 = smov 5  }
   0x4   :  { %s6437_s17 = sld [smem:[%s7559_s0 + %s6369_s14]]   ;;  %s6372_s26 = smov 6  }
   0x5   :  { %s6442_s21 = sld [smem:[%s7559_s0 + %s6370_s18]]   ;;  %s6373_s30 = smov 7  }
   0x6   :  { %s6447_s25 = sld [smem:[%s7559_s0 + %s6371_s22]]   ;;  %s6374_s4 = smov 8  }
   0x7   :  { %7608 = sst [smem:[#allocation11_spill]] %s6422_s5  ;;  %s6375_s10 = smov 9  }
   0x8   :  { %7609 = sst [smem:[#allocation12_spill]] %s6427_s9  ;;  %s6376_s15 = smov 10  }
   0x9   :  { %7610 = sst [smem:[#allocation13_spill]] %s6432_s13  ;;  %s6377_s20 = smov 11  }
   0xa   :  { %7611 = sst [smem:[#allocation14_spill]] %s6437_s17  ;;  %s6379_s1 = smov 13  }
   0xb   :  { %s6452_s29 = sld [smem:[%s7559_s0 + %s6372_s26]]   ;;  %s6378_s26 = smov 12  }
   0xc   :  { %s6457_s3 = sld [smem:[%s7559_s0 + %s6373_s30]]   ;;  %s6380_s7 = smov 14  }
   0xd   :  { %s6462_s8 = sld [smem:[%s7559_s0 + %s6374_s4]]   ;;  %s6382_s22 = smov 16  }
   0xe   :  { %s6467_s14 = sld [smem:[%s7559_s0 + %s6375_s10]]   ;;  %s6383_s28 = smov 17  }
   0xf   :  { %s6472_s19 = sld [smem:[%s7559_s0 + %s6376_s15]]   ;;  %s6381_s15 = smov 15  }
  0x10   :  { %s6477_s24 = sld [smem:[%s7559_s0 + %s6377_s20]]  }
  0x11   :  { %s6482_s30 = sld [smem:[%s7559_s0 + %s6378_s26]]  }
  0x12   :  { %7612 = sst [smem:[#allocation15_spill]] %s6457_s3 }
  0x13   :  { %7613 = sst [smem:[#allocation16_spill]] %s6462_s8 }
  0x14   :  { %7614 = sst [smem:[#allocation17_spill]] %s6467_s14 }
  0x15   :  { %7615 = sst [smem:[#allocation18_spill]] %s6472_s19 }
  0x16   :  { %s6487_s6 = sld [smem:[%s7559_s0 + %s6379_s1]]  }
  0x17   :  { %s6492_s12 = sld [smem:[%s7559_s0 + %s6380_s7]]   ;;  %s6384_s7 = smov 18  }
  0x18   :  { %s6497_s20 = sld [smem:[%s7559_s0 + %s6381_s15]]   ;;  %s6385_s15 = smov 19  }
  0x19   :  { %s6502_s27 = sld [smem:[%s7559_s0 + %s6382_s22]]   ;;  %s6386_s22 = smov 20  }
  0x1a   :  { %s6507_s4 = sld [smem:[%s7559_s0 + %s6383_s28]]   ;;  %s6387_s28 = smov 21  }
  0x1c   :  { %69 = sst [smem:[#allocation3]] %s6487_s6 }
  0x1d   :  { %7616 = sst [smem:[#allocation19_spill]] %s6492_s12 }
  0x1e   :  { %7617 = sst [smem:[#allocation20_spill]] %s6497_s20 }
  0x1f   :  { %7618 = sst [smem:[#allocation21_spill]] %s6502_s27 }
  0x20   :  { %7619 = sst [smem:[#allocation22_spill]] %s6507_s4 }
  0x21   :  { %s6512_s12 = sld [smem:[%s7559_s0 + %s6384_s7]]   ;;  %s6388_s7 = smov 22  }
  0x22   :  { %s6517_s20 = sld [smem:[%s7559_s0 + %s6385_s15]]   ;;  %s6389_s15 = smov 23  }
  0x23   :  { %s6522_s27 = sld [smem:[%s7559_s0 + %s6386_s22]]   ;;  %s6390_s22 = smov 24  }
  0x24   :  { %s6527_s4 = sld [smem:[%s7559_s0 + %s6387_s28]]   ;;  %s6391_s28 = smov 25  }
  0x25   :  { %s6542_s1 = sld [smem:[%s7559_s0 + %s6390_s22]]   ;;  %s6394_s22 = smov 28  }
  0x26   :  { %s6547_s10 = sld [smem:[%s7559_s0 + %s6391_s28]]  }
  0x27   :  { %7620 = sst [smem:[#allocation23_spill]] %s6512_s12 }
  0x28   :  { %7621 = sst [smem:[#allocation24_spill]] %s6517_s20 }
  0x29   :  { %7622 = sst [smem:[#allocation25_spill]] %s6522_s27  ;;  %s6395_s27 = smov 29  }
  0x2a   :  { %7623 = sst [smem:[#allocation26_spill]] %s6527_s4 }
  0x2b   :  { %s6532_s12 = sld [smem:[%s7559_s0 + %s6388_s7]]   ;;  %s6392_s7 = smov 26  }
  0x2c   :  { %s6537_s20 = sld [smem:[%s7559_s0 + %s6389_s15]]   ;;  %s6393_s15 = smov 27  }
  0x2d   :  { %7626 = sst [smem:[#allocation29_spill]] %s6542_s1 }
  0x2e   :  { %7627 = sst [smem:[#allocation30_spill]] %s6547_s10 }
  0x2f   :  { %s6552_s16 = sld [smem:[%s7559_s0 + %s6392_s7]]  }
  0x30   :  { %s6557_s23 = sld [smem:[%s7559_s0 + %s6393_s15]]  }
  0x31   :  { %7624 = sst [smem:[#allocation27_spill]] %s6532_s12  ;;  %s6396_s12 = smov 30  }
  0x32   :  { %7625 = sst [smem:[#allocation28_spill]] %s6537_s20  ;;  %s6397_s20 = smov 31  }
  0x33   :  { %s6562_s4 = sld [smem:[%s7559_s0 + %s6394_s22]]  }
  0x34   :  { %s6567_s10 = sld [smem:[%s7559_s0 + %s6395_s27]]  }
  0x35   :  { %7628 = sst [smem:[#allocation31_spill]] %s6552_s16 }
  0x36   :  { %7629 = sst [smem:[#allocation32_spill]] %s6557_s23 }
  0x37   :  { %s6572_s16 = sld [smem:[%s7559_s0 + %s6396_s12]]  }
  0x38   :  { %s6577_s23 = sld [smem:[%s7559_s0 + %s6397_s20]]  }
  0x3d   :  { %7630 = sst [smem:[#allocation33_spill]] %s6572_s16 }
  0x3e   :  { %70 = vsyncpa [#allocation5], 0 }
  0x3f   :  { %72 = vsyncpa [#allocation5 + $0x1], 0 }
  0x40   :  { %73 = vsyncpa [#allocation7], 0 }
  0x41   :  { %75 = vsyncpa [#allocation7 + $0x1], 0  ;;  %s6580_s1 = smov 0   ;;  %s6582_s22 = smov 0  }
  0x42   :  { %s6584_s26 = smov 0   ;;  %s6586_s27 = smov 0  }
  0x43 LB: > { %s7631_s16 = sld [smem:[#allocation33_spill]]  ;;  %s6601_s0 = sadd.s32 4294967295, %s6365_s27   ;;  %s6357_s22 = sphi %s6582_s22, %s7670_s22   ;;  %s6353_s1 = sphi %s6580_s1, %s7669_s1   ;;  %s6365_s27 = sphi %s6586_s27, %s7672_s27   ;;  %s6361_s26 = sphi %s6584_s26, %s7671_s26  }
  0x44   : > { %s7632_s19 = sld [smem:[#allocation18_spill]]  ;;  %s7572_s6 = sadd.s32 4294967294, %s6365_s27  }
  0x45   : > { %s6605_s28 = sadd.s32 1, %s6365_s27   ;;  %s707_s2 = sadd.s32 1, %s6361_s26 }
  0x46   : > { %s704_s12 = ssub.s32 %s6365_s27, %s6605_s28  ;;  %p717_p0 = scmp.ne.s32.totalorder %s6361_s26, %s6357_s22 }
  0x47   : > { %p705_p1 = scmp.eq.s32.totalorder %s704_s12, 0  ;;  %p718_p2 = scmp.eq.s32.totalorder %s6601_s0, 1 }
  0x48   : > { %p723_p3 = scmp.ne.s32.totalorder %s6357_s22, %s6353_s1  ;;  %p724_p4 = scmp.eq.s32.totalorder %s7572_s6, 1 }
  0x49   : > { %s6618_s7 = scalar_select %p705_p1, %s6361_s26, %s707_s2  }
  0x4a   : > { %p6620_p5 = por %p718_p2, %p717_p0  ;;  %p6624_p6 = por %p724_p4, %p723_p3 }
  0x4b   : > { %p5154_p7 = scmp.ge.s32.totalorder %s6365_s27, 1  ;;  %p889_p8 = scmp.lt.s32.totalorder %s6365_s27, 3 }
  0x4d   : > { %p890_p9 = pnand %p5154_p7, %p889_p8 }
  0x4e   : > { %s7635_s5 = sld [smem:[#allocation11_spill]] (!%p890_p9)  ;;  %p979_p10 = scmp.lt.s32.totalorder (!%p890_p9), %s6601_s0, 1 }
  0x4f   : > { %893 = sbr.rel (%p890_p9) target bundleno = 8501 (0x2135), region = 136  ;;  %s7636_s9 = sld [smem:[#allocation12_spill]] (!%p890_p9) }
  0x50   : > { %s7637_s13 = sld [smem:[#allocation13_spill]] (!%p890_p9) }
  0x51   : > { %s7638_s17 = sld [smem:[#allocation14_spill]] (!%p890_p9) }
  0x52   : > { %s7639_s8 = sld [smem:[#allocation16_spill]] (!%p890_p9) }
  0x53   : > { %s7640_s14 = sld [smem:[#allocation17_spill]] (!%p890_p9) }
  0x54   : > { %s980_s15 = scalar_select %p979_p10, %s6601_s0, 1  ;;  %vm991_vm0 = vcmask 392192   ;;  %vm1176_vm1 = vcmask 73728   ;;  %v1040_v16 = vld [vmem:[%s6442_s21 + $0x28] sm:$0xff]  ;;  %v1039_v18 = vld [vmem:[%s6442_s21 + $0x20] sm:$0xff]  ;;  %v1038_v20 = vld [vmem:[%s6442_s21 + $0x18] sm:$0xff] }
  0x55   : > { %5522 = vmatprep.subr.mxu0 %v1040_v16  ;;  %v1037_v22 = vld [vmem:[%s6442_s21 + $0x10] sm:$0xff]  ;;  %v1036_v23 = vld [vmem:[%s6442_s21 + $0x8] sm:$0xff]  ;;  %v1035_v24 = vld [vmem:[%s6442_s21] sm:$0xff]  ;;  %vm1195_vm2 = vcmask 1041408   ;;  %v6398_v28 = vmov 0.0   ;;  %vm6399_vm3 = vmmov 0  }
  0x56   : > { %s5327_s18 = sshll.u32 %s980_s15, 4  ;;  %s986_s12 = scalar_lea.vmem %s7636_s9, %s980_s15  ;;  %5523 = vmatpush3.msra.mxu0 %v1040_v16  ;;  %v1189_v27 = vld [vmem:[%s6477_s24 + $0x8] sm:$0x3]  ;;  %5537 = vmatprep.subr.mxu1 %v6398_v28  ;;  %v1188_v29 = vld [vmem:[%s6477_s24] sm:$0xff]  ;;  %vm1191_vm4 = vcmask 80896   ;;  %vm1131_vm5 = vcmask 261120  }
  0x57   : > { %s983_s2 = scalar_lea.vmem %s7635_s5, %s5327_s18  ;;  %v1175_v4 = vld [vmem:[%s986_s12] sm:$0x1]  ;;  %5524 = vmatprep.subr.mxu0 %v1039_v18  ;;  %5541 = vmatprep.mubr.msk.f32.mxu1 %vm6399_vm3, %v6398_v28  ;;  %s1281_s15 = sld [smem:[#allocation3]]  ;;  %vm1269_vm6 = vcmask 253952   ;;  %vm1285_vm7 = vcmask 259072   ;;  %vm1458_vm8 = vcmask 64512  }
  0x58   : > { %v987_v0 = vld [vmem:[%s983_s2] sm:$0xff]  ;;  %v988_v1 = vld [vmem:[%s983_s2 + $0x8] sm:$0xff]  ;;  %v1177_v5 = vsel %vm1176_vm1, %v1175_v4, -inf  ;;  %5525 = vmatpush3.msra.mxu0 %v1039_v18  ;;  %5538 = vmatpush3.msk.msra.mxu1 %vm1195_vm2, %v1189_v27  ;;  %s6671_s18 = sand.u32 1, %s6357_s22   ;;  %1286 = vst.msk [vmem:[#allocation2 + $0x12] sm:$0x3f] %vm1285_vm7, %v6398_v28 }
  0x59   : > { %v992_v2 = vsel %vm991_vm0, %v987_v0, 0.0  ;;  %v995_v3 = vsel %vm991_vm0, %v988_v1, 0.0  ;;  %5526 = vmatprep.subr.mxu0 %v1038_v20  ;;  %5539 = vmatprep.subr.mxu1 %v6398_v28  ;;  %v5157_v37 = vld [vmem:[%s7637_s13] ss:$0 sm:$0xff]  ;;  %s7573_s2 = scalar_lea.vmem [#allocation4], %s6671_s18  ;;  %s7641_s3 = sld [smem:[#allocation15_spill]] }
  0x5a   : > { %993 = vadd.xlane.f32.xlu0 %v992_v2  ;;  %5527 = vmatpush3.msra.mxu0 %v1038_v20  ;;  %v5158_v39 = vld [vmem:[%s7638_s17] ss:$0 sm:$0xff]  ;;  %s7642_s12 = sld [smem:[#allocation21_spill]]  ;;  %s7574_s5 = smov 120   ;;  %vm1556_vm10 = vcmask 195584   ;;  %vm2978_vm11 = vcmask 523264  }
  0x5b   : > { %5528 = vmatprep.subr.mxu0 %v1037_v22  ;;  %5540 = vmatpush3.msra.mxu1 %v1188_v29  ;;  %v5159_v49 = vld [vmem:[%s6447_s25] ss:$0 sm:$0xff]  ;;  %s7644_s6 = sld [smem:[#allocation20_spill]] }
  0x5c   : > { %5529 = vmatpush3.msra.mxu0 %v1037_v22  ;;  %5544 = vmatprep.subr.mxu1 %v6398_v28  ;;  %v1277_v56 = vld [vmem:[%s7639_s8] sm:$0x1]  ;;  %s7646_s8 = smov 72   ;;  %s7649_s9 = sld [smem:[#allocation24_spill]] }
  0x5d   : > { %5530 = vmatprep.subr.mxu0 %v1036_v23  ;;  %v1278_v57 = vld [vmem:[%s7640_s14] sm:$0x1]  ;;  %v1282_v63 = vstv %s1281_s15  ;;  %s7643_s15 = sld [smem:[#allocation19_spill]] }
  0x5e   : > { %996 = vadd.xlane.f32.xlu0 %v995_v3  ;;  %5531 = vmatpush3.msra.mxu0 %v1036_v23  ;;  %v1190_v58 = vld [vmem:[%s6482_s30] sm:$0x1]  ;;  %v1279_v59 = vadd.f32 %v1278_v57, %v1277_v56  ;;  %s7650_s13 = sld [smem:[#allocation25_spill]] }
  0x5f   : > { %5532 = vmatprep.subr.mxu0 %v1035_v24  ;;  %v5162_v18 = vld [vmem:[%s6452_s29] ss:$0 sm:$0xff]  ;;  %s7651_s14 = sld [smem:[#allocation28_spill]] }
  0x60   : > { %5533 = vmatpush3.msra.mxu0 %v1035_v24  ;;  %1280 = vst.msk [vmem:[#allocation2 + $0x10] sm:$0x1] %vm1269_vm6, %v1279_v59  ;;  %v1272_v24 = vld [vmem:[%s7632_s19 + $0x8] sm:$0xff]  ;;  %v1271_v27 = vld [vmem:[%s7632_s19] sm:$0xff]  ;;  %s7652_s17 = sld [smem:[#allocation27_spill]] }
  0x61   : > { %5561 = vmatprep.subr.mxu0 %v6398_v28  ;;  %v1352_v56 = vld [vmem:[%s7642_s12] sm:$0xff]  ;;  %s7653_s19 = sld [smem:[#allocation29_spill]] }
  0x62   : > { %1178 = vmax.xlane.f32.xlu0 %v1177_v5 }
  0xe3   : > { %v994_v6 = vpop.xlane.xlu0 %993 }
  0xe4   : > { %v999_v7 = vmul.f32 0.020833334, %v994_v6 }
  0xe6   : > { %v1001_v8 = vsub.f32 %v987_v0, %v999_v7 }
  0xe7   : > { %v997_v9 = vpop.xlane.xlu0 %996 }
  0xe8   : > { %v1000_v10 = vmul.f32 0.020833334, %v997_v9  ;;  %v1003_v11 = vmul.f32 %v1001_v8, %v1001_v8 }
  0xea   : > { %v1002_v12 = vsub.f32 %v988_v1, %v1000_v10  ;;  %v1005_v13 = vsel %vm991_vm0, %v1003_v11, 0.0 }
  0xeb   : > { %1006 = vadd.xlane.f32.xlu1 %v1005_v13  ;;  %v1179_v17 = vpop.xlane.xlu0 %1178 }
  0xec   : > { %v1004_v14 = vmul.f32 %v1002_v12, %v1002_v12  ;;  %v1180_v19 = vsub.f32 %v1175_v4, %v1179_v17 }
  0xee   : > { %v1008_v15 = vsel %vm991_vm0, %v1004_v14, 0.0  ;;  %v1181_v21 = vmul.f32 1.442695, %v1180_v19 }
  0xef   : > { %1009 = vadd.xlane.f32.xlu1 %v1008_v15 }
  0xf0   : > { %6100 = vpow2.f32 %v1181_v21  ;;  %v5163_v21 = vld [vmem:[%s7641_s3] ss:$0 sm:$0xff]  ;;  %s7576_s3 = smov 88  }
  0xfd   : > { %v6101_v25 = vpop.eup %6100 }
  0xfe   : > { %v1183_v26 = vsel %vm1176_vm1, %v6101_v25, 0.0 }
  0xff   : > { %1184 = vadd.xlane.f32.xlu1 %v1183_v26 }
 0x174   : > { %v1007_v30 = vpop.xlane.xlu1 %1006 }
 0x175   : > { %v1011_v31 = vmul.f32 0.020833334, %v1007_v30 }
 0x177   : > { %v1013_v32 = vadd.f32 1e-05, %v1011_v31 }
 0x178   : > { %v1010_v33 = vpop.xlane.xlu1 %1009 }
 0x179   : > { %6102 = vrsqrt.f32 %v1013_v32  ;;  %v1012_v34 = vmul.f32 0.020833334, %v1010_v33 }
 0x17b   : > { %v1014_v35 = vadd.f32 1e-05, %v1012_v34 }
 0x17d   : > { %6104 = vrsqrt.f32 %v1014_v35 }
 0x186   : > { %v6103_v36 = vpop.eup %6102 }
 0x187   : > { %v1017_v38 = vmul.f32 %v6103_v36, %v1001_v8 }
 0x188   : > { %v1185_v46 = vpop.xlane.xlu1 %1184 }
 0x189   : > { %v1025_v40 = vmul.f32 %v5157_v37, %v1017_v38  ;;  %6106 = vrcp.f32 %v1185_v46 }
 0x18a   : > { %v6105_v41 = vpop.eup %6104 }
 0x18b   : > { %v1018_v42 = vmul.f32 %v6105_v41, %v1002_v12  ;;  %v1033_v43 = vadd.f32 %v5158_v39, %v1025_v40 }
 0x18d   : > { %v1026_v44 = vmul.f32 %v5157_v37, %v1018_v42  ;;  %5534 = vmatprep.mubr.msk.f32.mxu0 %vm991_vm0, %v1033_v43 }
 0x18f   : > { %v1034_v45 = vadd.f32 %v5158_v39, %v1026_v44 }
 0x191   : > { %5535 = vmatmul.mubr.msk.f32.vlgmr.msra.gmra.mxu0 %vm991_vm0, %v1034_v45 }
 0x192   : > { %5567 = vmatprep.mubr.msk.f32.mxu0 %vm6399_vm3, %v6398_v28 }
 0x196   : > { %v6107_v47 = vpop.eup %6106 }
 0x197   : > { %v1187_v48 = vmul.f32 %v6107_v47, %v6101_v25 }
 0x199   : > { %5542 = vmatmul.mubr.msk.f32.vlgmr.msra.gmra.mxu1 %vm1191_vm4, %v1187_v48 }
 0x19a   : > { %5552 = vmatprep.mubr.msk.f32.mxu1 %vm6399_vm3, %v6398_v28 }
 0x251   : > { %v5536_v50 = vpop.f32.mrf.mxu0 }
 0x252   : > { %v1126_v51 = vadd.f32 %v5536_v50, %v5159_v49 }
 0x253   : > { %v1120_v52 = vpop.f32.mrf.mxu0 }
 0x254   : > { %v1121_v53 = vadd.f32 %v5159_v49, %v1120_v52  ;;  %v1135_v54 = vsel %vm1131_vm5, %v1126_v51, 0.0 }
 0x255   : > { %1136 = vadd.xlane.f32.xlu1 %v1135_v54  ;;  %v1354_v54 = vld [vmem:[%s7642_s12 + $0x10] sm:$0xff] }
 0x256   : > { %v1132_v55 = vsel %vm1131_vm5, %v1121_v53, 0.0 }
 0x257   : > { %1133 = vadd.xlane.f32.xlu0 %v1132_v55  ;;  %v1353_v55 = vld [vmem:[%s7642_s12 + $0x8] sm:$0xff] }
 0x259   : > { %v1265_v60 = vpop.f32.mrf.mxu1 }
 0x25a   : > { %v1266_v61 = vadd.f32 %v1265_v60, %v1190_v58 }
 0x25b   : > { %v5543_v62 = vpop.f32.mrf.mxu1 }
 0x25c   : > { %v1283_v0 = vmul.f32 %v1282_v63, %v1266_v61  ;;  %1270 = vst.msk [vmem:[%s7573_s2] sm:$0x1] %vm1269_vm6, %v1266_v61  ;;  %s7580_s2 = smov 96  }
 0x25e   : > { %1284 = vst.msk [vmem:[#allocation2 + $0x11] sm:$0x1] %vm1269_vm6, %v1283_v0 }
 0x265   : > { %v1289_v36 = vld [vmem:[#allocation2 + $0x10] sm:$0xff] }
 0x266   : > { %v1301_v37 = vsel %vm1131_vm5, %v1289_v36, 0.0 }
 0x2de   : > { %v1137_v1 = vpop.xlane.xlu1 %1136 }
 0x2df   : > { %v1140_v2 = vmul.f32 0.03125, %v1137_v1 }
 0x2e0   : > { %v1134_v3 = vpop.xlane.xlu0 %1133 }
 0x2e1   : > { %v1142_v4 = vsub.f32 %v1126_v51, %v1140_v2  ;;  %v1139_v5 = vmul.f32 0.03125, %v1134_v3 }
 0x2e3   : > { %v1141_v6 = vsub.f32 %v1121_v53, %v1139_v5  ;;  %v1144_v7 = vmul.f32 %v1142_v4, %v1142_v4  ;;  %v1355_v53 = vld [vmem:[%s7642_s12 + $0x18] sm:$0xff] }
 0x2e4   : > { %5545 = vmatpush3.msra.mxu1 %v1355_v53 }
 0x2e5   : > { %v1148_v8 = vsel %vm1131_vm5, %v1144_v7, 0.0  ;;  %v1143_v9 = vmul.f32 %v1141_v6, %v1141_v6  ;;  %5546 = vmatprep.subr.mxu1 %v6398_v28 }
 0x2e6   : > { %1149 = vadd.xlane.f32.xlu1 %v1148_v8  ;;  %5547 = vmatpush3.msra.mxu1 %v1354_v54 }
 0x2e7   : > { %v1145_v10 = vsel %vm1131_vm5, %v1143_v9, 0.0  ;;  %5548 = vmatprep.subr.mxu1 %v6398_v28  ;;  %v5167_v9 = vld [vmem:[%s7644_s6] ss:$0 sm:$0xff] }
 0x2e8   : > { %1146 = vadd.xlane.f32.xlu0 %v1145_v10  ;;  %5549 = vmatpush3.msra.mxu1 %v1353_v55 }
 0x2e9   : > { %5550 = vmatprep.subr.mxu1 %v6398_v28 }
 0x2ea   : > { %5551 = vmatpush3.msra.mxu1 %v1352_v56 }
 0x2eb   : > { %5576 = vmatprep.subr.mxu1 %v6398_v28 }
 0x36f   : > { %v1150_v11 = vpop.xlane.xlu1 %1149 }
 0x370   : > { %v1152_v12 = vmul.f32 0.03125, %v1150_v11 }
 0x371   : > { %v1147_v13 = vpop.xlane.xlu0 %1146 }
 0x372   : > { %v1154_v14 = vadd.f32 1e-05, %v1152_v12  ;;  %v1151_v15 = vmul.f32 0.03125, %v1147_v13 }
 0x374   : > { %6108 = vrsqrt.f32 %v1154_v14  ;;  %v1153_v16 = vadd.f32 1e-05, %v1151_v15 }
 0x376   : > { %6110 = vrsqrt.f32 %v1153_v16 }
 0x381   : > { %v6109_v17 = vpop.eup %6108 }
 0x382   : > { %v1158_v19 = vmul.f32 %v6109_v17, %v1142_v4 }
 0x383   : > { %v6111_v20 = vpop.eup %6110 }
 0x384   : > { %v1166_v22 = vmul.f32 %v5162_v18, %v1158_v19  ;;  %v1157_v23 = vmul.f32 %v6111_v20, %v1141_v6  ;;  %v5166_v6 = vld [vmem:[%s7643_s15] ss:$0 sm:$0xff] }
 0x386   : > { %v1174_v25 = vadd.f32 %v5163_v21, %v1166_v22  ;;  %v1165_v26 = vmul.f32 %v5162_v18, %v1157_v23 }
 0x388   : > { %v1274_v29 = vadd.f32 %v1272_v24, %v1174_v25  ;;  %v1173_v30 = vadd.f32 %v5163_v21, %v1165_v26 }
 0x38a   : > { %1276 = vst.msk [vmem:[#allocation2 + $0x8] sm:$0xff] %vm1131_vm5, %v1274_v29  ;;  %v1273_v31 = vadd.f32 %v1271_v27, %v1173_v30 }
 0x38c   : > { %1275 = vst.msk [vmem:[#allocation2] sm:$0xff] %vm1131_vm5, %v1273_v31 }
 0x391   : > { %v1288_v32 = vld [vmem:[#allocation2 + $0x8] sm:$0xff] }
 0x392   : > { %v1298_v33 = vsel %vm1131_vm5, %v1288_v32, 0.0 }
 0x393   : > { %1299 = vadd.xlane.f32.xlu1 %v1298_v33  ;;  %v1287_v34 = vld [vmem:[#allocation2] sm:$0xff] }
 0x394   : > { %v1295_v35 = vsel %vm1131_vm5, %v1287_v34, 0.0 }
 0x395   : > { %1296 = vadd.xlane.f32.xlu0 %v1295_v35 }
 0x399   : > { %1302 = vadd.xlane.f32.xlu0 %v1301_v37 }
 0x41c   : > { %v1300_v38 = vpop.xlane.xlu1 %1299 }
 0x41d   : > { %v1305_v39 = vmul.f32 0.03125, %v1300_v38 }
 0x41e   : > { %v1297_v40 = vpop.xlane.xlu0 %1296 }
 0x41f   : > { %v1308_v41 = vsub.f32 %v1288_v32, %v1305_v39  ;;  %v1304_v42 = vmul.f32 0.03125, %v1297_v40  ;;  %v1290_v32 = vlaneseq }
 0x421   : > { %v1307_v43 = vsub.f32 %v1287_v34, %v1304_v42  ;;  %v1311_v44 = vmul.f32 %v1308_v41, %v1308_v41  ;;  %v6768_v33 = vand.u32 127, %v1290_v32 }
 0x422   : > { %v1303_v45 = vpop.xlane.xlu0 %1302 }
 0x423   : > { %v1306_v46 = vmul.f32 0.03125, %v1303_v45  ;;  %v1316_v47 = vsel %vm1131_vm5, %v1311_v44, 0.0  ;;  %v1310_v48 = vmul.f32 %v1307_v43, %v1307_v43  ;;  %vm1292_vm9 = vcmp.lt.s32.totalorder %v6768_v33, 18 }
 0x424   : > { %1317 = vadd.xlane.f32.xlu0 %v1316_v47 }
 0x425   : > { %v1309_v49 = vsub.f32 %v1289_v36, %v1306_v46  ;;  %v1313_v50 = vsel %vm1131_vm5, %v1310_v48, 0.0 }
 0x426   : > { %1314 = vadd.xlane.f32.xlu1 %v1313_v50 }
 0x427   : > { %v1312_v51 = vmul.f32 %v1309_v49, %v1309_v49 }
 0x429   : > { %v1319_v52 = vsel %vm1131_vm5, %v1312_v51, 0.0 }
 0x42a   : > { %1320 = vadd.xlane.f32.xlu1 %v1319_v52 }
 0x4ad   : > { %v1318_v57 = vpop.xlane.xlu0 %1317 }
 0x4ae   : > { %v1323_v58 = vmul.f32 0.03125, %v1318_v57 }
 0x4af   : > { %v1315_v59 = vpop.xlane.xlu1 %1314 }
 0x4b0   : > { %v1326_v60 = vadd.f32 1e-05, %v1323_v58  ;;  %v1322_v61 = vmul.f32 0.03125, %v1315_v59 }
 0x4b2   : > { %6112 = vrsqrt.f32 %v1326_v60  ;;  %v1325_v62 = vadd.f32 1e-05, %v1322_v61 }
 0x4b3   : > { %v1321_v63 = vpop.xlane.xlu1 %1320 }
 0x4b4   : > { %6114 = vrsqrt.f32 %v1325_v62  ;;  %v1324_v0 = vmul.f32 0.03125, %v1321_v63 }
 0x4b6   : > { %v1327_v1 = vadd.f32 1e-05, %v1324_v0 }
 0x4b8   : > { %6116 = vrsqrt.f32 %v1327_v1 }
 0x4bf   : > { %v6113_v2 = vpop.eup %6112 }
 0x4c0   : > { %v1332_v5 = vmul.f32 %v6113_v2, %v1308_v41 }
 0x4c1   : > { %v6115_v3 = vpop.eup %6114 }
 0x4c2   : > { %v1331_v4 = vmul.f32 %v6115_v3, %v1307_v43  ;;  %v1341_v11 = vmul.f32 %v5166_v6, %v1332_v5 }
 0x4c4   : > { %v1340_v7 = vmul.f32 %v5166_v6, %v1331_v4  ;;  %v1350_v13 = vadd.f32 %v5167_v9, %v1341_v11 }
 0x4c5   : > { %v6117_v8 = vpop.eup %6116 }
 0x4c6   : > { %v1349_v10 = vadd.f32 %v5167_v9, %v1340_v7  ;;  %v1333_v12 = vmul.f32 %v6117_v8, %v1309_v49 }
 0x4c8   : > { %5553 = vmatmul.mubr.msk.f32.vlgmr.msra.gmra.mxu1 %vm1131_vm5, %v1349_v10  ;;  %v1342_v14 = vmul.f32 %v5166_v6, %v1333_v12 }
 0x4c9   : > { %5555 = vmatprep.mubr.msk.f32.mxu1 %vm6399_vm3, %v6398_v28 }
 0x4ca   : > { %v1351_v15 = vadd.f32 %v5167_v9, %v1342_v14 }
 0x4cc   : > { %5556 = vmatmul.mubr.msk.f32.gmra.mxu1 %vm1131_vm5, %v1350_v13 }
 0x4cd   : > { %5558 = vmatprep.mubr.msk.f32.mxu1 %vm6399_vm3, %v6398_v28 }
 0x4d0   : > { %5559 = vmatmul.mubr.msk.f32.gmra.mxu1 %vm1131_vm5, %v1351_v15 }
 0x4d1   : > { %5582 = vmatprep.mubr.msk.f32.mxu1 %vm6399_vm3, %v6398_v28 }
 0x588   : > { %v6711_v16 = vpop.f32.mrf.mxu1 }
 0x58a   : > { %v5554_v17 = vpop.f32.mrf.mxu1 }
 0x58c   : > { %v6713_v18 = vpop.f32.mrf.mxu1 }
 0x58d   : > { %1454 = vrot.lane.b32.xlu1 %v6713_v18, %s7580_s2 }
 0x58e   : > { %v5557_v19 = vpop.f32.mrf.mxu1 }
 0x590   : > { %v6717_v20 = vpop.f32.mrf.mxu1 }
 0x591   : > { %1452 = vrot.lane.b32.xlu1 %v6711_v16, %s7580_s2  ;;  %1456 = vrot.lane.b32.xlu0 %v6717_v20, %s7580_s2  ;;  %s7582_s2 = smov 112  }
 0x592   : > { %v5560_v21 = vpop.f32.mrf.mxu1 }
 0x595   : > { %1698 = vrot.lane.b32.xlu1 %v6717_v20, %s7576_s3  ;;  %1696 = vrot.lane.b32.xlu0 %v6713_v18, %s7576_s3 }
 0x599   : > { %1694 = vrot.lane.b32.xlu1 %v6711_v16, %s7576_s3  ;;  %1688 = vrot.lane.b32.xlu0 %v6711_v16, %s7574_s5  ;;  %s7586_s3 = smov 56  }
 0x59d   : > { %1690 = vrot.lane.b32.xlu1 %v6713_v18, %s7574_s5  ;;  %1692 = vrot.lane.b32.xlu0 %v6717_v20, %s7574_s5  ;;  %s7578_s5 = smov 64  }
 0x5ff   : > { %v1455_v22 = vpop.permute.xlu1 %1454 }
 0x603   : > { %v1457_v23 = vpop.permute.xlu0 %1456  ;;  %v1453_v24 = vpop.permute.xlu1 %1452 }
 0x604   : > { %5562 = vmatpush3.xpose.msk.msra.mxu0 %vm1458_vm8, %v1457_v23 }
 0x605   : > { %5563 = vmatprep.subr.mxu0 %v6398_v28 }
 0x607   : > { %v1699_v25 = vpop.permute.xlu1 %1698  ;;  %v1697_v26 = vpop.permute.xlu0 %1696 }
 0x608   : > { %5564 = vmatpush3.xpose.msk.msra.mxu0 %vm1458_vm8, %v1455_v22 }
 0x609   : > { %5565 = vmatprep.subr.mxu0 %v6398_v28 }
 0x60b   : > { %v1695_v27 = vpop.permute.xlu1 %1694  ;;  %v1689_v29 = vpop.permute.xlu0 %1688 }
 0x60c   : > { %5566 = vmatpush3.xpose.msk.msra.mxu0 %vm1458_vm8, %v1453_v24 }
 0x60d   : > { %5591 = vmatprep.subr.mxu0 %v6398_v28 }
 0x60f   : > { %5568 = vmatmul.mubr.msk.f32.vlgmr.msra.gmra.mxu0 %vm1458_vm8, %v6711_v16  ;;  %v1691_v30 = vpop.permute.xlu1 %1690  ;;  %v1693_v31 = vpop.permute.xlu0 %1692 }
 0x610   : > { %5592 = vmatpush3.xpose.msk.msra.mxu0 %vm1458_vm8, %v1699_v25  ;;  %5570 = vmatprep.mubr.msk.f32.mxu0 %vm6399_vm3, %v6398_v28 }
 0x611   : > { %5593 = vmatprep.subr.mxu0 %v6398_v28 }
 0x613   : > { %5571 = vmatmul.mubr.msk.f32.gmra.mxu0 %vm1458_vm8, %v6713_v18 }
 0x614   : > { %5594 = vmatpush3.xpose.msk.msra.mxu0 %vm1458_vm8, %v1697_v26  ;;  %5573 = vmatprep.mubr.msk.f32.mxu0 %vm6399_vm3, %v6398_v28 }
 0x615   : > { %5595 = vmatprep.subr.mxu0 %v6398_v28 }
 0x617   : > { %5574 = vmatmul.mubr.msk.f32.gmra.mxu0 %vm1458_vm8, %v6717_v20 }
 0x618   : > { %5596 = vmatpush3.xpose.msk.msra.mxu0 %vm1458_vm8, %v1695_v27  ;;  %5597 = vmatprep.mubr.msk.f32.mxu0 %vm6399_vm3, %v6398_v28 }
 0x619   : > { %5621 = vmatprep.subr.mxu0 %v6398_v28 }
 0x61b   : > { %5598 = vmatmul.mubr.msk.f32.vlgmr.msra.gmra.mxu0 %vm1458_vm8, %v1689_v29 }
 0x61c   : > { %5600 = vmatprep.mubr.msk.f32.mxu0 %vm6399_vm3, %v6398_v28 }
 0x61f   : > { %5601 = vmatmul.mubr.msk.f32.gmra.mxu0 %vm1458_vm8, %v1691_v30 }
 0x620   : > { %5603 = vmatprep.mubr.msk.f32.mxu0 %vm6399_vm3, %v6398_v28 }
 0x623   : > { %5604 = vmatmul.mubr.msk.f32.gmra.mxu0 %vm1458_vm8, %v1693_v31 }
 0x624   : > { %5623 = vmatprep.mubr.msk.f32.mxu0 %vm6399_vm3, %v6398_v28 }
 0x6cf   : > { %v1537_v34 = vpop.f32.mrf.mxu0 }
 0x6d0   : > { %v1553_v35 = vsel %vm1292_vm9, %v1537_v34, -1e+30 }
 0x6d1   : > { %v5569_v36 = vpop.f32.mrf.mxu0  ;;  %v1557_v37 = vsel %vm1556_vm10, %v1553_v35, -inf }
 0x6d2   : > { %1558 = vmax.xlane.f32.xlu1 %v1557_v37 }
 0x6d3   : > { %v1542_v38 = vpop.f32.mrf.mxu0 }
 0x6d4   : > { %v1554_v39 = vsel %vm1292_vm9, %v1542_v38, -1e+30 }
 0x6d5   : > { %v5572_v40 = vpop.f32.mrf.mxu0  ;;  %v1560_v41 = vsel %vm1556_vm10, %v1554_v39, -inf }
 0x6d6   : > { %1561 = vmax.xlane.f32.xlu0 %v1560_v41 }
 0x6d7   : > { %v1547_v42 = vpop.f32.mrf.mxu0 }
 0x6d8   : > { %v1555_v43 = vsel %vm1292_vm9, %v1547_v42, -1e+30 }
 0x6d9   : > { %v5575_v44 = vpop.f32.mrf.mxu0  ;;  %v1563_v45 = vsel %vm1556_vm10, %v1555_v43, -inf }
 0x6da   : > { %1564 = vmax.xlane.f32.xlu0 %v1563_v45 }
 0x6db   : > { %v1778_v46 = vpop.f32.mrf.mxu0 }
 0x6dc   : > { %v1792_v47 = vsel %vm1292_vm9, %v1778_v46, -1e+30 }
 0x6dd   : > { %v5599_v48 = vpop.f32.mrf.mxu0  ;;  %v1795_v49 = vsel %vm1556_vm10, %v1792_v47, -inf }
 0x6de   : > { %1796 = vmax.xlane.f32.xlu0 %v1795_v49 }
 0x6df   : > { %v1783_v50 = vpop.f32.mrf.mxu0 }
 0x6e0   : > { %v1793_v51 = vsel %vm1292_vm9, %v1783_v50, -1e+30 }
 0x6e1   : > { %v5602_v52 = vpop.f32.mrf.mxu0  ;;  %v1798_v53 = vsel %vm1556_vm10, %v1793_v51, -inf }
 0x6e2   : > { %1799 = vmax.xlane.f32.xlu1 %v1798_v53 }
 0x6e3   : > { %v1788_v54 = vpop.f32.mrf.mxu0 }
 0x6e4   : > { %v1794_v55 = vsel %vm1292_vm9, %v1788_v54, -1e+30 }
 0x6e5   : > { %v5605_v56 = vpop.f32.mrf.mxu0  ;;  %v1801_v57 = vsel %vm1556_vm10, %v1794_v55, -inf }
 0x6e6   : > { %1802 = vmax.xlane.f32.xlu0 %v1801_v57 }
 0x6f3   : > { %1594 = vrot.lane.b32.xlu1 %v6717_v20, %s7578_s5 }
 0x6f7   : > { %1590 = vrot.lane.b32.xlu1 %v6711_v16, %s7578_s5 }
 0x6fb   : > { %1832 = vrot.lane.b32.xlu1 %v6717_v20, %s7586_s3 }
 0x6fc   : > { %1592 = vrot.lane.b32.xlu0 %v6713_v18, %s7578_s5  ;;  %s7584_s5 = smov 80  }
 0x75b   : > { %v1559_v58 = vpop.xlane.xlu1 %1558 }
 0x75c   : > { %v1566_v59 = vsub.f32 %v1553_v35, %v1559_v58 }
 0x75e   : > { %v1569_v60 = vmul.f32 1.442695, %v1566_v59 }
 0x75f   : > { %v1562_v61 = vpop.xlane.xlu0 %1561 }
 0x760   : > { %6118 = vpow2.f32 %v1569_v60  ;;  %v1567_v62 = vsub.f32 %v1554_v39, %v1562_v61 }
 0x762   : > { %v1571_v63 = vmul.f32 1.442695, %v1567_v62 }
 0x763   : > { %v1565_v0 = vpop.xlane.xlu0 %1564 }
 0x764   : > { %6120 = vpow2.f32 %v1571_v63  ;;  %v1568_v1 = vsub.f32 %v1555_v43, %v1565_v0 }
 0x766   : > { %v1573_v2 = vmul.f32 1.442695, %v1568_v1 }
 0x767   : > { %v1797_v3 = vpop.xlane.xlu0 %1796 }
 0x768   : > { %6122 = vpow2.f32 %v1573_v2  ;;  %v1804_v4 = vsub.f32 %v1792_v47, %v1797_v3 }
 0x76a   : > { %v1807_v5 = vmul.f32 1.442695, %v1804_v4 }
 0x76b   : > { %v1800_v6 = vpop.xlane.xlu1 %1799 }
 0x76c   : > { %6124 = vpow2.f32 %v1807_v5  ;;  %v1805_v7 = vsub.f32 %v1793_v51, %v1800_v6 }
 0x76d   : > { %v6119_v8 = vpop.eup %6118 }
 0x76e   : > { %v1809_v9 = vmul.f32 1.442695, %v1805_v7  ;;  %v1575_v10 = vsel %vm1556_vm10, %v6119_v8, 0.0 }
 0x76f   : > { %1576 = vadd.xlane.f32.xlu1 %v1575_v10  ;;  %v1595_v11 = vpop.permute.xlu1 %1594  ;;  %v1803_v12 = vpop.xlane.xlu0 %1802 }
 0x770   : > { %6126 = vpow2.f32 %v1809_v9  ;;  %v1806_v13 = vsub.f32 %v1794_v55, %v1803_v12  ;;  %5577 = vmatpush3.msra.mxu1 %v1595_v11 }
 0x771   : > { %v6121_v14 = vpop.eup %6120  ;;  %5578 = vmatprep.subr.mxu1 %v6398_v28 }
 0x772   : > { %v1811_v15 = vmul.f32 1.442695, %v1806_v13  ;;  %v1578_v17 = vsel %vm1556_vm10, %v6121_v14, 0.0 }
 0x773   : > { %1579 = vadd.xlane.f32.xlu0 %v1578_v17  ;;  %v1593_v19 = vpop.permute.xlu0 %1592  ;;  %v1591_v22 = vpop.permute.xlu1 %1590 }
 0x774   : > { %6128 = vpow2.f32 %v1811_v15  ;;  %5579 = vmatpush3.msra.mxu1 %v1593_v19 }
 0x775   : > { %v6123_v21 = vpop.eup %6122  ;;  %5580 = vmatprep.subr.mxu1 %v6398_v28 }
 0x776   : > { %5581 = vmatpush3.msra.mxu1 %v1591_v22  ;;  %v1581_v23 = vsel %vm1556_vm10, %v6123_v21, 0.0 }
 0x777   : > { %1582 = vadd.xlane.f32.xlu1 %v1581_v23  ;;  %5606 = vmatprep.subr.mxu1 %v6398_v28  ;;  %v1833_v31 = vpop.permute.xlu1 %1832 }
 0x779   : > { %v6125_v24 = vpop.eup %6124 }
 0x77a   : > { %v1813_v25 = vsel %vm1556_vm10, %v6125_v24, 0.0 }
 0x77b   : > { %1814 = vadd.xlane.f32.xlu0 %v1813_v25 }
 0x77d   : > { %v6127_v26 = vpop.eup %6126 }
 0x77e   : > { %v1816_v27 = vsel %vm1556_vm10, %v6127_v26, 0.0 }
 0x77f   : > { %1817 = vadd.xlane.f32.xlu1 %v1816_v27 }
 0x781   : > { %v6129_v29 = vpop.eup %6128 }
 0x782   : > { %v1819_v30 = vsel %vm1556_vm10, %v6129_v29, 0.0 }
 0x783   : > { %1820 = vadd.xlane.f32.xlu0 %v1819_v30 }
 0x790   : > { %1830 = vrot.lane.b32.xlu1 %v6713_v18, %s7586_s3 }
 0x794   : > { %2114 = vrot.lane.b32.xlu1 %v6717_v20, %s7584_s5 }
 0x798   : > { %2110 = vrot.lane.b32.xlu1 %v6711_v16, %s7584_s5 }
 0x799   : > { %1828 = vrot.lane.b32.xlu0 %v6711_v16, %s7586_s3  ;;  %s7588_s3 = smov 72  }
 0x79c   : > { %2106 = vrot.lane.b32.xlu1 %v6713_v18, %s7582_s2 }
 0x79d   : > { %2112 = vrot.lane.b32.xlu0 %v6713_v18, %s7584_s5  ;;  %s7594_s5 = smov 48  }
 0x7a1   : > { %2104 = vrot.lane.b32.xlu0 %v6711_v16, %s7582_s2 }
 0x7a5   : > { %2108 = vrot.lane.b32.xlu0 %v6717_v20, %s7582_s2  ;;  %s7645_s2 = sld [smem:[#allocation22_spill]] }
 0x7ab   : > { %v1445_v53 = vld [vmem:[%s7645_s2] sm:$0xff]  ;;  %v1446_v54 = vld [vmem:[%s7645_s2 + $0x8] sm:$0xff] }
 0x7ac   : > { %5622 = vmatpush3.msra.mxu0 %v1446_v54 }
 0x7ad   : > { %5643 = vmatprep.subr.mxu0 %v6398_v28 }
 0x7f8   : > { %v1577_v32 = vpop.xlane.xlu1 %1576 }
 0x7f9   : > { %6130 = vrcp.f32 %v1577_v32 }
 0x7fc   : > { %v1580_v34 = vpop.xlane.xlu0 %1579 }
 0x7fd   : > { %6132 = vrcp.f32 %v1580_v34 }
 0x800   : > { %v1583_v35 = vpop.xlane.xlu1 %1582 }
 0x801   : > { %6134 = vrcp.f32 %v1583_v35 }
 0x804   : > { %v1815_v36 = vpop.xlane.xlu0 %1814 }
 0x805   : > { %6136 = vrcp.f32 %v1815_v36 }
 0x806   : > { %v6131_v37 = vpop.eup %6130 }
 0x807   : > { %v1587_v38 = vmul.f32 %v6131_v37, %v6119_v8 }
 0x808   : > { %v1818_v39 = vpop.xlane.xlu1 %1817 }
 0x809   : > { %6138 = vrcp.f32 %v1818_v39  ;;  %5583 = vmatmul.mubr.msk.f32.vlgmr.msra.gmra.mxu1 %vm1556_vm10, %v1587_v38 }
 0x80a   : > { %v6133_v40 = vpop.eup %6132  ;;  %5607 = vmatpush3.msra.mxu1 %v1833_v31  ;;  %5585 = vmatprep.mubr.msk.f32.mxu1 %vm6399_vm3, %v6398_v28 }
 0x80b   : > { %5608 = vmatprep.subr.mxu1 %v6398_v28  ;;  %v1588_v41 = vmul.f32 %v6133_v40, %v6121_v14 }
 0x80c   : > { %v1831_v42 = vpop.permute.xlu1 %1830  ;;  %v1821_v43 = vpop.xlane.xlu0 %1820 }
 0x80d   : > { %6140 = vrcp.f32 %v1821_v43  ;;  %5586 = vmatmul.mubr.msk.f32.gmra.mxu1 %vm1556_vm10, %v1588_v41 }
 0x80e   : > { %v6135_v44 = vpop.eup %6134  ;;  %5609 = vmatpush3.msra.mxu1 %v1831_v42  ;;  %5588 = vmatprep.mubr.msk.f32.mxu1 %vm6399_vm3, %v6398_v28 }
 0x80f   : > { %5610 = vmatprep.subr.mxu1 %v6398_v28  ;;  %v1589_v45 = vmul.f32 %v6135_v44, %v6123_v21 }
 0x810   : > { %v1829_v46 = vpop.permute.xlu0 %1828  ;;  %v2115_v62 = vpop.permute.xlu1 %2114 }
 0x811   : > { %5589 = vmatmul.mubr.msk.f32.gmra.mxu1 %vm1556_vm10, %v1589_v45 }
 0x812   : > { %v6137_v47 = vpop.eup %6136  ;;  %5611 = vmatpush3.msra.mxu1 %v1829_v46  ;;  %5612 = vmatprep.mubr.msk.f32.mxu1 %vm6399_vm3, %v6398_v28 }
 0x813   : > { %v1825_v48 = vmul.f32 %v6137_v47, %v6125_v24  ;;  %5632 = vmatprep.subr.mxu1 %v6398_v28 }
 0x814   : > { %v2113_v1 = vpop.permute.xlu0 %2112  ;;  %v2111_v4 = vpop.permute.xlu1 %2110 }
 0x815   : > { %5613 = vmatmul.mubr.msk.f32.vlgmr.msra.gmra.mxu1 %vm1556_vm10, %v1825_v48 }
 0x816   : > { %v6139_v49 = vpop.eup %6138  ;;  %5615 = vmatprep.mubr.msk.f32.mxu1 %vm6399_vm3, %v6398_v28  ;;  %5633 = vmatpush3.msra.mxu1 %v1445_v53 }
 0x817   : > { %v1826_v50 = vmul.f32 %v6139_v49, %v6127_v26  ;;  %5658 = vmatprep.subr.mxu1 %v6398_v28 }
 0x818   : > { %v2105_v6 = vpop.permute.xlu0 %2104  ;;  %v2107_v7 = vpop.permute.xlu1 %2106 }
 0x819   : > { %5616 = vmatmul.mubr.msk.f32.gmra.mxu1 %vm1556_vm10, %v1826_v50 }
 0x81a   : > { %v6141_v51 = vpop.eup %6140  ;;  %5618 = vmatprep.mubr.msk.f32.mxu1 %vm6399_vm3, %v6398_v28 }
 0x81b   : > { %v1827_v52 = vmul.f32 %v6141_v51, %v6129_v29 }
 0x81c   : > { %v2109_v8 = vpop.permute.xlu0 %2108 }
 0x81d   : > { %5619 = vmatmul.mubr.msk.f32.gmra.mxu1 %vm1556_vm10, %v1827_v52 }
 0x81e   : > { %5634 = vmatprep.mubr.msk.f32.mxu1 %vm6399_vm3, %v6398_v28 }
 0x8c9   : > { %v1674_v55 = vpop.f32.mrf.mxu1 }
 0x8ca   : > { %5635 = vmatmul.mubr.msk.f32.vlgmr.msra.gmra.mxu1 %vm1458_vm8, %v1674_v55 }
 0x8cb   : > { %v5584_v56 = vpop.f32.mrf.mxu1  ;;  %5637 = vmatprep.mubr.msk.f32.mxu1 %vm6399_vm3, %v6398_v28 }
 0x8cd   : > { %v1679_v57 = vpop.f32.mrf.mxu1 }
 0x8ce   : > { %5638 = vmatmul.mubr.msk.f32.gmra.mxu1 %vm1458_vm8, %v1679_v57 }
 0x8cf   : > { %v5587_v58 = vpop.f32.mrf.mxu1  ;;  %5640 = vmatprep.mubr.msk.f32.mxu1 %vm6399_vm3, %v6398_v28 }
 0x8d1   : > { %v1684_v59 = vpop.f32.mrf.mxu1 }
 0x8d2   : > { %5641 = vmatmul.mubr.msk.f32.gmra.mxu1 %vm1458_vm8, %v1684_v59 }
 0x8d3   : > { %v5590_v60 = vpop.f32.mrf.mxu1  ;;  %5664 = vmatprep.mubr.msk.f32.mxu1 %vm6399_vm3, %v6398_v28 }
 0x8d5   : > { %v1912_v61 = vpop.f32.mrf.mxu1 }
 0x8d6   : > { %5624 = vmatmul.mubr.msk.f32.vlgmr.msra.gmra.mxu0 %vm1458_vm8, %v1912_v61 }
 0x8d7   : > { %5644 = vmatpush3.xpose.msk.msra.mxu0 %vm1458_vm8, %v2115_v62  ;;  %v5614_v63 = vpop.f32.mrf.mxu1  ;;  %5626 = vmatprep.mubr.msk.f32.mxu0 %vm6399_vm3, %v6398_v28 }
 0x8d8   : > { %5645 = vmatprep.subr.mxu0 %v6398_v28 }
 0x8d9   : > { %v1917_v0 = vpop.f32.mrf.mxu1 }
 0x8da   : > { %5627 = vmatmul.mubr.msk.f32.gmra.mxu0 %vm1458_vm8, %v1917_v0 }
 0x8db   : > { %5646 = vmatpush3.xpose.msk.msra.mxu0 %vm1458_vm8, %v2113_v1  ;;  %v5617_v2 = vpop.f32.mrf.mxu1  ;;  %5629 = vmatprep.mubr.msk.f32.mxu0 %vm6399_vm3, %v6398_v28 }
 0x8dc   : > { %5647 = vmatprep.subr.mxu0 %v6398_v28 }
 0x8dd   : > { %v1922_v3 = vpop.f32.mrf.mxu1 }
 0x8de   : > { %5630 = vmatmul.mubr.msk.f32.gmra.mxu0 %vm1458_vm8, %v1922_v3 }
 0x8df   : > { %5648 = vmatpush3.xpose.msk.msra.mxu0 %vm1458_vm8, %v2111_v4  ;;  %v5620_v5 = vpop.f32.mrf.mxu1  ;;  %5649 = vmatprep.mubr.msk.f32.mxu0 %vm6399_vm3, %v6398_v28 }
 0x8e0   : > { %5673 = vmatprep.subr.mxu0 %v6398_v28 }
 0x8e2   : > { %5650 = vmatmul.mubr.msk.f32.vlgmr.msra.gmra.mxu0 %vm1458_vm8, %v2105_v6 }
 0x8e3   : > { %5652 = vmatprep.mubr.msk.f32.mxu0 %vm6399_vm3, %v6398_v28 }
 0x8e6   : > { %5653 = vmatmul.mubr.msk.f32.gmra.mxu0 %vm1458_vm8, %v2107_v7 }
 0x8e7   : > { %5655 = vmatprep.mubr.msk.f32.mxu0 %vm6399_vm3, %v6398_v28 }
 0x8ea   : > { %5656 = vmatmul.mubr.msk.f32.gmra.mxu0 %vm1458_vm8, %v2109_v8 }
 0x8eb   : > { %5675 = vmatprep.mubr.msk.f32.mxu0 %vm6399_vm3, %v6398_v28 }
 0x98a   : > { %v2090_v9 = vpop.f32.mrf.mxu1 }
 0x98c   : > { %v5636_v10 = vpop.f32.mrf.mxu1 }
 0x98d   : > { %v1447_v10 = vld [vmem:[%s7645_s2 + $0x10] sm:$0xff] }
 0x98e   : > { %v2095_v11 = vpop.f32.mrf.mxu1  ;;  %5674 = vmatpush3.msra.mxu0 %v1447_v10 }
 0x98f   : > { %5699 = vmatprep.subr.mxu0 %v6398_v28 }
 0x990   : > { %v5639_v12 = vpop.f32.mrf.mxu1 }
 0x992   : > { %v2100_v13 = vpop.f32.mrf.mxu1 }
 0x994   : > { %v5642_v14 = vpop.f32.mrf.mxu1 }
 0x996   : > { %v2001_v15 = vpop.f32.mrf.mxu0 }
 0x997   : > { %v6880_v17 = vadd.f32 %v2090_v9, %v2001_v15 }
 0x998   : > { %v5625_v19 = vpop.f32.mrf.mxu0 }
 0x99a   : > { %v2006_v21 = vpop.f32.mrf.mxu0 }
 0x99b   : > { %v6882_v22 = vadd.f32 %v2095_v11, %v2006_v21 }
 0x99c   : > { %v5628_v23 = vpop.f32.mrf.mxu0 }
 0x99e   : > { %v2011_v24 = vpop.f32.mrf.mxu0 }
 0x99f   : > { %v6884_v25 = vadd.f32 %v2100_v13, %v2011_v24 }
 0x9a0   : > { %v5631_v26 = vpop.f32.mrf.mxu0 }
 0x9a2   : > { %v2194_v27 = vpop.f32.mrf.mxu0 }
 0x9a3   : > { %v2208_v29 = vsel %vm1292_vm9, %v2194_v27, -1e+30 }
 0x9a4   : > { %v5651_v30 = vpop.f32.mrf.mxu0  ;;  %v2211_v31 = vsel %vm1556_vm10, %v2208_v29, -inf }
 0x9a5   : > { %2212 = vmax.xlane.f32.xlu1 %v2211_v31 }
 0x9a6   : > { %v2199_v32 = vpop.f32.mrf.mxu0 }
 0x9a7   : > { %v2209_v34 = vsel %vm1292_vm9, %v2199_v32, -1e+30 }
 0x9a8   : > { %v5654_v35 = vpop.f32.mrf.mxu0  ;;  %v2214_v36 = vsel %vm1556_vm10, %v2209_v34, -inf }
 0x9a9   : > { %2215 = vmax.xlane.f32.xlu0 %v2214_v36 }
 0x9aa   : > { %v2204_v37 = vpop.f32.mrf.mxu0 }
 0x9ab   : > { %v2210_v38 = vsel %vm1292_vm9, %v2204_v37, -1e+30 }
 0x9ac   : > { %v5657_v39 = vpop.f32.mrf.mxu0  ;;  %v2217_v40 = vsel %vm1556_vm10, %v2210_v38, -inf }
 0x9ad   : > { %2218 = vmax.xlane.f32.xlu0 %v2217_v40 }
 0x9b6   : > { %2248 = vrot.lane.b32.xlu1 %v6717_v20, %s7594_s5 }
 0x9ba   : > { %2244 = vrot.lane.b32.xlu1 %v6711_v16, %s7594_s5 }
 0x9be   : > { %2444 = vrot.lane.b32.xlu1 %v6717_v20, %s7588_s3 }
 0x9c2   : > { %2442 = vrot.lane.b32.xlu1 %v6713_v18, %s7588_s3  ;;  %s7590_s3 = smov 104  }
 0xa2e   : > { %v2213_v41 = vpop.xlane.xlu1 %2212 }
 0xa2f   : > { %v2220_v42 = vsub.f32 %v2208_v29, %v2213_v41 }
 0xa31   : > { %v2223_v43 = vmul.f32 1.442695, %v2220_v42 }
 0xa32   : > { %v2249_v44 = vpop.permute.xlu1 %2248  ;;  %v2216_v45 = vpop.xlane.xlu0 %2215 }
 0xa33   : > { %6142 = vpow2.f32 %v2223_v43  ;;  %v2221_v46 = vsub.f32 %v2209_v34, %v2216_v45  ;;  %5659 = vmatpush3.msra.mxu1 %v2249_v44 }
 0xa34   : > { %5660 = vmatprep.subr.mxu1 %v6398_v28 }
 0xa35   : > { %v2225_v47 = vmul.f32 1.442695, %v2221_v46 }
 0xa36   : > { %v2219_v52 = vpop.xlane.xlu0 %2218  ;;  %v2245_v57 = vpop.permute.xlu1 %2244 }
 0xa37   : > { %6144 = vpow2.f32 %v2225_v47  ;;  %v2222_v53 = vsub.f32 %v2210_v38, %v2219_v52 }
 0xa39   : > { %v2227_v54 = vmul.f32 1.442695, %v2222_v53 }
 0xa3a   : > { %v2445_v58 = vpop.permute.xlu1 %2444 }
 0xa3b   : > { %6146 = vpow2.f32 %v2227_v54 }
 0xa3e   : > { %v2443_v59 = vpop.permute.xlu1 %2442 }
 0xa40   : > { %v6143_v48 = vpop.eup %6142 }
 0xa41   : > { %v2229_v49 = vsel %vm1556_vm10, %v6143_v48, 0.0 }
 0xa42   : > { %2230 = vadd.xlane.f32.xlu0 %v2229_v49 }
 0xa44   : > { %v6145_v50 = vpop.eup %6144 }
 0xa45   : > { %v2232_v51 = vsel %vm1556_vm10, %v6145_v50, 0.0 }
 0xa46   : > { %2233 = vadd.xlane.f32.xlu1 %v2232_v51 }
 0xa48   : > { %v6147_v55 = vpop.eup %6146 }
 0xa49   : > { %v2235_v56 = vsel %vm1556_vm10, %v6147_v55, 0.0 }
 0xa57   : > { %2434 = vrot.lane.b32.xlu1 %v6711_v16, %s7590_s3 }
 0xa58   : > { %2246 = vrot.lane.b32.xlu0 %v6713_v18, %s7594_s5  ;;  %s7648_s5 = sld [smem:[#allocation26_spill]] }
 0xa5b   : > { %2438 = vrot.lane.b32.xlu1 %v6717_v20, %s7590_s3 }
 0xa77   : > { %2236 = vadd.xlane.f32.xlu0 %v2235_v56 }
 0xa8d   : > { %2440 = vrot.lane.b32.xlu0 %v6711_v16, %s7646_s8 }
 0xa91   : > { %2436 = vrot.lane.b32.xlu0 %v6713_v18, %s7590_s3  ;;  %s7592_s3 = smov 40  }
 0xacb   : > { %v2231_v60 = vpop.xlane.xlu0 %2230 }
 0xacc   : > { %6148 = vrcp.f32 %v2231_v60 }
 0xacf   : > { %v2234_v61 = vpop.xlane.xlu1 %2233  ;;  %v2247_v62 = vpop.permute.xlu0 %2246 }
 0xad0   : > { %6150 = vrcp.f32 %v2234_v61  ;;  %5661 = vmatpush3.msra.mxu1 %v2247_v62 }
 0xad1   : > { %5662 = vmatprep.subr.mxu1 %v6398_v28 }
 0xad2   : > { %5663 = vmatpush3.msra.mxu1 %v2245_v57 }
 0xad3   : > { %5684 = vmatprep.subr.mxu1 %v6398_v28  ;;  %v2435_v7 = vpop.permute.xlu1 %2434 }
 0xad7   : > { %v2439_v9 = vpop.permute.xlu1 %2438 }
 0xad9   : > { %v6149_v63 = vpop.eup %6148 }
 0xada   : > { %v2241_v0 = vmul.f32 %v6149_v63, %v6143_v48 }
 0xadc   : > { %5665 = vmatmul.mubr.msk.f32.vlgmr.msra.gmra.mxu1 %vm1556_vm10, %v2241_v0 }
 0xadd   : > { %v6151_v1 = vpop.eup %6150  ;;  %5685 = vmatpush3.xpose.msk.msra.mxu1 %vm1458_vm8, %v2445_v58  ;;  %5667 = vmatprep.mubr.msk.f32.mxu1 %vm6399_vm3, %v6398_v28 }
 0xade   : > { %5686 = vmatprep.subr.mxu1 %v6398_v28  ;;  %v2242_v2 = vmul.f32 %v6151_v1, %v6145_v50 }
 0xae0   : > { %5668 = vmatmul.mubr.msk.f32.gmra.mxu1 %vm1556_vm10, %v2242_v2 }
 0xae1   : > { %5687 = vmatpush3.xpose.msk.msra.mxu1 %vm1458_vm8, %v2443_v59  ;;  %5670 = vmatprep.mubr.msk.f32.mxu1 %vm6399_vm3, %v6398_v28 }
 0xae2   : > { %5688 = vmatprep.subr.mxu1 %v6398_v28 }
 0xb00   : > { %v2237_v3 = vpop.xlane.xlu0 %2236 }
 0xb01   : > { %6152 = vrcp.f32 %v2237_v3  ;;  %v1448_v3 = vld [vmem:[%s7645_s2 + $0x18] sm:$0xff] }
 0xb04   : > { %v2441_v4 = vpop.permute.xlu0 %2440 }
 0xb05   : > { %5689 = vmatpush3.xpose.msk.msra.mxu1 %vm1458_vm8, %v2441_v4 }
 0xb06   : > { %6001 = vmatprep.subr.mxu1 %v6398_v28 }
 0xb08   : > { %v2437_v8 = vpop.permute.xlu0 %2436 }
 0xb0e   : > { %v6153_v5 = vpop.eup %6152 }
 0xb0f   : > { %v2243_v6 = vmul.f32 %v6153_v5, %v6147_v55 }
 0xb11   : > { %5671 = vmatmul.mubr.msk.f32.gmra.mxu1 %vm1556_vm10, %v2243_v6 }
 0xb12   : > { %5690 = vmatprep.mubr.msk.f32.mxu1 %vm6399_vm3, %v6398_v28 }
 0xb15   : > { %5691 = vmatmul.mubr.msk.f32.vlgmr.msra.gmra.mxu1 %vm1458_vm8, %v2435_v7 }
 0xb16   : > { %5693 = vmatprep.mubr.msk.f32.mxu1 %vm6399_vm3, %v6398_v28 }
 0xb19   : > { %5694 = vmatmul.mubr.msk.f32.gmra.mxu1 %vm1458_vm8, %v2437_v8 }
 0xb1a   : > { %5696 = vmatprep.mubr.msk.f32.mxu1 %vm6399_vm3, %v6398_v28 }
 0xb1d   : > { %5697 = vmatmul.mubr.msk.f32.gmra.mxu1 %vm1458_vm8, %v2439_v9 }
 0xb1e   : > { %5711 = vmatprep.mubr.msk.f32.mxu1 %vm6399_vm3, %v6398_v28 }
 0xb9c   : > { %v2328_v11 = vpop.f32.mrf.mxu1 }
 0xb9d   : > { %5676 = vmatmul.mubr.msk.f32.vlgmr.msra.gmra.mxu0 %vm1458_vm8, %v2328_v11 }
 0xb9e   : > { %v5666_v12 = vpop.f32.mrf.mxu1  ;;  %5678 = vmatprep.mubr.msk.f32.mxu0 %vm6399_vm3, %v6398_v28 }
 0xba0   : > { %v2333_v13 = vpop.f32.mrf.mxu1 }
 0xba1   : > { %5679 = vmatmul.mubr.msk.f32.gmra.mxu0 %vm1458_vm8, %v2333_v13 }
 0xba2   : > { %v5669_v14 = vpop.f32.mrf.mxu1  ;;  %5681 = vmatprep.mubr.msk.f32.mxu0 %vm6399_vm3, %v6398_v28 }
 0xba3   : > { %v6246_v14 = vld [vmem:[#allocation2] sm:$0xff] }
 0xbd1   : > { %v2338_v15 = vpop.f32.mrf.mxu1 }
 0xbd2   : > { %5682 = vmatmul.mubr.msk.f32.gmra.mxu0 %vm1458_vm8, %v2338_v15 }
 0xbd3   : > { %v5672_v19 = vpop.f32.mrf.mxu1  ;;  %5705 = vmatprep.mubr.msk.f32.mxu0 %vm6399_vm3, %v6398_v28 }
 0xbd5   : > { %v2524_v21 = vpop.f32.mrf.mxu1 }
 0xbd6   : > { %v2538_v23 = vsel %vm1292_vm9, %v2524_v21, -1e+30 }
 0xbd7   : > { %v5692_v24 = vpop.f32.mrf.mxu1  ;;  %v2541_v26 = vsel %vm1556_vm10, %v2538_v23, -inf }
 0xbd8   : > { %2542 = vmax.xlane.f32.xlu0 %v2541_v26  ;;  %v6247_v26 = vld [vmem:[#allocation2 + $0x8] sm:$0xff] }
 0xbd9   : > { %v2529_v27 = vpop.f32.mrf.mxu1 }
 0xbda   : > { %v2539_v29 = vsel %vm1292_vm9, %v2529_v27, -1e+30 }
 0xbdb   : > { %v5695_v30 = vpop.f32.mrf.mxu1  ;;  %v2544_v31 = vsel %vm1556_vm10, %v2539_v29, -inf }
 0xbdc   : > { %2545 = vmax.xlane.f32.xlu1 %v2544_v31 }
 0xbdd   : > { %v2534_v32 = vpop.f32.mrf.mxu1 }
 0xbde   : > { %v2540_v34 = vsel %vm1292_vm9, %v2534_v32, -1e+30 }
 0xbdf   : > { %v5698_v35 = vpop.f32.mrf.mxu1  ;;  %v2547_v36 = vsel %vm1556_vm10, %v2540_v34, -inf }
 0xbe0   : > { %2548 = vmax.xlane.f32.xlu0 %v2547_v36  ;;  %v6248_v35 = vld [vmem:[#allocation2 + $0x10] sm:$0xff] }
 0xbed   : > { %2576 = vrot.lane.b32.xlu1 %v6713_v18, %s7592_s3 }
 0xc5d   : > { %v2417_v37 = vpop.f32.mrf.mxu0 }
 0xc5e   : > { %v6966_v38 = vadd.f32 %v2417_v37, %v6880_v17 }
 0xc5f   : > { %v5677_v39 = vpop.f32.mrf.mxu0 }
 0xc61   : > { %v2422_v40 = vpop.f32.mrf.mxu0  ;;  %v2543_v41 = vpop.xlane.xlu0 %2542 }
 0xc62   : > { %v6969_v42 = vadd.f32 %v2422_v40, %v6882_v22  ;;  %v2550_v43 = vsub.f32 %v2538_v23, %v2543_v41 }
 0xc63   : > { %v5680_v44 = vpop.f32.mrf.mxu0 }
 0xc64   : > { %v2553_v45 = vmul.f32 1.442695, %v2550_v43 }
 0xc65   : > { %v2546_v46 = vpop.xlane.xlu1 %2545 }
 0xc66   : > { %6154 = vpow2.f32 %v2553_v45  ;;  %v2551_v47 = vsub.f32 %v2539_v29, %v2546_v46 }
 0xc68   : > { %v2555_v48 = vmul.f32 1.442695, %v2551_v47 }
 0xc69   : > { %v2549_v49 = vpop.xlane.xlu0 %2548  ;;  %v2577_v59 = vpop.permute.xlu1 %2576 }
 0xc6a   : > { %6156 = vpow2.f32 %v2555_v48  ;;  %v2552_v18 = vsub.f32 %v2540_v34, %v2549_v49 }
 0xc6c   : > { %v2557_v50 = vmul.f32 1.442695, %v2552_v18 }
 0xc6e   : > { %6158 = vpow2.f32 %v2557_v50 }
 0xc73   : > { %v6155_v17 = vpop.eup %6154 }
 0xc74   : > { %v2559_v51 = vsel %vm1556_vm10, %v6155_v17, 0.0 }
 0xc75   : > { %2560 = vadd.xlane.f32.xlu0 %v2559_v51 }
 0xc77   : > { %v6157_v52 = vpop.eup %6156 }
 0xc78   : > { %v2562_v22 = vsel %vm1556_vm10, %v6157_v52, 0.0 }
 0xc79   : > { %2563 = vadd.xlane.f32.xlu0 %v2562_v22  ;;  %v2839_v22 = vld [vmem:[%s7648_s5 + $0x18] sm:$0xff] }
 0xc7b   : > { %v6159_v53 = vpop.eup %6158 }
 0xc7c   : > { %v2565_v54 = vsel %vm1556_vm10, %v6159_v53, 0.0 }
 0xc7d   : > { %2566 = vadd.xlane.f32.xlu1 %v2565_v54  ;;  %v2837_v54 = vld [vmem:[%s7648_s5 + $0x8] sm:$0xff] }
 0xc8e   : > { %2574 = vrot.lane.b32.xlu1 %v6711_v16, %s7592_s3 }
 0xc8f   : > { %2578 = vrot.lane.b32.xlu0 %v6717_v20, %s7592_s3  ;;  %s7647_s3 = sld [smem:[#allocation23_spill]] }
 0xc92   : > { %v2427_v55 = vpop.f32.mrf.mxu0 }
 0xc93   : > { %v6979_v56 = vadd.f32 %v2427_v55, %v6884_v25  ;;  %v2836_v55 = vld [vmem:[%s7648_s5] sm:$0xff] }
 0xc94   : > { %v5683_v57 = vpop.f32.mrf.mxu0 }
 0xc95   : > { %v5219_v12 = vld [vmem:[%s7647_s3] ss:$0 sm:$0xff] }
 0xcfe   : > { %v2561_v58 = vpop.xlane.xlu0 %2560 }
 0xcff   : > { %6160 = vrcp.f32 %v2561_v58 }
 0xd02   : > { %v2564_v60 = vpop.xlane.xlu0 %2563 }
 0xd03   : > { %6162 = vrcp.f32 %v2564_v60 }
 0xd06   : > { %v2567_v61 = vpop.xlane.xlu1 %2566  ;;  %v2579_v62 = vpop.permute.xlu0 %2578 }
 0xd07   : > { %6164 = vrcp.f32 %v2567_v61  ;;  %5700 = vmatpush3.msra.mxu0 %v2579_v62  ;;  %6004 = vmatpush3.msra.mxu1 %v2579_v62 }
 0xd08   : > { %5701 = vmatprep.subr.mxu0 %v6398_v28  ;;  %6002 = vmatprep.subr.mxu1 %v6398_v28 }
 0xd09   : > { %5702 = vmatpush3.msra.mxu0 %v2577_v59  ;;  %6005 = vmatpush3.msra.mxu1 %v2577_v59 }
 0xd0a   : > { %v2575_v16 = vpop.permute.xlu1 %2574  ;;  %5703 = vmatprep.subr.mxu0 %v6398_v28  ;;  %6003 = vmatprep.subr.mxu1 %v6398_v28 }
 0xd0b   : > { %5704 = vmatpush3.msra.mxu0 %v2575_v16  ;;  %6006 = vmatpush3.msra.mxu1 %v2575_v16 }
 0xd0c   : > { %v6161_v20 = vpop.eup %6160  ;;  %5714 = vmatprep.subr.mxu1 %v6398_v28  ;;  %5725 = vmatprep.subr.mxu0 %v6398_v28 }
 0xd0d   : > { %v2571_v25 = vmul.f32 %v6161_v20, %v6155_v17 }
 0xd0f   : > { %5706 = vmatmul.mubr.msk.f32.vlgmr.msra.gmra.mxu0 %vm1556_vm10, %v2571_v25 }
 0xd10   : > { %v6163_v63 = vpop.eup %6162  ;;  %5708 = vmatprep.mubr.msk.f32.mxu0 %vm6399_vm3, %v6398_v28  ;;  %5726 = vmatpush3.msra.mxu0 %v2839_v22 }
 0xd11   : > { %v2572_v0 = vmul.f32 %v6163_v63, %v6157_v52  ;;  %5727 = vmatprep.subr.mxu0 %v6398_v28  ;;  %v5220_v63 = vld [vmem:[%s7649_s9] ss:$0 sm:$0xff] }
 0xd13   : > { %5709 = vmatmul.mubr.msk.f32.gmra.mxu0 %vm1556_vm10, %v2572_v0 }
 0xd14   : > { %v6165_v1 = vpop.eup %6164  ;;  %5733 = vmatprep.mubr.msk.f32.mxu0 %vm6399_vm3, %v6398_v28 }
 0xd15   : > { %v2573_v2 = vmul.f32 %v6165_v1, %v6159_v53  ;;  %v2838_v53 = vld [vmem:[%s7648_s5 + $0x10] sm:$0xff]  ;;  %v5221_v1 = vld [vmem:[%s7650_s13] ss:$0 sm:$0xff] }
 0xd16   : > { %5728 = vmatpush3.msra.mxu0 %v2838_v53 }
 0xd17   : > { %5712 = vmatmul.mubr.msk.f32.vlgmr.msra.gmra.mxu1 %vm1556_vm10, %v2573_v2  ;;  %5729 = vmatprep.subr.mxu0 %v6398_v28 }
 0xd18   : > { %5716 = vmatprep.mubr.msk.f32.mxu1 %vm6399_vm3, %v6398_v28  ;;  %5715 = vmatpush3.msra.mxu1 %v1448_v3 }
 0xd19   : > { %5742 = vmatprep.subr.mxu1 %v6398_v28  ;;  %5730 = vmatpush3.msra.mxu0 %v2837_v54 }
 0xd1a   : > { %5731 = vmatprep.subr.mxu0 %v6398_v28 }
 0xd1b   : > { %5732 = vmatpush3.msra.mxu0 %v2836_v55 }
 0xd1c   : > { %5767 = vmatprep.subr.mxu0 %v6398_v28 }
 0xdcf   : > { %v2658_v4 = vpop.f32.mrf.mxu0 }
 0xdd0   : > { %5717 = vmatmul.mubr.msk.f32.vlgmr.msra.gmra.mxu1 %vm1458_vm8, %v2658_v4 }
 0xdd1   : > { %v5707_v5 = vpop.f32.mrf.mxu0  ;;  %5719 = vmatprep.mubr.msk.f32.mxu1 %vm6399_vm3, %v6398_v28 }
 0xdd3   : > { %v2663_v6 = vpop.f32.mrf.mxu0 }
 0xdd4   : > { %5720 = vmatmul.mubr.msk.f32.gmra.mxu1 %vm1458_vm8, %v2663_v6 }
 0xdd5   : > { %v5710_v7 = vpop.f32.mrf.mxu0  ;;  %5722 = vmatprep.mubr.msk.f32.mxu1 %vm6399_vm3, %v6398_v28 }
 0xdd7   : > { %v2668_v8 = vpop.f32.mrf.mxu1 }
 0xdd8   : > { %5723 = vmatmul.mubr.msk.f32.gmra.mxu1 %vm1458_vm8, %v2668_v8 }
 0xdd9   : > { %v5713_v9 = vpop.f32.mrf.mxu1  ;;  %5758 = vmatprep.mubr.msk.f32.mxu1 %vm6399_vm3, %v6398_v28 }
 0xe90   : > { %v2747_v10 = vpop.f32.mrf.mxu1 }
 0xe91   : > { %v2761_v11 = vadd.f32 %v2747_v10, %v6966_v38 }
 0xe92   : > { %v5718_v13 = vpop.f32.mrf.mxu1 }
 0xe93   : > { %v2764_v15 = vadd.f32 %v6246_v14, %v2761_v11  ;;  %v2969_v13 = vld [vmem:[%s7651_s14 + $0x30] sm:$0xff]  ;;  %v2968_v14 = vld [vmem:[%s7651_s14 + $0x28] sm:$0xff] }
 0xe94   : > { %v2752_v19 = vpop.f32.mrf.mxu1 }
 0xe95   : > { %v7009_v21 = vadd.f32 %v5219_v12, %v2764_v15  ;;  %v2762_v23 = vadd.f32 %v2752_v19, %v6969_v42  ;;  %v2967_v15 = vld [vmem:[%s7651_s14 + $0x20] sm:$0xff]  ;;  %v2966_v19 = vld [vmem:[%s7651_s14 + $0x18] sm:$0xff] }
 0xe96   : > { %v5721_v24 = vpop.f32.mrf.mxu1 }
 0xe97   : > { %v2765_v27 = vadd.f32 %v6247_v26, %v2762_v23  ;;  %v2779_v29 = vsel %vm1131_vm5, %v7009_v21, 0.0  ;;  %v2965_v23 = vld [vmem:[%s7651_s14 + $0x10] sm:$0xff]  ;;  %v2964_v24 = vld [vmem:[%s7651_s14 + $0x8] sm:$0xff]  ;;  %v2963_v26 = vld [vmem:[%s7651_s14] sm:$0xff] }
 0xe98   : > { %2780 = vadd.xlane.f32.xlu1 %v2779_v29  ;;  %v2757_v30 = vpop.f32.mrf.mxu1 }
 0xe99   : > { %v7014_v31 = vadd.f32 %v5219_v12, %v2765_v27  ;;  %v2763_v32 = vadd.f32 %v2757_v30, %v6979_v56  ;;  %v5222_v27 = vld [vmem:[%s7652_s17] ss:$0 sm:$0xff] }
 0xe9a   : > { %v5724_v34 = vpop.f32.mrf.mxu1 }
 0xe9b   : > { %v2766_v36 = vadd.f32 %v6248_v35, %v2763_v32  ;;  %v2782_v37 = vsel %vm1131_vm5, %v7014_v31, 0.0 }
 0xe9c   : > { %2783 = vadd.xlane.f32.xlu0 %v2782_v37 }
 0xe9d   : > { %v7019_v38 = vadd.f32 %v5219_v12, %v2766_v36  ;;  %v2970_v12 = vld [vmem:[%s7651_s14 + $0x38] sm:$0xff] }
 0xe9e   : > { %5743 = vmatpush3.msra.mxu1 %v2970_v12 }
 0xe9f   : > { %v2785_v39 = vsel %vm1131_vm5, %v7019_v38, 0.0  ;;  %5744 = vmatprep.subr.mxu1 %v6398_v28 }
 0xea0   : > { %2786 = vadd.xlane.f32.xlu0 %v2785_v39  ;;  %5745 = vmatpush3.msra.mxu1 %v2969_v13 }
 0xea1   : > { %5746 = vmatprep.subr.mxu1 %v6398_v28 }
 0xea2   : > { %5747 = vmatpush3.msra.mxu1 %v2968_v14 }
 0xea3   : > { %5748 = vmatprep.subr.mxu1 %v6398_v28 }
 0xea4   : > { %5749 = vmatpush3.msra.mxu1 %v2967_v15 }
 0xea5   : > { %5750 = vmatprep.subr.mxu1 %v6398_v28 }
 0xea6   : > { %5751 = vmatpush3.msra.mxu1 %v2966_v19 }
 0xea7   : > { %5752 = vmatprep.subr.mxu1 %v6398_v28 }
 0xea8   : > { %5753 = vmatpush3.msra.mxu1 %v2965_v23 }
 0xea9   : > { %5754 = vmatprep.subr.mxu1 %v6398_v28 }
 0xeaa   : > { %5755 = vmatpush3.msra.mxu1 %v2964_v24 }
 0xeab   : > { %5756 = vmatprep.subr.mxu1 %v6398_v28 }
 0xeac   : > { %5757 = vmatpush3.msra.mxu1 %v2963_v26 }
 0xead   : > { %5784 = vmatprep.subr.mxu1 %v6398_v28 }
 0xf21   : > { %v2781_v40 = vpop.xlane.xlu1 %2780 }
 0xf22   : > { %v2788_v41 = vmul.f32 0.03125, %v2781_v40 }
 0xf24   : > { %v2791_v42 = vsub.f32 %v7009_v21, %v2788_v41 }
 0xf25   : > { %v2784_v43 = vpop.xlane.xlu0 %2783 }
 0xf26   : > { %v2789_v44 = vmul.f32 0.03125, %v2784_v43  ;;  %v2794_v45 = vmul.f32 %v2791_v42, %v2791_v42 }
 0xf28   : > { %v2792_v46 = vsub.f32 %v7014_v31, %v2789_v44  ;;  %v2797_v47 = vsel %vm1131_vm5, %v2794_v45, 0.0 }
 0xf29   : > { %2798 = vadd.xlane.f32.xlu0 %v2797_v47  ;;  %v2787_v48 = vpop.xlane.xlu0 %2786 }
 0xf2a   : > { %v2790_v49 = vmul.f32 0.03125, %v2787_v48  ;;  %v2795_v18 = vmul.f32 %v2792_v46, %v2792_v46 }
 0xf2c   : > { %v2793_v50 = vsub.f32 %v7019_v38, %v2790_v49  ;;  %v2800_v17 = vsel %vm1131_vm5, %v2795_v18, 0.0 }
 0xf2d   : > { %2801 = vadd.xlane.f32.xlu1 %v2800_v17 }
 0xf2e   : > { %v2796_v51 = vmul.f32 %v2793_v50, %v2793_v50 }
 0xf30   : > { %v2803_v52 = vsel %vm1131_vm5, %v2796_v51, 0.0 }
 0xf31   : > { %2804 = vadd.xlane.f32.xlu0 %v2803_v52 }
 0xfb2   : > { %v2799_v56 = vpop.xlane.xlu0 %2798 }
 0xfb3   : > { %v2806_v57 = vmul.f32 0.03125, %v2799_v56 }
 0xfb5   : > { %v2809_v58 = vadd.f32 1e-05, %v2806_v57 }
 0xfb6   : > { %v2802_v59 = vpop.xlane.xlu1 %2801 }
 0xfb7   : > { %6166 = vrsqrt.f32 %v2809_v58  ;;  %v2807_v60 = vmul.f32 0.03125, %v2802_v59 }
 0xfb9   : > { %v2810_v61 = vadd.f32 1e-05, %v2807_v60 }
 0xfba   : > { %v2805_v62 = vpop.xlane.xlu0 %2804 }
 0xfbb   : > { %6168 = vrsqrt.f32 %v2810_v61  ;;  %v2808_v16 = vmul.f32 0.03125, %v2805_v62 }
 0xfbd   : > { %v2811_v20 = vadd.f32 1e-05, %v2808_v16 }
 0xfbf   : > { %6170 = vrsqrt.f32 %v2811_v20 }
 0xfc4   : > { %v6167_v25 = vpop.eup %6166 }
 0xfc5   : > { %v2815_v0 = vmul.f32 %v6167_v25, %v2791_v42  ;;  %v5226_v25 = vld [vmem:[%s7653_s19] ss:$0 sm:$0xff] }
 0xfc7   : > { %v2824_v2 = vmul.f32 %v5220_v63, %v2815_v0 }
 0xfc8   : > { %v6169_v3 = vpop.eup %6168 }
 0xfc9   : > { %v2833_v4 = vadd.f32 %v5221_v1, %v2824_v2  ;;  %v2816_v5 = vmul.f32 %v6169_v3, %v2792_v46 }
 0xfcb   : > { %5734 = vmatmul.mubr.msk.f32.vlgmr.msra.gmra.mxu0 %vm1131_vm5, %v2833_v4  ;;  %v2825_v6 = vmul.f32 %v5220_v63, %v2816_v5 }
 0xfcc   : > { %v6171_v7 = vpop.eup %6170  ;;  %5736 = vmatprep.mubr.msk.f32.mxu0 %vm6399_vm3, %v6398_v28 }
 0xfcd   : > { %v2834_v8 = vadd.f32 %v5221_v1, %v2825_v6  ;;  %v2817_v9 = vmul.f32 %v6171_v7, %v2793_v50 }
 0xfcf   : > { %5737 = vmatmul.mubr.msk.f32.gmra.mxu0 %vm1131_vm5, %v2834_v8  ;;  %v2826_v10 = vmul.f32 %v5220_v63, %v2817_v9 }
 0xfd0   : > { %5739 = vmatprep.mubr.msk.f32.mxu0 %vm6399_vm3, %v6398_v28 }
 0xfd1   : > { %v2835_v11 = vadd.f32 %v5221_v1, %v2826_v10 }
 0xfd3   : > { %5740 = vmatmul.mubr.msk.f32.gmra.mxu0 %vm1131_vm5, %v2835_v11 }
 0xfd4   : > { %5775 = vmatprep.mubr.msk.f32.mxu0 %vm6399_vm3, %v6398_v28 }
0x108b   : > { %v2922_v29 = vpop.f32.mrf.mxu0 }
0x108c   : > { %v2923_v30 = vadd.f32 %v5222_v27, %v2922_v29 }
0x108d   : > { %v5735_v32 = vpop.f32.mrf.mxu0 }
0x108e   : > { %v2936_v34 = vmul.f32 %v2923_v30, %v2923_v30 }
0x108f   : > { %v2927_v35 = vpop.f32.mrf.mxu0 }
0x1090   : > { %v2939_v36 = vmul.f32 %v2936_v34, %v2923_v30  ;;  %v2928_v37 = vadd.f32 %v5222_v27, %v2927_v35 }
0x1091   : > { %v5738_v39 = vpop.f32.mrf.mxu0 }
0x1092   : > { %v2942_v40 = vmul.f32 0.044715, %v2939_v36  ;;  %v2937_v41 = vmul.f32 %v2928_v37, %v2928_v37  ;;  %v5237_v36 = vld [vmem:[%s7642_s12 + $0x38] sm:$0xff]  ;;  %v5235_v39 = vld [vmem:[%s7642_s12 + $0x28] sm:$0xff] }
0x1093   : > { %v2932_v42 = vpop.f32.mrf.mxu0  ;;  %5768 = vmatpush3.msra.mxu0 %v5237_v36 }
0x1094   : > { %v2945_v43 = vadd.f32 %v2942_v40, %v2923_v30  ;;  %v2940_v44 = vmul.f32 %v2937_v41, %v2928_v37  ;;  %v2933_v45 = vadd.f32 %v5222_v27, %v2932_v42  ;;  %5769 = vmatprep.subr.mxu0 %v6398_v28  ;;  %v5234_v40 = vld [vmem:[%s7642_s12 + $0x20] sm:$0xff] }
0x1095   : > { %v5741_v46 = vpop.f32.mrf.mxu0 }
0x1096   : > { %v2948_v47 = vmul.f32 0.7978846, %v2945_v43  ;;  %v2943_v48 = vmul.f32 0.044715, %v2940_v44  ;;  %v2938_v49 = vmul.f32 %v2933_v45, %v2933_v45 }
0x1098   : > { %6172 = vtanh.f32 %v2948_v47  ;;  %v2946_v18 = vadd.f32 %v2943_v48, %v2928_v37  ;;  %v2941_v50 = vmul.f32 %v2938_v49, %v2933_v45 }
0x109a   : > { %v2949_v17 = vmul.f32 0.7978846, %v2946_v18  ;;  %v2944_v51 = vmul.f32 0.044715, %v2941_v50  ;;  %v5232_v50 = vld [vmem:[%s7643_s15 + $0x1] ss:$0 sm:$0xff] }
0x109b   : > { %s7656_s15 = smov 120  }
0x109c   : > { %6174 = vtanh.f32 %v2949_v17  ;;  %v2947_v52 = vadd.f32 %v2944_v51, %v2933_v45  ;;  %v5233_v51 = vld [vmem:[%s7644_s6 + $0x1] ss:$0 sm:$0xff]  ;;  %s7654_s6 = smov 96  }
0x109e   : > { %v2950_v22 = vmul.f32 0.7978846, %v2947_v52 }
0x10a0   : > { %6176 = vtanh.f32 %v2950_v22 }
0x10a5   : > { %v6173_v53 = vpop.eup %6172 }
0x10a6   : > { %v2954_v54 = vadd.f32 1.0, %v6173_v53 }
0x10a8   : > { %v2957_v55 = vmul.f32 0.5, %v2954_v54 }
0x10a9   : > { %v6175_v56 = vpop.eup %6174 }
0x10aa   : > { %v2960_v57 = vmul.f32 %v2957_v55, %v2923_v30  ;;  %v2955_v58 = vadd.f32 1.0, %v6175_v56 }
0x10ac   : > { %5759 = vmatmul.mubr.msk.f32.vlgmr.msra.gmra.mxu1 %vm2978_vm11, %v2960_v57  ;;  %v2958_v59 = vmul.f32 0.5, %v2955_v58 }
0x10ad   : > { %v6177_v60 = vpop.eup %6176  ;;  %5761 = vmatprep.mubr.msk.f32.mxu1 %vm6399_vm3, %v6398_v28 }
0x10ae   : > { %v2961_v61 = vmul.f32 %v2958_v59, %v2928_v37  ;;  %v2956_v62 = vadd.f32 1.0, %v6177_v60  ;;  %v5236_v37 = vld [vmem:[%s7642_s12 + $0x30] sm:$0xff]  ;;  %s7655_s12 = smov 88  }
0x10af   : > { %5770 = vmatpush3.msra.mxu0 %v5236_v37 }
0x10b0   : > { %5762 = vmatmul.mubr.msk.f32.gmra.mxu1 %vm2978_vm11, %v2961_v61  ;;  %v2959_v16 = vmul.f32 0.5, %v2956_v62  ;;  %5771 = vmatprep.subr.mxu0 %v6398_v28 }
0x10b1   : > { %5764 = vmatprep.mubr.msk.f32.mxu1 %vm6399_vm3, %v6398_v28  ;;  %5772 = vmatpush3.msra.mxu0 %v5235_v39 }
0x10b2   : > { %v2962_v20 = vmul.f32 %v2959_v16, %v2933_v45  ;;  %5773 = vmatprep.subr.mxu0 %v6398_v28 }
0x10b3   : > { %5774 = vmatpush3.msra.mxu0 %v5234_v40 }
0x10b4   : > { %5765 = vmatmul.mubr.msk.f32.gmra.mxu1 %vm2978_vm11, %v2962_v20  ;;  %5799 = vmatprep.subr.mxu0 %v6398_v28 }
0x10b5   : > { %5790 = vmatprep.mubr.msk.f32.mxu1 %vm6399_vm3, %v6398_v28 }
0x116c   : > { %v3054_v63 = vpop.f32.mrf.mxu1 }
0x116d   : > { %v3055_v0 = vadd.f32 %v5226_v25, %v3054_v63 }
0x116e   : > { %v5760_v1 = vpop.f32.mrf.mxu1 }
0x116f   : > { %v7076_v2 = vadd.f32 %v3055_v0, %v7009_v21 }
0x1170   : > { %v3059_v3 = vpop.f32.mrf.mxu1 }
0x1171   : > { %v3060_v4 = vadd.f32 %v5226_v25, %v3059_v3  ;;  %v3075_v5 = vsel %vm1131_vm5, %v7076_v2, 0.0 }
0x1172   : > { %3076 = vadd.xlane.f32.xlu1 %v3075_v5  ;;  %v5763_v6 = vpop.f32.mrf.mxu1 }
0x1173   : > { %v7081_v7 = vadd.f32 %v3060_v4, %v7014_v31 }
0x1174   : > { %v3064_v8 = vpop.f32.mrf.mxu1 }
0x1175   : > { %v3065_v9 = vadd.f32 %v5226_v25, %v3064_v8  ;;  %v3078_v10 = vsel %vm1131_vm5, %v7081_v7, 0.0 }
0x1176   : > { %3079 = vadd.xlane.f32.xlu0 %v3078_v10  ;;  %v5766_v11 = vpop.f32.mrf.mxu1 }
0x1177   : > { %v7086_v21 = vadd.f32 %v3065_v9, %v7019_v38 }
0x1179   : > { %v3081_v12 = vsel %vm1131_vm5, %v7086_v21, 0.0 }
0x117a   : > { %3082 = vadd.xlane.f32.xlu1 %v3081_v12 }
0x11fb   : > { %v3077_v13 = vpop.xlane.xlu1 %3076 }
0x11fc   : > { %v3084_v14 = vmul.f32 0.03125, %v3077_v13 }
0x11fe   : > { %v3087_v15 = vsub.f32 %v7076_v2, %v3084_v14 }
0x11ff   : > { %v3080_v31 = vpop.xlane.xlu0 %3079 }
0x1200   : > { %v3085_v19 = vmul.f32 0.03125, %v3080_v31  ;;  %v3090_v23 = vmul.f32 %v3087_v15, %v3087_v15 }
0x1202   : > { %v3088_v24 = vsub.f32 %v7081_v7, %v3085_v19  ;;  %v3093_v26 = vsel %vm1131_vm5, %v3090_v23, 0.0 }
0x1203   : > { %3094 = vadd.xlane.f32.xlu0 %v3093_v26  ;;  %v3083_v38 = vpop.xlane.xlu1 %3082 }
0x1204   : > { %v3086_v27 = vmul.f32 0.03125, %v3083_v38  ;;  %v3091_v29 = vmul.f32 %v3088_v24, %v3088_v24 }
0x1206   : > { %v3089_v30 = vsub.f32 %v7086_v21, %v3086_v27  ;;  %v3096_v32 = vsel %vm1131_vm5, %v3091_v29, 0.0 }
0x1207   : > { %3097 = vadd.xlane.f32.xlu1 %v3096_v32 }
0x1208   : > { %v3092_v34 = vmul.f32 %v3089_v30, %v3089_v30 }
0x120a   : > { %v3099_v35 = vsel %vm1131_vm5, %v3092_v34, 0.0 }
0x120b   : > { %3100 = vadd.xlane.f32.xlu0 %v3099_v35 }
0x128c   : > { %v3095_v41 = vpop.xlane.xlu0 %3094 }
0x128d   : > { %v3102_v42 = vmul.f32 0.03125, %v3095_v41 }
0x128f   : > { %v3105_v43 = vadd.f32 1e-05, %v3102_v42 }
0x1290   : > { %v3098_v44 = vpop.xlane.xlu1 %3097 }
0x1291   : > { %6178 = vrsqrt.f32 %v3105_v43  ;;  %v3103_v45 = vmul.f32 0.03125, %v3098_v44 }
0x1293   : > { %v3106_v46 = vadd.f32 1e-05, %v3103_v45 }
0x1294   : > { %v3101_v47 = vpop.xlane.xlu0 %3100 }
0x1295   : > { %6180 = vrsqrt.f32 %v3106_v46  ;;  %v3104_v48 = vmul.f32 0.03125, %v3101_v47 }
0x1297   : > { %v3107_v49 = vadd.f32 1e-05, %v3104_v48 }
0x1299   : > { %6182 = vrsqrt.f32 %v3107_v49 }
0x129e   : > { %v6179_v18 = vpop.eup %6178 }
0x129f   : > { %v3111_v17 = vmul.f32 %v6179_v18, %v3087_v15 }
0x12a1   : > { %v3120_v52 = vmul.f32 %v5232_v50, %v3111_v17 }
0x12a2   : > { %v6181_v22 = vpop.eup %6180 }
0x12a3   : > { %v3129_v53 = vadd.f32 %v5233_v51, %v3120_v52  ;;  %v3112_v54 = vmul.f32 %v6181_v22, %v3088_v24 }
0x12a5   : > { %5776 = vmatmul.mubr.msk.f32.vlgmr.msra.gmra.mxu0 %vm1131_vm5, %v3129_v53  ;;  %v3121_v55 = vmul.f32 %v5232_v50, %v3112_v54 }
0x12a6   : > { %v6183_v56 = vpop.eup %6182  ;;  %5778 = vmatprep.mubr.msk.f32.mxu0 %vm6399_vm3, %v6398_v28 }
0x12a7   : > { %v3130_v57 = vadd.f32 %v5233_v51, %v3121_v55  ;;  %v3113_v58 = vmul.f32 %v6183_v56, %v3089_v30 }
0x12a9   : > { %5779 = vmatmul.mubr.msk.f32.gmra.mxu0 %vm1131_vm5, %v3130_v57  ;;  %v3122_v59 = vmul.f32 %v5232_v50, %v3113_v58 }
0x12aa   : > { %5781 = vmatprep.mubr.msk.f32.mxu0 %vm6399_vm3, %v6398_v28 }
0x12ab   : > { %v3131_v60 = vadd.f32 %v5233_v51, %v3122_v59 }
0x12ad   : > { %5782 = vmatmul.mubr.msk.f32.gmra.mxu0 %vm1131_vm5, %v3131_v60 }
0x12ae   : > { %5805 = vmatprep.mubr.msk.f32.mxu0 %vm6399_vm3, %v6398_v28 }
0x1365   : > { %v7115_v61 = vpop.f32.mrf.mxu0 }
0x1367   : > { %v5777_v62 = vpop.f32.mrf.mxu0 }
0x1369   : > { %v7117_v16 = vpop.f32.mrf.mxu0 }
0x136a   : > { %3236 = vrot.lane.b32.xlu0 %v7117_v16, %s7654_s6 }
0x136b   : > { %v5780_v20 = vpop.f32.mrf.mxu0 }
0x136d   : > { %v7121_v25 = vpop.f32.mrf.mxu0 }
0x136e   : > { %3472 = vrot.lane.b32.xlu0 %v7115_v61, %s7655_s12  ;;  %3238 = vrot.lane.b32.xlu1 %v7121_v25, %s7654_s6 }
0x136f   : > { %v5783_v63 = vpop.f32.mrf.mxu0 }
0x1372   : > { %3468 = vrot.lane.b32.xlu0 %v7117_v16, %s7656_s15  ;;  %3234 = vrot.lane.b32.xlu1 %v7115_v61, %s7654_s6  ;;  %s7657_s6 = smov 64  }
0x1376   : > { %3476 = vrot.lane.b32.xlu1 %v7121_v25, %s7655_s12 }
0x137a   : > { %3474 = vrot.lane.b32.xlu1 %v7117_v16, %s7655_s12  ;;  %s7658_s12 = smov 56  }
0x137e   : > { %3466 = vrot.lane.b32.xlu1 %v7115_v61, %s7656_s15 }
0x1382   : > { %3470 = vrot.lane.b32.xlu1 %v7121_v25, %s7656_s15  ;;  %s7659_s15 = smov 80  }
0x13dc   : > { %v3237_v1 = vpop.permute.xlu0 %3236 }
0x13e0   : > { %v3239_v0 = vpop.permute.xlu1 %3238  ;;  %v3473_v6 = vpop.permute.xlu0 %3472 }
0x13e1   : > { %5785 = vmatpush3.xpose.msk.msra.mxu1 %vm1458_vm8, %v3239_v0 }
0x13e2   : > { %5786 = vmatprep.subr.mxu1 %v6398_v28 }
0x13e4   : > { %v3235_v3 = vpop.permute.xlu1 %3234  ;;  %v3469_v9 = vpop.permute.xlu0 %3468 }
0x13e5   : > { %5787 = vmatpush3.xpose.msk.msra.mxu1 %vm1458_vm8, %v3237_v1 }
0x13e6   : > { %5788 = vmatprep.subr.mxu1 %v6398_v28 }
0x13e8   : > { %v3477_v4 = vpop.permute.xlu1 %3476 }
0x13e9   : > { %5789 = vmatpush3.xpose.msk.msra.mxu1 %vm1458_vm8, %v3235_v3 }
0x13ea   : > { %5814 = vmatprep.subr.mxu1 %v6398_v28 }
0x13ec   : > { %5791 = vmatmul.mubr.msk.f32.vlgmr.msra.gmra.mxu1 %vm1458_vm8, %v7115_v61  ;;  %v3475_v5 = vpop.permute.xlu1 %3474 }
0x13ed   : > { %5815 = vmatpush3.xpose.msk.msra.mxu1 %vm1458_vm8, %v3477_v4  ;;  %5793 = vmatprep.mubr.msk.f32.mxu1 %vm6399_vm3, %v6398_v28 }
0x13ee   : > { %5816 = vmatprep.subr.mxu1 %v6398_v28 }
0x13f0   : > { %5794 = vmatmul.mubr.msk.f32.gmra.mxu1 %vm1458_vm8, %v7117_v16  ;;  %v3467_v8 = vpop.permute.xlu1 %3466 }
0x13f1   : > { %5817 = vmatpush3.xpose.msk.msra.mxu1 %vm1458_vm8, %v3475_v5  ;;  %5796 = vmatprep.mubr.msk.f32.mxu1 %vm6399_vm3, %v6398_v28 }
0x13f2   : > { %5818 = vmatprep.subr.mxu1 %v6398_v28 }
0x13f4   : > { %5797 = vmatmul.mubr.msk.f32.gmra.mxu1 %vm1458_vm8, %v7121_v25  ;;  %v3471_v10 = vpop.permute.xlu1 %3470 }
0x13f5   : > { %5819 = vmatpush3.xpose.msk.msra.mxu1 %vm1458_vm8, %v3473_v6  ;;  %5820 = vmatprep.mubr.msk.f32.mxu1 %vm6399_vm3, %v6398_v28 }
0x13f6   : > { %5844 = vmatprep.subr.mxu1 %v6398_v28 }
0x13f8   : > { %5821 = vmatmul.mubr.msk.f32.vlgmr.msra.gmra.mxu1 %vm1458_vm8, %v3467_v8 }
0x13f9   : > { %5823 = vmatprep.mubr.msk.f32.mxu1 %vm6399_vm3, %v6398_v28 }
0x13fc   : > { %5824 = vmatmul.mubr.msk.f32.gmra.mxu1 %vm1458_vm8, %v3469_v9 }
0x13fd   : > { %5826 = vmatprep.mubr.msk.f32.mxu1 %vm6399_vm3, %v6398_v28 }
0x1400   : > { %5827 = vmatmul.mubr.msk.f32.gmra.mxu1 %vm1458_vm8, %v3471_v10 }
0x1401   : > { %5846 = vmatprep.mubr.msk.f32.mxu1 %vm6399_vm3, %v6398_v28 }
0x14ac   : > { %v3318_v11 = vpop.f32.mrf.mxu1 }
0x14ad   : > { %v3332_v12 = vsel %vm1292_vm9, %v3318_v11, -1e+30 }
0x14ae   : > { %v5792_v13 = vpop.f32.mrf.mxu1  ;;  %v3335_v14 = vsel %vm1556_vm10, %v3332_v12, -inf }
0x14af   : > { %3336 = vmax.xlane.f32.xlu0 %v3335_v14 }
0x14b0   : > { %v3323_v15 = vpop.f32.mrf.mxu1 }
0x14b1   : > { %v3333_v31 = vsel %vm1292_vm9, %v3323_v15, -1e+30 }
0x14b2   : > { %v5795_v19 = vpop.f32.mrf.mxu1  ;;  %v3338_v23 = vsel %vm1556_vm10, %v3333_v31, -inf }
0x14b3   : > { %3339 = vmax.xlane.f32.xlu1 %v3338_v23 }
0x14b4   : > { %v3328_v24 = vpop.f32.mrf.mxu1 }
0x14b5   : > { %v3334_v26 = vsel %vm1292_vm9, %v3328_v24, -1e+30 }
0x14b6   : > { %v5798_v38 = vpop.f32.mrf.mxu1  ;;  %v3341_v27 = vsel %vm1556_vm10, %v3334_v26, -inf }
0x14b7   : > { %3342 = vmax.xlane.f32.xlu0 %v3341_v27 }
0x14b8   : > { %v3556_v29 = vpop.f32.mrf.mxu1 }
0x14b9   : > { %v3570_v30 = vsel %vm1292_vm9, %v3556_v29, -1e+30 }
0x14ba   : > { %v5822_v32 = vpop.f32.mrf.mxu1  ;;  %v3573_v34 = vsel %vm1556_vm10, %v3570_v30, -inf }
0x14bb   : > { %3574 = vmax.xlane.f32.xlu0 %v3573_v34 }
0x14bc   : > { %v3561_v35 = vpop.f32.mrf.mxu1 }
0x14bd   : > { %v3571_v36 = vsel %vm1292_vm9, %v3561_v35, -1e+30 }
0x14be   : > { %v3576_v37 = vsel %vm1556_vm10, %v3571_v36, -inf  ;;  %v5825_v39 = vpop.f32.mrf.mxu1 }
0x14bf   : > { %3577 = vmax.xlane.f32.xlu0 %v3576_v37 }
0x14c0   : > { %v3566_v40 = vpop.f32.mrf.mxu1 }
0x14c1   : > { %v3572_v41 = vsel %vm1292_vm9, %v3566_v40, -1e+30 }
0x14c2   : > { %v3579_v42 = vsel %vm1556_vm10, %v3572_v41, -inf  ;;  %v5828_v43 = vpop.f32.mrf.mxu1 }
0x14c3   : > { %3580 = vmax.xlane.f32.xlu1 %v3579_v42  ;;  %v5241_v42 = vld [vmem:[%s7645_s2 + $0x20] sm:$0xff]  ;;  %v5242_v43 = vld [vmem:[%s7645_s2 + $0x28] sm:$0xff] }
0x14c4   : > { %5845 = vmatpush3.msra.mxu1 %v5242_v43 }
0x14c5   : > { %5866 = vmatprep.subr.mxu1 %v6398_v28 }
0x14d4   : > { %3370 = vrot.lane.b32.xlu1 %v7117_v16, %s7657_s6 }
0x14d5   : > { %3372 = vrot.lane.b32.xlu0 %v7121_v25, %s7657_s6 }
0x14d8   : > { %3368 = vrot.lane.b32.xlu1 %v7115_v61, %s7657_s6  ;;  %s7660_s6 = smov 112  }
0x14dc   : > { %3610 = vrot.lane.b32.xlu1 %v7121_v25, %s7658_s12 }
0x1538   : > { %v3337_v44 = vpop.xlane.xlu0 %3336 }
0x1539   : > { %v3344_v45 = vsub.f32 %v3332_v12, %v3337_v44 }
0x153b   : > { %v3347_v46 = vmul.f32 1.442695, %v3344_v45 }
0x153c   : > { %v3340_v47 = vpop.xlane.xlu1 %3339 }
0x153d   : > { %6184 = vpow2.f32 %v3347_v46  ;;  %v3345_v48 = vsub.f32 %v3333_v31, %v3340_v47 }
0x153f   : > { %v3349_v49 = vmul.f32 1.442695, %v3345_v48 }
0x1540   : > { %v3343_v18 = vpop.xlane.xlu0 %3342 }
0x1541   : > { %6186 = vpow2.f32 %v3349_v49  ;;  %v3346_v50 = vsub.f32 %v3334_v26, %v3343_v18 }
0x1543   : > { %v3351_v17 = vmul.f32 1.442695, %v3346_v50 }
0x1544   : > { %v3575_v51 = vpop.xlane.xlu0 %3574 }
0x1545   : > { %6188 = vpow2.f32 %v3351_v17  ;;  %v3582_v52 = vsub.f32 %v3570_v30, %v3575_v51 }
0x1547   : > { %v3585_v22 = vmul.f32 1.442695, %v3582_v52 }
0x1548   : > { %v3578_v53 = vpop.xlane.xlu0 %3577 }
0x1549   : > { %6190 = vpow2.f32 %v3585_v22  ;;  %v3583_v54 = vsub.f32 %v3571_v36, %v3578_v53 }
0x154a   : > { %v6185_v55 = vpop.eup %6184 }
0x154b   : > { %v3587_v56 = vmul.f32 1.442695, %v3583_v54  ;;  %v3353_v57 = vsel %vm1556_vm10, %v6185_v55, 0.0 }
0x154c   : > { %3354 = vadd.xlane.f32.xlu0 %v3353_v57  ;;  %v3373_v58 = vpop.permute.xlu0 %3372  ;;  %v3581_v59 = vpop.xlane.xlu1 %3580 }
0x154d   : > { %6192 = vpow2.f32 %v3587_v56  ;;  %v3584_v60 = vsub.f32 %v3572_v41, %v3581_v59  ;;  %5800 = vmatpush3.msra.mxu0 %v3373_v58 }
0x154e   : > { %v6187_v62 = vpop.eup %6186  ;;  %5801 = vmatprep.subr.mxu0 %v6398_v28 }
0x154f   : > { %v3589_v20 = vmul.f32 1.442695, %v3584_v60  ;;  %v3356_v63 = vsel %vm1556_vm10, %v6187_v62, 0.0 }
0x1550   : > { %3357 = vadd.xlane.f32.xlu1 %v3356_v63  ;;  %v3371_v0 = vpop.permute.xlu1 %3370 }
0x1551   : > { %6194 = vpow2.f32 %v3589_v20  ;;  %5802 = vmatpush3.msra.mxu0 %v3371_v0 }
0x1552   : > { %v6189_v1 = vpop.eup %6188  ;;  %5803 = vmatprep.subr.mxu0 %v6398_v28 }
0x1553   : > { %v3359_v3 = vsel %vm1556_vm10, %v6189_v1, 0.0 }
0x1554   : > { %3360 = vadd.xlane.f32.xlu0 %v3359_v3  ;;  %v3369_v4 = vpop.permute.xlu1 %3368 }
0x1555   : > { %5804 = vmatpush3.msra.mxu0 %v3369_v4 }
0x1556   : > { %v6191_v5 = vpop.eup %6190  ;;  %5829 = vmatprep.subr.mxu0 %v6398_v28 }
0x1557   : > { %v3591_v6 = vsel %vm1556_vm10, %v6191_v5, 0.0 }
0x1558   : > { %3592 = vadd.xlane.f32.xlu1 %v3591_v6  ;;  %v3611_v12 = vpop.permute.xlu1 %3610 }
0x155a   : > { %v6193_v8 = vpop.eup %6192 }
0x155b   : > { %v3594_v9 = vsel %vm1556_vm10, %v6193_v8, 0.0 }
0x155c   : > { %3595 = vadd.xlane.f32.xlu0 %v3594_v9 }
0x155e   : > { %v6195_v10 = vpop.eup %6194 }
0x155f   : > { %v3597_v11 = vsel %vm1556_vm10, %v6195_v10, 0.0 }
0x1560   : > { %3598 = vadd.xlane.f32.xlu1 %v3597_v11 }
0x1571   : > { %3606 = vrot.lane.b32.xlu1 %v7115_v61, %s7658_s12 }
0x1572   : > { %3608 = vrot.lane.b32.xlu0 %v7117_v16, %s7658_s12  ;;  %s7661_s12 = smov 48  }
0x1575   : > { %3890 = vrot.lane.b32.xlu1 %v7117_v16, %s7659_s15 }
0x1576   : > { %3892 = vrot.lane.b32.xlu0 %v7121_v25, %s7659_s15 }
0x1579   : > { %3882 = vrot.lane.b32.xlu1 %v7115_v61, %s7660_s6 }
0x157a   : > { %3888 = vrot.lane.b32.xlu0 %v7115_v61, %s7659_s15  ;;  %s7662_s15 = smov 104  }
0x157d   : > { %3886 = vrot.lane.b32.xlu1 %v7121_v25, %s7660_s6 }
0x157e   : > { %3884 = vrot.lane.b32.xlu0 %v7117_v16, %s7660_s6  ;;  %s7664_s6 = sld [smem:[#allocation32_spill]] }
0x15d5   : > { %v3355_v13 = vpop.xlane.xlu0 %3354 }
0x15d6   : > { %6196 = vrcp.f32 %v3355_v13 }
0x15d9   : > { %v3358_v14 = vpop.xlane.xlu1 %3357 }
0x15da   : > { %6198 = vrcp.f32 %v3358_v14 }
0x15dd   : > { %v3361_v15 = vpop.xlane.xlu0 %3360 }
0x15de   : > { %6200 = vrcp.f32 %v3361_v15 }
0x15e1   : > { %v3593_v31 = vpop.xlane.xlu1 %3592 }
0x15e2   : > { %6202 = vrcp.f32 %v3593_v31 }
0x15e3   : > { %v6197_v19 = vpop.eup %6196 }
0x15e4   : > { %v3365_v23 = vmul.f32 %v6197_v19, %v6185_v55 }
0x15e5   : > { %v3596_v24 = vpop.xlane.xlu0 %3595 }
0x15e6   : > { %6204 = vrcp.f32 %v3596_v24  ;;  %5806 = vmatmul.mubr.msk.f32.vlgmr.msra.gmra.mxu0 %vm1556_vm10, %v3365_v23 }
0x15e7   : > { %v6199_v26 = vpop.eup %6198  ;;  %5830 = vmatpush3.msra.mxu0 %v3611_v12  ;;  %5808 = vmatprep.mubr.msk.f32.mxu0 %vm6399_vm3, %v6398_v28 }
0x15e8   : > { %5831 = vmatprep.subr.mxu0 %v6398_v28  ;;  %v3366_v38 = vmul.f32 %v6199_v26, %v6187_v62 }
0x15e9   : > { %v3609_v27 = vpop.permute.xlu0 %3608  ;;  %v3599_v29 = vpop.xlane.xlu1 %3598 }
0x15ea   : > { %6206 = vrcp.f32 %v3599_v29  ;;  %5809 = vmatmul.mubr.msk.f32.gmra.mxu0 %vm1556_vm10, %v3366_v38 }
0x15eb   : > { %v6201_v30 = vpop.eup %6200  ;;  %5832 = vmatpush3.msra.mxu0 %v3609_v27  ;;  %5811 = vmatprep.mubr.msk.f32.mxu0 %vm6399_vm3, %v6398_v28 }
0x15ec   : > { %5833 = vmatprep.subr.mxu0 %v6398_v28  ;;  %v3367_v32 = vmul.f32 %v6201_v30, %v6189_v1 }
0x15ed   : > { %v3607_v34 = vpop.permute.xlu1 %3606  ;;  %v3893_v50 = vpop.permute.xlu0 %3892 }
0x15ee   : > { %5812 = vmatmul.mubr.msk.f32.gmra.mxu0 %vm1556_vm10, %v3367_v32 }
0x15ef   : > { %v6203_v35 = vpop.eup %6202  ;;  %5834 = vmatpush3.msra.mxu0 %v3607_v34  ;;  %5835 = vmatprep.mubr.msk.f32.mxu0 %vm6399_vm3, %v6398_v28 }
0x15f0   : > { %v3603_v36 = vmul.f32 %v6203_v35, %v6191_v5  ;;  %5855 = vmatprep.subr.mxu0 %v6398_v28 }
0x15f1   : > { %v3891_v52 = vpop.permute.xlu1 %3890  ;;  %v3889_v54 = vpop.permute.xlu0 %3888 }
0x15f2   : > { %5836 = vmatmul.mubr.msk.f32.vlgmr.msra.gmra.mxu0 %vm1556_vm10, %v3603_v36 }
0x15f3   : > { %v6205_v37 = vpop.eup %6204  ;;  %5838 = vmatprep.mubr.msk.f32.mxu0 %vm6399_vm3, %v6398_v28  ;;  %5856 = vmatpush3.msra.mxu0 %v5241_v42 }
0x15f4   : > { %v3604_v39 = vmul.f32 %v6205_v37, %v6193_v8  ;;  %5881 = vmatprep.subr.mxu0 %v6398_v28 }
0x15f5   : > { %v3883_v56 = vpop.permute.xlu1 %3882  ;;  %v3885_v57 = vpop.permute.xlu0 %3884 }
0x15f6   : > { %5839 = vmatmul.mubr.msk.f32.gmra.mxu0 %vm1556_vm10, %v3604_v39 }
0x15f7   : > { %v6207_v40 = vpop.eup %6206  ;;  %5841 = vmatprep.mubr.msk.f32.mxu0 %vm6399_vm3, %v6398_v28 }
0x15f8   : > { %v3605_v41 = vmul.f32 %v6207_v40, %v6195_v10 }
0x15f9   : > { %v3887_v58 = vpop.permute.xlu1 %3886 }
0x15fa   : > { %5842 = vmatmul.mubr.msk.f32.gmra.mxu0 %vm1556_vm10, %v3605_v41 }
0x15fb   : > { %5857 = vmatprep.mubr.msk.f32.mxu0 %vm6399_vm3, %v6398_v28 }
0x16a6   : > { %v3452_v44 = vpop.f32.mrf.mxu0 }
0x16a7   : > { %5858 = vmatmul.mubr.msk.f32.vlgmr.msra.gmra.mxu0 %vm1458_vm8, %v3452_v44 }
0x16a8   : > { %v5807_v45 = vpop.f32.mrf.mxu0  ;;  %5860 = vmatprep.mubr.msk.f32.mxu0 %vm6399_vm3, %v6398_v28 }
0x16aa   : > { %v3457_v46 = vpop.f32.mrf.mxu0 }
0x16ab   : > { %5861 = vmatmul.mubr.msk.f32.gmra.mxu0 %vm1458_vm8, %v3457_v46 }
0x16ac   : > { %v5810_v47 = vpop.f32.mrf.mxu0  ;;  %5863 = vmatprep.mubr.msk.f32.mxu0 %vm6399_vm3, %v6398_v28 }
0x16ae   : > { %v3462_v48 = vpop.f32.mrf.mxu0 }
0x16af   : > { %5864 = vmatmul.mubr.msk.f32.gmra.mxu0 %vm1458_vm8, %v3462_v48 }
0x16b0   : > { %v5813_v49 = vpop.f32.mrf.mxu0  ;;  %5887 = vmatprep.mubr.msk.f32.mxu0 %vm6399_vm3, %v6398_v28 }
0x16b2   : > { %v3690_v18 = vpop.f32.mrf.mxu0 }
0x16b3   : > { %5847 = vmatmul.mubr.msk.f32.vlgmr.msra.gmra.mxu1 %vm1458_vm8, %v3690_v18 }
0x16b4   : > { %5867 = vmatpush3.xpose.msk.msra.mxu1 %vm1458_vm8, %v3893_v50  ;;  %v5837_v17 = vpop.f32.mrf.mxu0  ;;  %5849 = vmatprep.mubr.msk.f32.mxu1 %vm6399_vm3, %v6398_v28 }
0x16b5   : > { %5868 = vmatprep.subr.mxu1 %v6398_v28 }
0x16b6   : > { %v3695_v51 = vpop.f32.mrf.mxu0 }
0x16b7   : > { %5850 = vmatmul.mubr.msk.f32.gmra.mxu1 %vm1458_vm8, %v3695_v51 }
0x16b8   : > { %5869 = vmatpush3.xpose.msk.msra.mxu1 %vm1458_vm8, %v3891_v52  ;;  %v5840_v22 = vpop.f32.mrf.mxu0  ;;  %5852 = vmatprep.mubr.msk.f32.mxu1 %vm6399_vm3, %v6398_v28 }
0x16b9   : > { %5870 = vmatprep.subr.mxu1 %v6398_v28 }
0x16ba   : > { %v3700_v53 = vpop.f32.mrf.mxu0 }
0x16bb   : > { %5853 = vmatmul.mubr.msk.f32.gmra.mxu1 %vm1458_vm8, %v3700_v53 }
0x16bc   : > { %5871 = vmatpush3.xpose.msk.msra.mxu1 %vm1458_vm8, %v3889_v54  ;;  %v5843_v55 = vpop.f32.mrf.mxu0  ;;  %5872 = vmatprep.mubr.msk.f32.mxu1 %vm6399_vm3, %v6398_v28 }
0x16bd   : > { %5896 = vmatprep.subr.mxu1 %v6398_v28 }
0x16bf   : > { %5873 = vmatmul.mubr.msk.f32.vlgmr.msra.gmra.mxu1 %vm1458_vm8, %v3883_v56 }
0x16c0   : > { %5875 = vmatprep.mubr.msk.f32.mxu1 %vm6399_vm3, %v6398_v28 }
0x16c3   : > { %5876 = vmatmul.mubr.msk.f32.gmra.mxu1 %vm1458_vm8, %v3885_v57 }
0x16c4   : > { %5878 = vmatprep.mubr.msk.f32.mxu1 %vm6399_vm3, %v6398_v28 }
0x16c7   : > { %5879 = vmatmul.mubr.msk.f32.gmra.mxu1 %vm1458_vm8, %v3887_v58 }
0x16c8   : > { %5898 = vmatprep.mubr.msk.f32.mxu1 %vm6399_vm3, %v6398_v28 }
0x1767   : > { %v3868_v59 = vpop.f32.mrf.mxu0 }
0x1769   : > { %v5859_v60 = vpop.f32.mrf.mxu0 }
0x176b   : > { %v3873_v62 = vpop.f32.mrf.mxu0 }
0x176d   : > { %v5862_v20 = vpop.f32.mrf.mxu0 }
0x176f   : > { %v3878_v63 = vpop.f32.mrf.mxu0 }
0x1771   : > { %v5865_v0 = vpop.f32.mrf.mxu0 }
0x1773   : > { %v3779_v1 = vpop.f32.mrf.mxu1 }
0x1774   : > { %v7281_v3 = vadd.f32 %v3868_v59, %v3779_v1 }
0x1775   : > { %v5848_v4 = vpop.f32.mrf.mxu1 }
0x1777   : > { %v3784_v5 = vpop.f32.mrf.mxu1 }
0x1778   : > { %v7283_v6 = vadd.f32 %v3873_v62, %v3784_v5 }
0x1779   : > { %v5851_v8 = vpop.f32.mrf.mxu1 }
0x177b   : > { %v3789_v9 = vpop.f32.mrf.mxu1 }
0x177c   : > { %v7285_v10 = vadd.f32 %v3878_v63, %v3789_v9  ;;  %v5243_v63 = vld [vmem:[%s7645_s2 + $0x30] sm:$0xff] }
0x177d   : > { %v5854_v11 = vpop.f32.mrf.mxu1  ;;  %5897 = vmatpush3.msra.mxu1 %v5243_v63 }
0x177e   : > { %5922 = vmatprep.subr.mxu1 %v6398_v28 }
0x177f   : > { %v3972_v12 = vpop.f32.mrf.mxu1 }
0x1780   : > { %v3986_v13 = vsel %vm1292_vm9, %v3972_v12, -1e+30 }
0x1781   : > { %v3989_v14 = vsel %vm1556_vm10, %v3986_v13, -inf  ;;  %v5874_v15 = vpop.f32.mrf.mxu1 }
0x1782   : > { %3990 = vmax.xlane.f32.xlu0 %v3989_v14 }
0x1783   : > { %v3977_v31 = vpop.f32.mrf.mxu1 }
0x1784   : > { %v3987_v19 = vsel %vm1292_vm9, %v3977_v31, -1e+30 }
0x1785   : > { %v3992_v23 = vsel %vm1556_vm10, %v3987_v19, -inf  ;;  %v5877_v24 = vpop.f32.mrf.mxu1 }
0x1786   : > { %3993 = vmax.xlane.f32.xlu1 %v3992_v23 }
0x1787   : > { %v3982_v26 = vpop.f32.mrf.mxu1 }
0x1788   : > { %v3988_v38 = vsel %vm1292_vm9, %v3982_v26, -1e+30 }
0x1789   : > { %v3995_v27 = vsel %vm1556_vm10, %v3988_v38, -inf  ;;  %v5880_v29 = vpop.f32.mrf.mxu1 }
0x178a   : > { %3996 = vmax.xlane.f32.xlu0 %v3995_v27 }
0x1797   : > { %4024 = vrot.lane.b32.xlu1 %v7117_v16, %s7661_s12 }
0x179b   : > { %4022 = vrot.lane.b32.xlu1 %v7115_v61, %s7661_s12 }
0x179f   : > { %4222 = vrot.lane.b32.xlu1 %v7121_v25, %s7646_s8 }
0x17a0   : > { %4026 = vrot.lane.b32.xlu0 %v7121_v25, %s7661_s12  ;;  %s7665_s12 = sld [smem:[#allocation30_spill]] }
0x17a3   : > { %4218 = vrot.lane.b32.xlu1 %v7115_v61, %s7646_s8 }
0x180b   : > { %v3991_v30 = vpop.xlane.xlu0 %3990 }
0x180c   : > { %v3998_v32 = vsub.f32 %v3986_v13, %v3991_v30 }
0x180e   : > { %v4001_v34 = vmul.f32 1.442695, %v3998_v32 }
0x180f   : > { %v3994_v35 = vpop.xlane.xlu1 %3993 }
0x1810   : > { %6208 = vpow2.f32 %v4001_v34  ;;  %v3999_v36 = vsub.f32 %v3987_v19, %v3994_v35 }
0x1812   : > { %v4003_v37 = vmul.f32 1.442695, %v3999_v36 }
0x1813   : > { %v3997_v39 = vpop.xlane.xlu0 %3996  ;;  %v4025_v41 = vpop.permute.xlu1 %4024 }
0x1814   : > { %6210 = vpow2.f32 %v4003_v37  ;;  %v4000_v40 = vsub.f32 %v3988_v38, %v3997_v39 }
0x1816   : > { %v4005_v42 = vmul.f32 1.442695, %v4000_v40 }
0x1817   : > { %v4027_v43 = vpop.permute.xlu0 %4026  ;;  %v4023_v44 = vpop.permute.xlu1 %4022 }
0x1818   : > { %6212 = vpow2.f32 %v4005_v42  ;;  %5882 = vmatpush3.msra.mxu0 %v4027_v43 }
0x1819   : > { %5883 = vmatprep.subr.mxu0 %v6398_v28 }
0x181a   : > { %5884 = vmatpush3.msra.mxu0 %v4025_v41 }
0x181b   : > { %5885 = vmatprep.subr.mxu0 %v6398_v28  ;;  %v4223_v50 = vpop.permute.xlu1 %4222 }
0x181c   : > { %5886 = vmatpush3.msra.mxu0 %v4023_v44 }
0x181d   : > { %v6209_v45 = vpop.eup %6208  ;;  %5907 = vmatprep.subr.mxu0 %v6398_v28 }
0x181e   : > { %v4007_v46 = vsel %vm1556_vm10, %v6209_v45, 0.0 }
0x181f   : > { %4008 = vadd.xlane.f32.xlu0 %v4007_v46  ;;  %v4219_v51 = vpop.permute.xlu1 %4218 }
0x1821   : > { %v6211_v47 = vpop.eup %6210 }
0x1822   : > { %v4010_v48 = vsel %vm1556_vm10, %v6211_v47, 0.0 }
0x1823   : > { %4011 = vadd.xlane.f32.xlu0 %v4010_v48 }
0x1825   : > { %v6213_v49 = vpop.eup %6212 }
0x1826   : > { %v4013_v18 = vsel %vm1556_vm10, %v6213_v49, 0.0 }
0x1827   : > { %4014 = vadd.xlane.f32.xlu1 %v4013_v18 }
0x1838   : > { %4214 = vrot.lane.b32.xlu1 %v7117_v16, %s7662_s15 }
0x1839   : > { %4220 = vrot.lane.b32.xlu0 %v7117_v16, %s7646_s8  ;;  %s7663_s8 = smov 40  }
0x183d   : > { %4212 = vrot.lane.b32.xlu0 %v7115_v61, %s7662_s15 }
0x1841   : > { %4216 = vrot.lane.b32.xlu0 %v7121_v25, %s7662_s15  ;;  %s7666_s15 = sld [smem:[#allocation31_spill]] }
0x18a8   : > { %v4009_v17 = vpop.xlane.xlu0 %4008 }
0x18a9   : > { %6214 = vrcp.f32 %v4009_v17 }
0x18ac   : > { %v4012_v52 = vpop.xlane.xlu0 %4011 }
0x18ad   : > { %6216 = vrcp.f32 %v4012_v52 }
0x18b0   : > { %v4015_v22 = vpop.xlane.xlu1 %4014  ;;  %v4221_v57 = vpop.permute.xlu0 %4220 }
0x18b1   : > { %6218 = vrcp.f32 %v4015_v22  ;;  %v5244_v22 = vld [vmem:[%s7645_s2 + $0x38] sm:$0xff]  ;;  %s4960_s2 = sand.u32 1, %s6601_s0  }
0x18b4   : > { %v4213_v60 = vpop.permute.xlu0 %4212  ;;  %v4215_v62 = vpop.permute.xlu1 %4214 }
0x18b6   : > { %v6215_v53 = vpop.eup %6214 }
0x18b7   : > { %v4019_v54 = vmul.f32 %v6215_v53, %v6209_v45 }
0x18b8   : > { %v4217_v20 = vpop.permute.xlu0 %4216 }
0x18b9   : > { %5888 = vmatmul.mubr.msk.f32.vlgmr.msra.gmra.mxu0 %vm1556_vm10, %v4019_v54 }
0x18ba   : > { %v6217_v55 = vpop.eup %6216  ;;  %5908 = vmatpush3.xpose.msk.msra.mxu0 %vm1458_vm8, %v4223_v50  ;;  %5890 = vmatprep.mubr.msk.f32.mxu0 %vm6399_vm3, %v6398_v28 }
0x18bb   : > { %5909 = vmatprep.subr.mxu0 %v6398_v28  ;;  %v4020_v56 = vmul.f32 %v6217_v55, %v6211_v47 }
0x18bd   : > { %5891 = vmatmul.mubr.msk.f32.gmra.mxu0 %vm1556_vm10, %v4020_v56 }
0x18be   : > { %v6219_v58 = vpop.eup %6218  ;;  %5910 = vmatpush3.xpose.msk.msra.mxu0 %vm1458_vm8, %v4221_v57  ;;  %5893 = vmatprep.mubr.msk.f32.mxu0 %vm6399_vm3, %v6398_v28 }
0x18bf   : > { %5911 = vmatprep.subr.mxu0 %v6398_v28  ;;  %v4021_v59 = vmul.f32 %v6219_v58, %v6213_v49 }
0x18c1   : > { %5894 = vmatmul.mubr.msk.f32.gmra.mxu0 %vm1556_vm10, %v4021_v59 }
0x18c2   : > { %5912 = vmatpush3.xpose.msk.msra.mxu0 %vm1458_vm8, %v4219_v51  ;;  %5913 = vmatprep.mubr.msk.f32.mxu0 %vm6399_vm3, %v6398_v28 }
0x18c3   : > { %5937 = vmatprep.subr.mxu0 %v6398_v28 }
0x18c5   : > { %5914 = vmatmul.mubr.msk.f32.vlgmr.msra.gmra.mxu0 %vm1458_vm8, %v4213_v60 }
0x18c6   : > { %5916 = vmatprep.mubr.msk.f32.mxu0 %vm6399_vm3, %v6398_v28  ;;  %5938 = vmatpush3.msra.mxu0 %v5244_v22 }
0x18c7   : > { %5965 = vmatprep.subr.mxu0 %v6398_v28 }
0x18c9   : > { %5917 = vmatmul.mubr.msk.f32.gmra.mxu0 %vm1458_vm8, %v4215_v62 }
0x18ca   : > { %5919 = vmatprep.mubr.msk.f32.mxu0 %vm6399_vm3, %v6398_v28 }
0x18cd   : > { %5920 = vmatmul.mubr.msk.f32.gmra.mxu0 %vm1458_vm8, %v4217_v20 }
0x18ce   : > { %5939 = vmatprep.mubr.msk.f32.mxu0 %vm6399_vm3, %v6398_v28 }
0x1979   : > { %v4106_v0 = vpop.f32.mrf.mxu0 }
0x197a   : > { %5899 = vmatmul.mubr.msk.f32.vlgmr.msra.gmra.mxu1 %vm1458_vm8, %v4106_v0 }
0x197b   : > { %v5889_v1 = vpop.f32.mrf.mxu0  ;;  %5901 = vmatprep.mubr.msk.f32.mxu1 %vm6399_vm3, %v6398_v28 }
0x197d   : > { %v4111_v4 = vpop.f32.mrf.mxu0 }
0x197e   : > { %5902 = vmatmul.mubr.msk.f32.gmra.mxu1 %vm1458_vm8, %v4111_v4 }
0x197f   : > { %v5892_v5 = vpop.f32.mrf.mxu0  ;;  %5904 = vmatprep.mubr.msk.f32.mxu1 %vm6399_vm3, %v6398_v28 }
0x1980   : > { %v5294_v5 = vld [vmem:[%s7647_s3 + $0x1] ss:$0 sm:$0xff]  ;;  %s7486_s3 = sshll.u32 %s6601_s0, 4 }
0x1981   : > { %v4116_v8 = vpop.f32.mrf.mxu0 }
0x1982   : > { %5905 = vmatmul.mubr.msk.f32.gmra.mxu1 %vm1458_vm8, %v4116_v8 }
0x1983   : > { %v5895_v9 = vpop.f32.mrf.mxu0  ;;  %5928 = vmatprep.mubr.msk.f32.mxu1 %vm6399_vm3, %v6398_v28 }
0x1985   : > { %v4302_v11 = vpop.f32.mrf.mxu0 }
0x1986   : > { %v4316_v12 = vsel %vm1292_vm9, %v4302_v11, -1e+30 }
0x1987   : > { %v4319_v13 = vsel %vm1556_vm10, %v4316_v12, -inf  ;;  %v5915_v14 = vpop.f32.mrf.mxu0 }
0x1988   : > { %4320 = vmax.xlane.f32.xlu1 %v4319_v13 }
0x1989   : > { %v4307_v15 = vpop.f32.mrf.mxu0 }
0x198a   : > { %v4317_v31 = vsel %vm1292_vm9, %v4307_v15, -1e+30 }
0x198b   : > { %v4322_v19 = vsel %vm1556_vm10, %v4317_v31, -inf  ;;  %v5918_v23 = vpop.f32.mrf.mxu0 }
0x198c   : > { %4323 = vmax.xlane.f32.xlu0 %v4322_v19 }
0x198d   : > { %v4312_v24 = vpop.f32.mrf.mxu0 }
0x198e   : > { %v4318_v26 = vsel %vm1292_vm9, %v4312_v24, -1e+30 }
0x198f   : > { %v4325_v38 = vsel %vm1556_vm10, %v4318_v26, -inf  ;;  %v5921_v27 = vpop.f32.mrf.mxu0 }
0x1990   : > { %4326 = vmax.xlane.f32.xlu0 %v4325_v38 }
0x1999   : > { %4356 = vrot.lane.b32.xlu1 %v7121_v25, %s7663_s8 }
0x1a11   : > { %v4321_v29 = vpop.xlane.xlu1 %4320 }
0x1a12   : > { %v4328_v30 = vsub.f32 %v4316_v12, %v4321_v29 }
0x1a14   : > { %v4331_v32 = vmul.f32 1.442695, %v4328_v30 }
0x1a15   : > { %v4357_v34 = vpop.permute.xlu1 %4356  ;;  %v4324_v35 = vpop.xlane.xlu0 %4323 }
0x1a16   : > { %6220 = vpow2.f32 %v4331_v32  ;;  %v4329_v36 = vsub.f32 %v4317_v31, %v4324_v35  ;;  %5923 = vmatpush3.msra.mxu1 %v4357_v34 }
0x1a17   : > { %5924 = vmatprep.subr.mxu1 %v6398_v28 }
0x1a18   : > { %v4333_v37 = vmul.f32 1.442695, %v4329_v36 }
0x1a19   : > { %v4327_v33 = vpop.xlane.xlu0 %4326 }
0x1a1a   : > { %6222 = vpow2.f32 %v4333_v37  ;;  %v4330_v39 = vsub.f32 %v4318_v26, %v4327_v33 }
0x1a1c   : > { %v4335_v40 = vmul.f32 1.442695, %v4330_v39 }
0x1a1e   : > { %6224 = vpow2.f32 %v4335_v40 }
0x1a23   : > { %v6221_v41 = vpop.eup %6220 }
0x1a24   : > { %v4337_v42 = vsel %vm1556_vm10, %v6221_v41, 0.0 }
0x1a25   : > { %4338 = vadd.xlane.f32.xlu0 %v4337_v42 }
0x1a27   : > { %v6223_v25 = vpop.eup %6222 }
0x1a28   : > { %v4340_v43 = vsel %vm1556_vm10, %v6223_v25, 0.0 }
0x1a29   : > { %4341 = vadd.xlane.f32.xlu1 %v4340_v43 }
0x1a2b   : > { %v6225_v44 = vpop.eup %6224 }
0x1a2c   : > { %v4343_v45 = vsel %vm1556_vm10, %v6225_v44, 0.0 }
0x1a2d   : > { %4344 = vadd.xlane.f32.xlu0 %v4343_v45  ;;  %v5301_v45 = vld [vmem:[%s7648_s5 + $0x30] sm:$0xff] }
0x1a3a   : > { %4352 = vrot.lane.b32.xlu1 %v7115_v61, %s7663_s8  ;;  %v4195_v46 = vpop.f32.mrf.mxu1 }
0x1a3b   : > { %v4209_v47 = vadd.f32 %v4195_v46, %v7281_v3  ;;  %v5300_v46 = vld [vmem:[%s7648_s5 + $0x28] sm:$0xff] }
0x1a3c   : > { %v5900_v48 = vpop.f32.mrf.mxu1 }
0x1a3e   : > { %v4200_v49 = vpop.f32.mrf.mxu1 }
0x1a3f   : > { %v4210_v18 = vadd.f32 %v4200_v49, %v7283_v6 }
0x1a40   : > { %v5903_v50 = vpop.f32.mrf.mxu1 }
0x1a42   : > { %v4205_v17 = vpop.f32.mrf.mxu1 }
0x1a43   : > { %v4211_v51 = vadd.f32 %v4205_v17, %v7285_v10  ;;  %4354 = vrot.lane.b32.xlu0 %v7117_v16, %s7663_s8  ;;  %s972_s8 = scalar_lea.vmem [#allocation6], %s6671_s18 }
0x1a44   : > { %v5906_v52 = vpop.f32.mrf.mxu1 }
0x1aae   : > { %v4339_v61 = vpop.xlane.xlu0 %4338 }
0x1aaf   : > { %6226 = vrcp.f32 %v4339_v61 }
0x1ab2   : > { %v4342_v53 = vpop.xlane.xlu1 %4341 }
0x1ab3   : > { %6228 = vrcp.f32 %v4342_v53 }
0x1ab6   : > { %v4345_v3 = vpop.xlane.xlu0 %4344  ;;  %v4353_v55 = vpop.permute.xlu1 %4352 }
0x1ab7   : > { %6230 = vrcp.f32 %v4345_v3  ;;  %v5297_v3 = vld [vmem:[%s7649_s9 + $0x1] ss:$0 sm:$0xff]  ;;  %s7496_s9 = scalar_lea.sflag [#allocation7], %s4960_s2 }
0x1aba   : > { %v4355_v54 = vpop.permute.xlu0 %4354 }
0x1abb   : > { %5925 = vmatpush3.msra.mxu1 %v4355_v54 }
0x1abc   : > { %v6227_v6 = vpop.eup %6226  ;;  %5926 = vmatprep.subr.mxu1 %v6398_v28 }
0x1abd   : > { %v4349_v10 = vmul.f32 %v6227_v6, %v6221_v41  ;;  %5927 = vmatpush3.msra.mxu1 %v4353_v55  ;;  %v5298_v6 = vld [vmem:[%s7650_s13 + $0x1] ss:$0 sm:$0xff]  ;;  %s6411_s13 = smov [#allocation6]  }
0x1abe   : > { %5948 = vmatprep.subr.mxu1 %v6398_v28 }
0x1abf   : > { %5929 = vmatmul.mubr.msk.f32.vlgmr.msra.gmra.mxu1 %vm1556_vm10, %v4349_v10 }
0x1ac0   : > { %v6229_v16 = vpop.eup %6228  ;;  %5931 = vmatprep.mubr.msk.f32.mxu1 %vm6399_vm3, %v6398_v28 }
0x1ac1   : > { %v4350_v56 = vmul.f32 %v6229_v16, %v6223_v25 }
0x1ac3   : > { %5932 = vmatmul.mubr.msk.f32.gmra.mxu1 %vm1556_vm10, %v4350_v56 }
0x1ac4   : > { %v6231_v57 = vpop.eup %6230  ;;  %5934 = vmatprep.mubr.msk.f32.mxu1 %vm6399_vm3, %v6398_v28 }
0x1ac5   : > { %v4351_v58 = vmul.f32 %v6231_v57, %v6225_v44  ;;  %v5302_v44 = vld [vmem:[%s7648_s5 + $0x38] sm:$0xff] }
0x1ac6   : > { %5949 = vmatpush3.msra.mxu1 %v5302_v44 }
0x1ac7   : > { %5935 = vmatmul.mubr.msk.f32.gmra.mxu1 %vm1556_vm10, %v4351_v58  ;;  %5950 = vmatprep.subr.mxu1 %v6398_v28 }
0x1ac8   : > { %5956 = vmatprep.mubr.msk.f32.mxu1 %vm6399_vm3, %v6398_v28  ;;  %5951 = vmatpush3.msra.mxu1 %v5301_v45 }
0x1ac9   : > { %5952 = vmatprep.subr.mxu1 %v6398_v28 }
0x1aca   : > { %5953 = vmatpush3.msra.mxu1 %v5300_v46 }
0x1acb   : > { %5954 = vmatprep.subr.mxu1 %v6398_v28 }
0x1b7f   : > { %v4436_v59 = vpop.f32.mrf.mxu1 }
0x1b80   : > { %5940 = vmatmul.mubr.msk.f32.vlgmr.msra.gmra.mxu0 %vm1458_vm8, %v4436_v59 }
0x1b81   : > { %v5930_v60 = vpop.f32.mrf.mxu1  ;;  %5942 = vmatprep.mubr.msk.f32.mxu0 %vm6399_vm3, %v6398_v28 }
0x1b83   : > { %v4441_v62 = vpop.f32.mrf.mxu1 }
0x1b84   : > { %5943 = vmatmul.mubr.msk.f32.gmra.mxu0 %vm1458_vm8, %v4441_v62 }
0x1b85   : > { %v5933_v20 = vpop.f32.mrf.mxu1  ;;  %5945 = vmatprep.mubr.msk.f32.mxu0 %vm6399_vm3, %v6398_v28 }
0x1b87   : > { %v4446_v63 = vpop.f32.mrf.mxu1 }
0x1b88   : > { %5946 = vmatmul.mubr.msk.f32.gmra.mxu0 %vm1458_vm8, %v4446_v63  ;;  %v5315_v63 = vld [vmem:[%s7651_s14 + $0x78] sm:$0xff] }
0x1b89   : > { %v5936_v0 = vpop.f32.mrf.mxu1  ;;  %5981 = vmatprep.mubr.msk.f32.mxu0 %vm6399_vm3, %v6398_v28  ;;  %5966 = vmatpush3.msra.mxu0 %v5315_v63 }
0x1b8a   : > { %5967 = vmatprep.subr.mxu0 %v6398_v28  ;;  %v5314_v0 = vld [vmem:[%s7651_s14 + $0x70] sm:$0xff] }
0x1b8b   : > { %5968 = vmatpush3.msra.mxu0 %v5314_v0 }
0x1b8c   : > { %5969 = vmatprep.subr.mxu0 %v6398_v28 }
0x1c40   : > { %v4525_v1 = vpop.f32.mrf.mxu0 }
0x1c41   : > { %v4539_v4 = vadd.f32 %v4525_v1, %v4209_v47  ;;  %v5299_v47 = vld [vmem:[%s7648_s5 + $0x20] sm:$0xff]  ;;  %v5313_v1 = vld [vmem:[%s7651_s14 + $0x68] sm:$0xff]  ;;  %s7490_s5 = scalar_lea.hbm %s7631_s16, %s7486_s3 }
0x1c42   : > { %v5941_v8 = vpop.f32.mrf.mxu0  ;;  %5955 = vmatpush3.msra.mxu1 %v5299_v47  ;;  %5970 = vmatpush3.msra.mxu0 %v5313_v1 }
0x1c43   : > { %v4542_v9 = vadd.f32 %v4539_v4, %v7076_v2  ;;  %5990 = vmatprep.subr.mxu1 %v6398_v28  ;;  %5971 = vmatprep.subr.mxu0 %v6398_v28  ;;  %v5312_v4 = vld [vmem:[%s7651_s14 + $0x60] sm:$0xff]  ;;  %v5310_v8 = vld [vmem:[%s7651_s14 + $0x50] sm:$0xff] }
0x1c44   : > { %v4530_v11 = vpop.f32.mrf.mxu0  ;;  %5972 = vmatpush3.msra.mxu0 %v5312_v4  ;;  %v4880_v4 = vld [vmem:[%s7664_s6 + $0x18] sm:$0xff] }
0x1c45   : > { %v7401_v12 = vadd.f32 %v5294_v5, %v4542_v9  ;;  %v4540_v13 = vadd.f32 %v4530_v11, %v4210_v18  ;;  %5973 = vmatprep.subr.mxu0 %v6398_v28  ;;  %v5309_v9 = vld [vmem:[%s7651_s14 + $0x48] sm:$0xff]  ;;  %v5308_v11 = vld [vmem:[%s7651_s14 + $0x40] sm:$0xff] }
0x1c46   : > { %v5944_v14 = vpop.f32.mrf.mxu0 }
0x1c47   : > { %v4543_v15 = vadd.f32 %v4540_v13, %v7081_v7  ;;  %v4560_v31 = vsel %vm1131_vm5, %v7401_v12, 0.0  ;;  %v5304_v13 = vld [vmem:[%s7652_s17 + $0x1] ss:$0 sm:$0xff] }
0x1c48   : > { %4561 = vadd.xlane.f32.xlu1 %v4560_v31  ;;  %v4535_v19 = vpop.f32.mrf.mxu0 }
0x1c49   : > { %v7406_v23 = vadd.f32 %v5294_v5, %v4543_v15  ;;  %v4541_v24 = vadd.f32 %v4535_v19, %v4211_v51 }
0x1c4a   : > { %v5947_v26 = vpop.f32.mrf.mxu0 }
0x1c4b   : > { %v4544_v38 = vadd.f32 %v4541_v24, %v7086_v21  ;;  %v4563_v2 = vsel %vm1131_vm5, %v7406_v23, 0.0 }
0x1c4c   : > { %4564 = vadd.xlane.f32.xlu0 %v4563_v2 }
0x1c4d   : > { %v7411_v27 = vadd.f32 %v5294_v5, %v4544_v38  ;;  %v5311_v5 = vld [vmem:[%s7651_s14 + $0x58] sm:$0xff]  ;;  %s6253_s14 = sshll.u32 %s6411_s13, 4  ;;  %s6254_s14 = int_to_ptr.vmem [resolvable:$false] %s6253_s14 }
0x1c4e   : > { %5974 = vmatpush3.msra.mxu0 %v5311_v5  ;;  %v4878_v5 = vld [vmem:[%s7664_s6 + $0x8] sm:$0xff]  ;;  %s6255_s0 = scalar_lea.vmem %s6254_s14, 32 }
0x1c4f   : > { %v4566_v7 = vsel %vm1131_vm5, %v7411_v27, 0.0  ;;  %5975 = vmatprep.subr.mxu0 %v6398_v28 }
0x1c50   : > { %4567 = vadd.xlane.f32.xlu0 %v4566_v7  ;;  %5976 = vmatpush3.msra.mxu0 %v5310_v8  ;;  %v4877_v8 = vld [vmem:[%s7664_s6] sm:$0xff] }
0x1c51   : > { %5977 = vmatprep.subr.mxu0 %v6398_v28 }
0x1c52   : > { %5978 = vmatpush3.msra.mxu0 %v5309_v9 }
0x1c53   : > { %5979 = vmatprep.subr.mxu0 %v6398_v28 }
0x1c54   : > { %5980 = vmatpush3.msra.mxu0 %v5308_v11 }
0x1cd1   : > { %v4562_v29 = vpop.xlane.xlu1 %4561 }
0x1cd2   : > { %v4569_v30 = vmul.f32 0.03125, %v4562_v29 }
0x1cd4   : > { %v4572_v32 = vsub.f32 %v7401_v12, %v4569_v30 }
0x1cd5   : > { %v4565_v34 = vpop.xlane.xlu0 %4564 }
0x1cd6   : > { %v4570_v35 = vmul.f32 0.03125, %v4565_v34  ;;  %v4575_v36 = vmul.f32 %v4572_v32, %v4572_v32 }
0x1cd8   : > { %v4573_v21 = vsub.f32 %v7406_v23, %v4570_v35  ;;  %v4578_v37 = vsel %vm1131_vm5, %v4575_v36, 0.0 }
0x1cd9   : > { %4579 = vadd.xlane.f32.xlu1 %v4578_v37  ;;  %v4568_v33 = vpop.xlane.xlu0 %4567 }
0x1cda   : > { %v4571_v39 = vmul.f32 0.03125, %v4568_v33  ;;  %v4576_v40 = vmul.f32 %v4573_v21, %v4573_v21 }
0x1cdc   : > { %v4574_v41 = vsub.f32 %v7411_v27, %v4571_v39  ;;  %v4581_v42 = vsel %vm1131_vm5, %v4576_v40, 0.0 }
0x1cdd   : > { %4582 = vadd.xlane.f32.xlu0 %v4581_v42 }
0x1cde   : > { %v4577_v25 = vmul.f32 %v4574_v41, %v4574_v41 }
0x1ce0   : > { %v4584_v43 = vsel %vm1131_vm5, %v4577_v25, 0.0 }
0x1ce1   : > { %4585 = vadd.xlane.f32.xlu1 %v4584_v43 }
0x1d62   : > { %v4580_v48 = vpop.xlane.xlu1 %4579 }
0x1d63   : > { %v4587_v49 = vmul.f32 0.03125, %v4580_v48 }
0x1d65   : > { %v4590_v18 = vadd.f32 1e-05, %v4587_v49 }
0x1d66   : > { %v4583_v50 = vpop.xlane.xlu0 %4582 }
0x1d67   : > { %6232 = vrsqrt.f32 %v4590_v18  ;;  %v4588_v17 = vmul.f32 0.03125, %v4583_v50 }
0x1d69   : > { %v4591_v51 = vadd.f32 1e-05, %v4588_v17 }
0x1d6a   : > { %v4586_v52 = vpop.xlane.xlu1 %4585 }
0x1d6b   : > { %6234 = vrsqrt.f32 %v4591_v51  ;;  %v4589_v22 = vmul.f32 0.03125, %v4586_v52 }
0x1d6d   : > { %v4592_v61 = vadd.f32 1e-05, %v4589_v22 }
0x1d6f   : > { %6236 = vrsqrt.f32 %v4592_v61  ;;  %v5317_v61 = vld [vmem:[%s7653_s19 + $0x1] ss:$0 sm:$0xff] }
0x1d74   : > { %v6233_v53 = vpop.eup %6232 }
0x1d75   : > { %v4596_v54 = vmul.f32 %v6233_v53, %v4572_v32 }
0x1d77   : > { %v4605_v55 = vmul.f32 %v5297_v3, %v4596_v54 }
0x1d78   : > { %v6235_v10 = vpop.eup %6234 }
0x1d79   : > { %v4614_v16 = vadd.f32 %v5298_v6, %v4605_v55  ;;  %v4597_v56 = vmul.f32 %v6235_v10, %v4573_v21 }
0x1d7b   : > { %5957 = vmatmul.mubr.msk.f32.vlgmr.msra.gmra.mxu1 %vm1131_vm5, %v4614_v16  ;;  %v4606_v57 = vmul.f32 %v5297_v3, %v4597_v56 }
0x1d7c   : > { %v6237_v58 = vpop.eup %6236  ;;  %5959 = vmatprep.mubr.msk.f32.mxu1 %vm6399_vm3, %v6398_v28  ;;  %5991 = vmatpush3.msra.mxu1 %v4880_v4 }
0x1d7d   : > { %v4615_v59 = vadd.f32 %v5298_v6, %v4606_v57  ;;  %v4598_v60 = vmul.f32 %v6237_v58, %v4574_v41  ;;  %5992 = vmatprep.subr.mxu1 %v6398_v28 }
0x1d7f   : > { %5960 = vmatmul.mubr.msk.f32.gmra.mxu1 %vm1131_vm5, %v4615_v59  ;;  %v4607_v62 = vmul.f32 %v5297_v3, %v4598_v60 }
0x1d80   : > { %5962 = vmatprep.mubr.msk.f32.mxu1 %vm6399_vm3, %v6398_v28 }
0x1d81   : > { %v4616_v20 = vadd.f32 %v5298_v6, %v4607_v62 }
0x1d83   : > { %5963 = vmatmul.mubr.msk.f32.gmra.mxu1 %vm1131_vm5, %v4616_v20 }
0x1d84   : > { %5998 = vmatprep.mubr.msk.f32.mxu1 %vm6399_vm3, %v6398_v28 }
0x1e3b   : > { %v4705_v14 = vpop.f32.mrf.mxu1 }
0x1e3c   : > { %v4706_v15 = vadd.f32 %v5304_v13, %v4705_v14 }
0x1e3d   : > { %v5958_v31 = vpop.f32.mrf.mxu1 }
0x1e3e   : > { %v4719_v19 = vmul.f32 %v4706_v15, %v4706_v15 }
0x1e3f   : > { %v4710_v24 = vpop.f32.mrf.mxu1 }
0x1e40   : > { %v4722_v26 = vmul.f32 %v4719_v19, %v4706_v15  ;;  %v4711_v38 = vadd.f32 %v5304_v13, %v4710_v24  ;;  %v4860_v19 = vld [vmem:[%s7666_s15] sm:$0x1] }
0x1e41   : > { %v5961_v2 = vpop.f32.mrf.mxu1 }
0x1e42   : > { %v4725_v7 = vmul.f32 0.044715, %v4722_v26  ;;  %v4720_v29 = vmul.f32 %v4711_v38, %v4711_v38 }
0x1e43   : > { %v4715_v30 = vpop.f32.mrf.mxu1 }
0x1e44   : > { %v4728_v32 = vadd.f32 %v4725_v7, %v4706_v15  ;;  %v4723_v34 = vmul.f32 %v4720_v29, %v4711_v38  ;;  %v4716_v35 = vadd.f32 %v5304_v13, %v4715_v30 }
0x1e45   : > { %v5964_v36 = vpop.f32.mrf.mxu1 }
0x1e46   : > { %v4731_v21 = vmul.f32 0.7978846, %v4728_v32  ;;  %v4726_v37 = vmul.f32 0.044715, %v4723_v34  ;;  %v4721_v33 = vmul.f32 %v4716_v35, %v4716_v35 }
0x1e48   : > { %6238 = vtanh.f32 %v4731_v21  ;;  %v4729_v39 = vadd.f32 %v4726_v37, %v4711_v38  ;;  %v4724_v40 = vmul.f32 %v4721_v33, %v4716_v35 }
0x1e4a   : > { %v4732_v41 = vmul.f32 0.7978846, %v4729_v39  ;;  %v4727_v42 = vmul.f32 0.044715, %v4724_v40 }
0x1e4c   : > { %6240 = vtanh.f32 %v4732_v41  ;;  %v4730_v25 = vadd.f32 %v4727_v42, %v4716_v35 }
0x1e4e   : > { %v4733_v43 = vmul.f32 0.7978846, %v4730_v25 }
0x1e50   : > { %6242 = vtanh.f32 %v4733_v43 }
0x1e55   : > { %v6239_v44 = vpop.eup %6238 }
0x1e56   : > { %v4737_v45 = vadd.f32 1.0, %v6239_v44 }
0x1e58   : > { %v4740_v46 = vmul.f32 0.5, %v4737_v45 }
0x1e59   : > { %v6241_v47 = vpop.eup %6240 }
0x1e5a   : > { %v4743_v48 = vmul.f32 %v4740_v46, %v4706_v15  ;;  %v4738_v49 = vadd.f32 1.0, %v6241_v47  ;;  %v4859_v15 = vld [vmem:[%s7665_s12] sm:$0x1]  ;;  %s7494_s12 = scalar_lea.hbm %s6567_s10, %s7486_s3 }
0x1e5c   : > { %5982 = vmatmul.mubr.msk.f32.vlgmr.msra.gmra.mxu0 %vm2978_vm11, %v4743_v48  ;;  %v4741_v18 = vmul.f32 0.5, %v4738_v49 }
0x1e5d   : > { %v6243_v50 = vpop.eup %6242  ;;  %5984 = vmatprep.mubr.msk.f32.mxu0 %vm6399_vm3, %v6398_v28 }
0x1e5e   : > { %v4744_v17 = vmul.f32 %v4741_v18, %v4711_v38  ;;  %v4739_v51 = vadd.f32 1.0, %v6243_v50 }
0x1e60   : > { %5985 = vmatmul.mubr.msk.f32.gmra.mxu0 %vm2978_vm11, %v4744_v17  ;;  %v4742_v52 = vmul.f32 0.5, %v4739_v51 }
0x1e61   : > { %5987 = vmatprep.mubr.msk.f32.mxu0 %vm6399_vm3, %v6398_v28 }
0x1e62   : > { %v4745_v22 = vmul.f32 %v4742_v52, %v4716_v35 }
0x1e64   : > { %5988 = vmatmul.mubr.msk.f32.gmra.mxu0 %vm2978_vm11, %v4745_v22 }
0x1f1c   : > { %v4838_v53 = vpop.f32.mrf.mxu0 }
0x1f1d   : > { %v4839_v3 = vadd.f32 %v5317_v61, %v4838_v53 }
0x1f1e   : > { %v5983_v54 = vpop.f32.mrf.mxu0 }
0x1f1f   : > { %v4852_v6 = vadd.f32 %v4839_v3, %v7401_v12 }
0x1f20   : > { %v4843_v55 = vpop.f32.mrf.mxu0 }
0x1f21   : > { %4855 = vst.msk [vmem:[#allocation2] sm:$0xff] %vm1131_vm5, %v4852_v6  ;;  %v4844_v10 = vadd.f32 %v5317_v61, %v4843_v55 }
0x1f22   : > { %v5986_v16 = vpop.f32.mrf.mxu0 }
0x1f23   : > { %v4853_v56 = vadd.f32 %v4844_v10, %v7406_v23 }
0x1f24   : > { %v4848_v57 = vpop.f32.mrf.mxu0 }
0x1f25   : > { %4856 = vst.msk [vmem:[#allocation2 + $0x8] sm:$0xff] %vm1131_vm5, %v4853_v56  ;;  %v4849_v58 = vadd.f32 %v5317_v61, %v4848_v57 }
0x1f26   : > { %v5989_v59 = vpop.f32.mrf.mxu0 }
0x1f27   : > { %v4854_v60 = vadd.f32 %v4849_v58, %v7411_v27  ;;  %v4879_v27 = vld [vmem:[%s7664_s6 + $0x10] sm:$0xff]  ;;  %s4990_s6 = sshll.u32 %s972_s8, 4  ;;  %s4991_s6 = int_to_ptr.vmem [resolvable:$true] %s4990_s6 }
0x1f28   : > { %5993 = vmatpush3.msra.mxu1 %v4879_v27  ;;  %s6249_s15 = scalar_lea.vmem %s4991_s6, 16  ;;  %p6256_p0 = scmp.lt.s32.totalorder %s4991_s6, %s6254_s14 }
0x1f29   : > { %4857 = vst.msk [vmem:[#allocation2 + $0x10] sm:$0xff] %vm1131_vm5, %v4854_v60  ;;  %5994 = vmatprep.subr.mxu1 %v6398_v28  ;;  %p6250_p11 = scmp.ne.s32.totalorder %s4991_s6, %s6249_s15  ;;  %p6257_p1 = scmp.lt.s32.totalorder %s6255_s0, %s6249_s15 }
0x1f2a   : > { %5995 = vmatpush3.msra.mxu1 %v4878_v5 }
0x1f2b   : > { %5996 = vmatprep.subr.mxu1 %v6398_v28  ;;  %p6251_p12 = pnand %p6250_p11, %p6620_p5  ;;  %p6258_p2 = por %p6257_p1, %p6256_p0 }
0x1f2c   : > { %5997 = vmatpush3.msra.mxu1 %v4877_v8 }
0x1f2d   : > { %p6252_p13 = pneg %p6251_p12 }
0x1f2f   : > { %p6259_p3 = pnand %p6258_p2, %p6252_p13 }
0x1f30   : > { %v4858_v12 = vld [vmem:[#allocation2 + $0x10] sm:$0x1] }
0x1f31   : > { %v4861_v62 = vsel %vm1269_vm6, %v4858_v12, 0.0 }
0x1f32   : > { %4862 = vadd.xlane.f32.xlu0 %v4861_v62 }
0x1fbb   : > { %v4863_v20 = vpop.xlane.xlu0 %4862 }
0x1fbc   : > { %v4864_v63 = vmul.f32 0.03125, %v4863_v20 }
0x1fbe   : > { %v4865_v23 = vsub.f32 %v4858_v12, %v4864_v63 }
0x1fc0   : > { %v4866_v0 = vmul.f32 %v4865_v23, %v4865_v23 }
0x1fc2   : > { %v4867_v1 = vsel %vm1269_vm6, %v4866_v0, 0.0 }
0x1fc3   : > { %4868 = vadd.xlane.f32.xlu1 %v4867_v1 }
0x204c   : > { %v4869_v9 = vpop.xlane.xlu1 %4868 }
0x204d   : > { %v4870_v11 = vmul.f32 0.03125, %v4869_v9 }
0x204f   : > { %v4871_v13 = vadd.f32 1e-05, %v4870_v11 }
0x2051   : > { %6244 = vrsqrt.f32 %v4871_v13 }
0x205e   : > { %v6245_v14 = vpop.eup %6244 }
0x205f   : > { %v4873_v31 = vmul.f32 %v6245_v14, %v4865_v23 }
0x2061   : > { %v4874_v24 = vmul.f32 %v4873_v31, %v4859_v15 }
0x2063   : > { %v4875_v26 = vadd.f32 %v4874_v24, %v4860_v19 }
0x2065   : > { %5999 = vmatmul.mubr.msk.f32.vlgmr.msra.gmra.mxu1 %vm1131_vm5, %v4875_v26  ;;  %4876 = vst.msk [vmem:[%s972_s8] sm:$0x1] %vm1269_vm6, %v4875_v26 }
0x2066   : > { %6262 = shalt.err (!%p6259_p3)
}
0x2067   : > { %s6263_s2 = scalar_lea.hbm %s7490_s5, 16  ;;  %s6267_s8 = scalar_lea.hbm %s7631_s16, 32 }
0x2068   : > { %p6264_p4 = scmp.ne.s32.totalorder %s7490_s5, %s6263_s2  ;;  %p6268_p9 = scmp.lt.s32.totalorder %s7490_s5, %s7631_s16 }
0x2069   : > { %p6269_p10 = scmp.lt.s32.totalorder %s6267_s8, %s6263_s2 }
0x206a   : > { %p6265_p7 = pnand %p6264_p4, %p6620_p5 }
0x206b   : > { %p6270_p11 = por %p6269_p10, %p6268_p9 }
0x206c   : > { %p6266_p8 = pneg %p6265_p7 }
0x206e   : > { %p6271_p12 = pnand %p6270_p11, %p6266_p8 }
0x2070   : > { %6274 = shalt.err (!%p6271_p12)
}
0x2071   : > { %6008 = dma.vmem_to_hbm [thread:$0]  (%p6620_p5), %s4991_s6, 16, %s7490_s5, %s7496_s9  }
0x2072   : > { %s7667_s13 = scalar_lea.vmem [#allocation4], %s6671_s18  ;;  %s4957_s15 = scalar_lea.sflag [#allocation5], %s6671_s18 }
0x2073   : > { %s4977_s14 = sshll.u32 %s7667_s13, 4  ;;  %s6412_s2 = smov [#allocation4]   ;;  %s4978_s14 = int_to_ptr.vmem [resolvable:$true] %s4977_s14 }
0x2074   : > { %s6275_s0 = scalar_lea.vmem %s4978_s14, 16  ;;  %s6279_s8 = sshll.u32 %s6412_s2, 4  ;;  %s6280_s8 = int_to_ptr.vmem [resolvable:$false] %s6279_s8 }
0x2075   : > { %p6276_p13 = scmp.ne.s32.totalorder %s4978_s14, %s6275_s0  ;;  %s6281_s16 = scalar_lea.vmem %s6280_s8, 32 }
0x2076   : > { %p6282_p2 = scmp.lt.s32.totalorder %s4978_s14, %s6280_s8  ;;  %p6283_p3 = scmp.lt.s32.totalorder %s6281_s16, %s6275_s0 }
0x2077   : > { %p6277_p0 = pnand %p6276_p13, %p6620_p5 }
0x2078   : > { %p6284_p4 = por %p6283_p3, %p6282_p2 }
0x2079   : > { %p6278_p1 = pneg %p6277_p0 }
0x207b   : > { %p6285_p7 = pnand %p6284_p4, %p6278_p1 }
0x207d   : > { %6288 = shalt.err (!%p6285_p7)
}
0x207e   : > { %s6289_s5 = scalar_lea.hbm %s7494_s12, 16  ;;  %s6293_s6 = scalar_lea.hbm %s6567_s10, 32 }
0x207f   : > { %p6290_p8 = scmp.ne.s32.totalorder %s7494_s12, %s6289_s5  ;;  %p6294_p11 = scmp.lt.s32.totalorder %s7494_s12, %s6567_s10 }
0x2080   : > { %p6295_p12 = scmp.lt.s32.totalorder %s6293_s6, %s6289_s5 }
0x2081   : > { %p6291_p9 = pnand %p6290_p8, %p6620_p5 }
0x2082   : > { %p6296_p13 = por %p6295_p12, %p6294_p11 }
0x2083   : > { %p6292_p10 = pneg %p6291_p9 }
0x2085   : > { %p6297_p0 = pnand %p6296_p13, %p6292_p10 }
0x2087   : > { %6300 = shalt.err (!%p6297_p0)
}
0x2088   : > { %6007 = dma.vmem_to_hbm [thread:$0]  (%p6620_p5), %s4978_s14, 16, %s7494_s12, %s4957_s15   ;;  %v4881_v28 = vld [vmem:[%s6562_s4] sm:$0x1] }
0x2089   : > { %s978_s16 = scalar_lea.vmem [#allocation8], %s6671_s18  ;;  %s5001_s0 = scalar_lea.hbm %s6577_s23, %s7486_s3 }
0x208a   : > { %s5003_s13 = sshll.u32 %s978_s16, 4  ;;  %s6413_s8 = smov [#allocation8]   ;;  %s5004_s13 = int_to_ptr.vmem [resolvable:$true] %s5003_s13 }
0x208b   : > { %s6301_s2 = scalar_lea.vmem %s5004_s13, 16  ;;  %s6305_s5 = sshll.u32 %s6413_s8, 4  ;;  %s6306_s5 = int_to_ptr.vmem [resolvable:$false] %s6305_s5 }
0x208c   : > { %p6302_p1 = scmp.ne.s32.totalorder %s5004_s13, %s6301_s2  ;;  %s6307_s6 = scalar_lea.vmem %s6306_s5, 32 }
0x208d   : > { %p6308_p4 = scmp.lt.s32.totalorder %s5004_s13, %s6306_s5  ;;  %p6309_p7 = scmp.lt.s32.totalorder %s6307_s6, %s6301_s2 }
0x208e   : > { %p6303_p2 = pnand %p6302_p1, %p6620_p5 }
0x208f   : > { %p6310_p8 = por %p6309_p7, %p6308_p4 }
0x2090   : > { %p6304_p3 = pneg %p6303_p2 }
0x2092   : > { %p6311_p9 = pnand %p6310_p8, %p6304_p3 }
0x2125   : > { %v4951_v38 = vpop.f32.mrf.mxu1 }
0x2126   : > { %v4952_v2 = vadd.f32 %v4951_v38, %v4881_v28 }
0x2127   : > { %v6000_v7 = vpop.f32.mrf.mxu1 }
0x2128   : > { %4955 = vst.msk [vmem:[%s978_s16] sm:$0x1] %vm1176_vm1, %v4952_v2 }
0x2129   : > { %6314 = shalt.err (!%p6311_p9)
}
0x212a   : > { %s6315_s18 = scalar_lea.hbm %s5001_s0, 16  ;;  %s6319_s3 = scalar_lea.hbm %s6577_s23, 32 }
0x212b   : > { %p6316_p10 = scmp.ne.s32.totalorder %s5001_s0, %s6315_s18  ;;  %p6320_p13 = scmp.lt.s32.totalorder %s5001_s0, %s6577_s23 }
0x212c   : > { %p6321_p0 = scmp.lt.s32.totalorder %s6319_s3, %s6315_s18 }
0x212d   : > { %p6317_p11 = pnand %p6316_p10, %p6620_p5 }
0x212e   : > { %p6322_p1 = por %p6321_p0, %p6320_p13 }
0x212f   : > { %p6318_p12 = pneg %p6317_p11 }
0x2131   : > { %p6323_p2 = pnand %p6322_p1, %p6318_p12 }
0x2133   : > { %6326 = shalt.err (!%p6323_p2)
}
0x2134   : > { %6009 = dma.vmem_to_hbm [thread:$0]  (%p6620_p5), %s5004_s13, 16, %s5001_s0, %s7496_s9  }
0x2135 PF: > { %p6023_p3 = scmp.ge.s32.totalorder %s6365_s27, 2  ;;  %s5015_s12 = sand.u32 1, %s6353_s1  }
0x2136   : > { %s5016_s14 = scalar_lea.sflag [#allocation5], %s5015_s12 }
0x2137   : > { %p6014_p4 = pnand %p6023_p3, %p6624_p6 }
0x2139   : > { %p6015_p7 = pneg %p6014_p4 }
0x213b   : > { %6344 = dma.done.wait (%p6015_p7), %s5016_s14, 16  }
0x213c   : > { %6346 = vsyncadd (%p6015_p7), %s5016_s14, 4294967280  ;;  %s7668_s15 = sadd.s32 4294967294, %s6365_s27  }
0x213d   : > { %s5023_s16 = sand.u32 1, %s7668_s15  }
0x213e   : > { %s5024_s2 = scalar_lea.sflag [#allocation7], %s5023_s16 }
0x213f   : > { %6348 = dma.done.wait (%p6015_p7), %s5024_s2, 32  }
0x2140   : > { %6350 = vsyncadd (%p6015_p7), %s5024_s2, 4294967264  ;;  %p78_p5 = scmp.ge.s32.totalorder %s6605_s28, 4   ;;  %s7669_s1 = smov %s6357_s22 }
0x2141   : > { %s7670_s22 = smov %s6361_s26  ;;  %s7671_s26 = smov %s6618_s7 }
0x2142   : > { %s7672_s27 = smov %s6605_s28  ;;  %80 = sbr.rel (!%p78_p5) target bundleno = 67 (0x43), region = 248 }
0x2147   :  { %5036 = vsyncpa [#allocation5], 1 }
0x2148   :  { %5038 = vsyncpa [#allocation5 + $0x1], 1 }
0x2149   :  { %5039 = vsyncpa [#allocation7], 1 }
0x214a   :  { %5041 = vsyncpa [#allocation7 + $0x1], 1 }

</bundles_post_ra>
